<compile_context>
chip_gen: v6e
topology: v6e:2x2x1
jax: 0.10.0
libtpu: 0.0.40
codegen_flags: <defaults>
</compile_context>

<pallas_src>
import functools

import jax
import jax.numpy as jnp
from jax import lax
from jax.experimental import pallas as pl
from jax.experimental.pallas import tpu as pltpu


def _sigmoid(x):
    # sigmoid(x) = 0.5 * tanh(0.5 x) + 0.5 : single EUP op (no exp + recip).
    return 0.5 * jnp.tanh(0.5 * x) + 0.5


def _lstm_cell(gates, c_prev, H):
    # PyTorch gate order [i, f, g, o]; gates is (B, 4H) f32.
    i = _sigmoid(gates[:, 0 * H:1 * H])
    f = _sigmoid(gates[:, 1 * H:2 * H])
    g = jnp.tanh(gates[:, 2 * H:3 * H])
    o = _sigmoid(gates[:, 3 * H:4 * H])
    c = f * c_prev + i * g
    h = o * jnp.tanh(c)
    return h, c


def _fused_lstm2_kernel(gx1_ref, wblk_ref, b2_ref,
                        mean_ref, hN_ref, cN_ref,
                        h1_s, c1_s, h2_s, c2_s, sum_s,
                        *, inv_t, unroll, precision):
    """Fused, layer-skewed 2-layer LSTM over one time block.

    gx1_ref : (t_block, B, 4H)  precomputed x @ W_ih1 + b1 for this block (f32)
    wblk_ref: (2H, 8H)          fused weights [[W_hh1, W_ih2], [0, W_hh2]]
    b2_ref  : (1, 4H)           layer-2 combined bias (f32)
    mean_ref: (B, H)            mean over time of layer-2 h (written at end)
    hN_ref  : (2, B, H)         final hidden states per layer (written at end)
    cN_ref  : (2, B, H)         final cell states per layer (written at end)
    h1_s..sum_s : (B, H) f32 VMEM scratch carried across grid iterations.

    Skewed carry semantics at global step t = blk*t_block + j:
        (h1, c1) = layer-1 state at step t-1
        (h2, c2) = layer-2 state at step t-2
        sum      = sum_{u <= t-2} h2_u          (negative indices == zeros)
    """
    blk = pl.program_id(0)
    nblk = pl.num_programs(0)
    t_blk, B, four_h = gx1_ref.shape
    H = four_h // 4
    cd = wblk_ref.dtype

    @pl.when(blk == 0)
    def _init():
        h1_s[...] = jnp.zeros_like(h1_s)
        c1_s[...] = jnp.zeros_like(c1_s)
        h2_s[...] = jnp.zeros_like(h2_s)
        c2_s[...] = jnp.zeros_like(c2_s)
        sum_s[...] = jnp.zeros_like(sum_s)

    # Hoisted out of the time loop: fused weight block and broadcast bias.
    # TODO(synk): drive the MXU weight-stationary (pltpu.matmul_push_rhs once
    # per block + matmul_acc_lhs/matmul_pop per step) if the bundle dump shows
    # Mosaic re-pushing the (2H,8H) weights on every per-step jnp.dot.
    w_blk = wblk_ref[...]                                            # (2H, 8H)
    b2 = jnp.broadcast_to(b2_ref[...], (B, 4 * H)).astype(jnp.float32)

    def step(j, carry):
        h1, c1, h2, c2, s = carry
        first = jnp.logical_and(blk == 0, j == 0)          # global t == 0
        # ---- ONE fused MXU call per step (layer skew):
        #   cols [0,4H)  : h1_{t-1} @ W_hh1                   (layer-1 rec, t)
        #   cols [4H,8H) : h1_{t-1} @ W_ih2 + h2_{t-2} @ W_hh2 (layer-2 gates, t-1)
        z = jnp.concatenate([h1, h2], axis=-1).astype(cd)            # (B, 2H)
        g = jnp.dot(z, w_blk, preferred_element_type=jnp.float32,
                    precision=precision)                             # (B, 8H) f32
        # ---- layer 2, step t-1 (masked no-op on the very first global step).
        h2_c, c2_c = _lstm_cell(g[:, 4 * H:] + b2, c2, H)
        h2 = jnp.where(first, h2, h2_c)
        c2 = jnp.where(first, c2, c2_c)
        s = s + jnp.where(first, jnp.zeros_like(h2_c), h2_c)
        # ---- layer 1, step t (input projection precomputed into gx1).
        h1, c1 = _lstm_cell(gx1_ref[j] + g[:, :4 * H], c1, H)
        return h1, c1, h2, c2, s

    carry0 = (h1_s[...], c1_s[...], h2_s[...], c2_s[...], sum_s[...])
    h1, c1, h2, c2, s = lax.fori_loop(0, t_blk, step, carry0, unroll=unroll)
    h1_s[...] = h1
    c1_s[...] = c1
    h2_s[...] = h2
    c2_s[...] = c2
    sum_s[...] = s

    @pl.when(blk == nblk - 1)
    def _finalize():
        # Epilogue: layer-2 step T-1 (consumes h1_{T-1} and h2_{T-2}).
        z = jnp.concatenate([h1, h2], axis=-1).astype(cd)
        g2 = jnp.dot(z, w_blk[:, 4 * H:], preferred_element_type=jnp.float32,
                     precision=precision) + b2
        h2_f, c2_f = _lstm_cell(g2, c2, H)
        mean_ref[...] = (s + h2_f) * inv_t
        hN_ref[0] = h1
        hN_ref[1] = h2_f
        cN_ref[0] = c1
        cN_ref[1] = c2_f


def rnn_forward(x_btd, params, *, t_block=None, compute_dtype=jnp.bfloat16):
    """Forward pass of the PyTorch `RNN` module (2-layer LSTM, batch_first).

    x_btd : (B, T, D) float32
    params: list of 2 dicts {w_ih (D_in,4H), w_hh (H,4H), b (1,4H)}
    returns (out (B, H), (h_n (2, B, H), c_n (2, B, H)))
    """
    assert len(params) == 2, "fused kernel is written for num_layers == 2"
    B, T, D = x_btd.shape
    p1, p2 = params
    H = p1["w_hh"].shape[0]

    if t_block is None:
        # Big time blocks amortize the ~0.35us/grid-step overhead; time is the
        # only (serial) grid axis.  (Set vmem_limit_bytes on v5e for very
        # large blocks.)
        t_block = T if T <= 256 else 256
    assert T % t_block == 0, "T must be divisible by t_block"
    n_blocks = T // t_block

    # Hoist layer-1's input projection out of the serial recurrence: one big
    # MXU-friendly matmul, produced directly in (T, B, 4H) layout.
    gx1 = (jnp.einsum("btd,dg->tbg", x_btd, p1["w_ih"],
                      precision=jax.lax.Precision.HIGHEST)
           + p1["b"]).astype(jnp.float32)                            # (T, B, 4H)
    # TODO(synk): at production T*B, flatten gx1 to (T*B, 4H) and slice
    # gx1_ref[pl.ds(j*B, B), :] per step: dense HBM->VMEM DMA and no 2->8
    # sublane padding of the (t_block, B, 4H) VMEM block.

    # Fused block weight [[W_hh1, W_ih2], [0, W_hh2]]  (2H, 8H).
    w_top = jnp.concatenate([p1["w_hh"], p2["w_ih"]], axis=1)        # (H, 8H)
    w_bot = jnp.concatenate([jnp.zeros_like(p2["w_hh"]), p2["w_hh"]], axis=1)
    w_blk = jnp.concatenate([w_top, w_bot], axis=0).astype(compute_dtype)
    b2 = p2["b"].astype(jnp.float32)                                 # (1, 4H)

    exact = jnp.dtype(compute_dtype) == jnp.dtype(jnp.float32)
    kernel = functools.partial(
        _fused_lstm2_kernel,
        inv_t=1.0 / T,
        unroll=True if t_block <= 32 else 8,
        precision=jax.lax.Precision.HIGHEST if exact else None,
    )

    out_shapes = (
        jax.ShapeDtypeStruct((B, H), jnp.float32),        # mean over time
        jax.ShapeDtypeStruct((2, B, H), jnp.float32),     # h_n
        jax.ShapeDtypeStruct((2, B, H), jnp.float32),     # c_n
    )

    grid_spec = pltpu.PrefetchScalarGridSpec(
        num_scalar_prefetch=0,
        grid=(n_blocks,),
        in_specs=[
            pl.BlockSpec((t_block, B, 4 * H), lambda i: (i, 0, 0)),   # gx1 block
            # TODO(synk): when scaling H, add pipeline_mode=pl.Buffered(1) on
            # the two loop-invariant specs below so the constant weights/bias
            # are not double-buffered (matters for v7x's 64 MiB VMEM).
            pl.BlockSpec((2 * H, 8 * H), lambda i: (0, 0)),           # fused W
            pl.BlockSpec((1, 4 * H), lambda i: (0, 0)),               # bias l2
        ],
        out_specs=[
            pl.BlockSpec((B, H), lambda i: (0, 0)),                   # mean
            pl.BlockSpec((2, B, H), lambda i: (0, 0, 0)),             # h_n
            pl.BlockSpec((2, B, H), lambda i: (0, 0, 0)),             # c_n
        ],
        scratch_shapes=[pltpu.VMEM((B, H), jnp.float32)] * 5,         # h1,c1,h2,c2,sum
    )

    mean_out, h_n, c_n = pl.pallas_call(
        kernel,
        out_shape=out_shapes,
        grid_spec=grid_spec,
        compiler_params=pltpu.CompilerParams(
            dimension_semantics=("arbitrary",)),   # time is inherently serial
        # TODO(synk): with B >= 8, add a leading "parallel" batch grid axis
        # (dimension_semantics=("parallel","arbitrary")) for v7x megacore.
    )(gx1, w_blk, b2)
    return mean_out, (h_n, c_n)


def init_lstm_params(key, input_size, hidden_size, num_layers):
    """nn.LSTM-style init: U(-1/sqrt(H), 1/sqrt(H)).

    Weights are stored pre-transposed ((D_in,4H) / (H,4H)) and biases
    pre-summed (b_ih + b_hh).  Gate order i, f, g, o (PyTorch layout).
    """
    bound = 1.0 / (hidden_size ** 0.5)
    params = []
    for layer in range(num_layers):
        d_in = input_size if layer == 0 else hidden_size
        key, k1, k2, k3, k4 = jax.random.split(key, 5)
        w_ih = jax.random.uniform(k1, (d_in, 4 * hidden_size),
                                  minval=-bound, maxval=bound, dtype=jnp.float32)
        w_hh = jax.random.uniform(k2, (hidden_size, 4 * hidden_size),
                                  minval=-bound, maxval=bound, dtype=jnp.float32)
        b_ih = jax.random.uniform(k3, (4 * hidden_size,),
                                  minval=-bound, maxval=bound, dtype=jnp.float32)
        b_hh = jax.random.uniform(k4, (4 * hidden_size,),
                                  minval=-bound, maxval=bound, dtype=jnp.float32)
        params.append({"w_ih": w_ih, "w_hh": w_hh,
                       "b": (b_ih + b_hh).reshape(1, 4 * hidden_size)})
    return params


def rnn_forward_ref(x_btd, params):
    """Pure-JAX reference (lax.scan LSTM, f32, HIGHEST matmul precision)."""
    P = jax.lax.Precision.HIGHEST

    def one_layer(x_tbd, p):
        T, B, _ = x_tbd.shape
        H = p["w_hh"].shape[0]

        def step(carry, x_t):
            h, c = carry
            gates = (jnp.dot(x_t, p["w_ih"], precision=P)
                     + jnp.dot(h, p["w_hh"], precision=P) + p["b"])
            i = jax.nn.sigmoid(gates[:, 0 * H:1 * H])
            f = jax.nn.sigmoid(gates[:, 1 * H:2 * H])
            g = jnp.tanh(gates[:, 2 * H:3 * H])
            o = jax.nn.sigmoid(gates[:, 3 * H:4 * H])
            c = f * c + i * g
            h = o * jnp.tanh(c)
            return (h, c), h

        init = (jnp.zeros((B, H), jnp.float32), jnp.zeros((B, H), jnp.float32))
        (h_last, c_last), ys = jax.lax.scan(step, init, x_tbd)
        return ys, h_last, c_last

    x_tbd = jnp.transpose(x_btd, (1, 0, 2))
    hs, cs = [], []
    cur = x_tbd
    for p in params:
        cur, h_last, c_last = one_layer(cur, p)
        hs.append(h_last)
        cs.append(c_last)
    out = jnp.mean(cur, axis=0)
    return out, (jnp.stack(hs, 0), jnp.stack(cs, 0))


if __name__ == "__main__":
    # Small shapes consistent with the module (input_size == hidden_size,
    # num_layers == 2, batch_first input (B, T, D)).  H is a multiple of 128
    # so gate slices and all stores are lane-aligned / lane-dense.
    batch = 2
    seq_len = 16
    features = 128          # input_size == hidden_size
    num_layers = 2

    key = jax.random.PRNGKey(0)
    k_x, k_p = jax.random.split(key)
    x = jax.random.normal(k_x, (batch, seq_len, features), dtype=jnp.float32)
    params = init_lstm_params(k_p, features, features, num_layers)

    out_ref, (h_ref, c_ref) = rnn_forward_ref(x, params)

    # Default fast path: bf16 MXU operands, f32 accumulation / gates / state.
    # t_block=8 -> 2 grid steps, exercises the cross-block skewed carry.
    out, (h_n, c_n) = rnn_forward(x, params, t_block=8)
    jax.block_until_ready((out, h_n, c_n))
    assert out.shape == (batch, features)
    assert h_n.shape == (num_layers, batch, features)
    assert c_n.shape == (num_layers, batch, features)
    assert float(jnp.max(jnp.abs(out - out_ref))) < 1e-1
    assert float(jnp.max(jnp.abs(h_n - h_ref))) < 1e-1
    assert float(jnp.max(jnp.abs(c_n - c_ref))) < 2e-1

    # Exact path: f32 MXU operands (precision=HIGHEST) — tight check.
    out32, (h32, c32) = rnn_forward(x, params, t_block=8,
                                    compute_dtype=jnp.float32)
    jax.block_until_ready((out32, h32, c32))
    assert float(jnp.max(jnp.abs(out32 - out_ref))) < 2e-3
    assert float(jnp.max(jnp.abs(h32 - h_ref))) < 2e-3
    assert float(jnp.max(jnp.abs(c32 - c_ref))) < 5e-3

    print("KERNEL_OK")
</pallas_src>

<mosaic_0001>
module attributes {stable_mosaic.version = 11 : i64} {
  func.func @_fused_lstm2_kernel(%arg0: i32, %arg1: memref<8x2x512xf32, #tpu.memory_space<vmem>>, %arg2: memref<256x1024xbf16, #tpu.memory_space<vmem>>, %arg3: memref<1x512xf32, #tpu.memory_space<vmem>>, %arg4: memref<2x128xf32, #tpu.memory_space<vmem>>, %arg5: memref<2x2x128xf32, #tpu.memory_space<vmem>>, %arg6: memref<2x2x128xf32, #tpu.memory_space<vmem>>, %arg7: memref<2x128xf32, #tpu.memory_space<vmem>>, %arg8: memref<2x128xf32, #tpu.memory_space<vmem>>, %arg9: memref<2x128xf32, #tpu.memory_space<vmem>>, %arg10: memref<2x128xf32, #tpu.memory_space<vmem>>, %arg11: memref<2x128xf32, #tpu.memory_space<vmem>>) attributes {dimension_semantics = [#tpu.dimension_semantics<arbitrary>], iteration_bounds = array<i64: 2>, scalar_prefetch = 0 : i64, scratch_operands = 5 : i64, tpu.core_type = #tpu.core_type<tc>, window_params = [{transform_indices = @transform_0, window_bounds = array<i64: 8, 2, 512>}, {pipeline_mode = #tpu.pipeline_mode<synchronous>, transform_indices = @transform_1, window_bounds = array<i64: 256, 1024>}, {pipeline_mode = #tpu.pipeline_mode<synchronous>, transform_indices = @transform_2, window_bounds = array<i64: 1, 512>}, {pipeline_mode = #tpu.pipeline_mode<synchronous>, transform_indices = @transform_3, window_bounds = array<i64: 2, 128>}, {pipeline_mode = #tpu.pipeline_mode<synchronous>, transform_indices = @transform_4, window_bounds = array<i64: 2, 2, 128>}, {pipeline_mode = #tpu.pipeline_mode<synchronous>, transform_indices = @transform_5, window_bounds = array<i64: 2, 2, 128>}]} {
    %c0_i32 = arith.constant 0 : i32
    %0 = arith.cmpi eq, %arg0, %c0_i32 : i32
    %1 = arith.extui %0 : i1 to i32
    %c0_i32_0 = arith.constant 0 : i32
    %2 = arith.cmpi ne, %1, %c0_i32_0 : i32
    scf.if %2 {
      %cst_218 = arith.constant 0.000000e+00 : f32
      %660 = vector.broadcast %cst_218 : f32 to vector<2x128xf32>
      %c0_219 = arith.constant 0 : index
      %c0_220 = arith.constant 0 : index
      %661 = vector.load %arg7[%c0_219, %c0_220] : memref<2x128xf32, #tpu.memory_space<vmem>>, vector<2x128xf32>
      tpu.vector_store %arg7[%c0_219, %c0_220], %660 {strides = array<i32>} : memref<2x128xf32, #tpu.memory_space<vmem>>, vector<2x128xf32>,
      %cst_221 = arith.constant 0.000000e+00 : f32
      %662 = vector.broadcast %cst_221 : f32 to vector<2x128xf32>
      %c0_222 = arith.constant 0 : index
      %c0_223 = arith.constant 0 : index
      %663 = vector.load %arg8[%c0_222, %c0_223] : memref<2x128xf32, #tpu.memory_space<vmem>>, vector<2x128xf32>
      tpu.vector_store %arg8[%c0_222, %c0_223], %662 {strides = array<i32>} : memref<2x128xf32, #tpu.memory_space<vmem>>, vector<2x128xf32>,
      %cst_224 = arith.constant 0.000000e+00 : f32
      %664 = vector.broadcast %cst_224 : f32 to vector<2x128xf32>
      %c0_225 = arith.constant 0 : index
      %c0_226 = arith.constant 0 : index
      %665 = vector.load %arg9[%c0_225, %c0_226] : memref<2x128xf32, #tpu.memory_space<vmem>>, vector<2x128xf32>
      tpu.vector_store %arg9[%c0_225, %c0_226], %664 {strides = array<i32>} : memref<2x128xf32, #tpu.memory_space<vmem>>, vector<2x128xf32>,
      %cst_227 = arith.constant 0.000000e+00 : f32
      %666 = vector.broadcast %cst_227 : f32 to vector<2x128xf32>
      %c0_228 = arith.constant 0 : index
      %c0_229 = arith.constant 0 : index
      %667 = vector.load %arg10[%c0_228, %c0_229] : memref<2x128xf32, #tpu.memory_space<vmem>>, vector<2x128xf32>
      tpu.vector_store %arg10[%c0_228, %c0_229], %666 {strides = array<i32>} : memref<2x128xf32, #tpu.memory_space<vmem>>, vector<2x128xf32>,
      %cst_230 = arith.constant 0.000000e+00 : f32
      %668 = vector.broadcast %cst_230 : f32 to vector<2x128xf32>
      %c0_231 = arith.constant 0 : index
      %c0_232 = arith.constant 0 : index
      %669 = vector.load %arg11[%c0_231, %c0_232] : memref<2x128xf32, #tpu.memory_space<vmem>>, vector<2x128xf32>
      tpu.vector_store %arg11[%c0_231, %c0_232], %668 {strides = array<i32>} : memref<2x128xf32, #tpu.memory_space<vmem>>, vector<2x128xf32>,
    } else {
    }
    %c0 = arith.constant 0 : index
    %c0_1 = arith.constant 0 : index
    %3 = vector.load %arg2[%c0, %c0_1] : memref<256x1024xbf16, #tpu.memory_space<vmem>>, vector<256x1024xbf16>
    %c0_2 = arith.constant 0 : index
    %c0_3 = arith.constant 0 : index
    %4 = vector.load %arg3[%c0_2, %c0_3] : memref<1x512xf32, #tpu.memory_space<vmem>>, vector<1x512xf32>
    %5 = vector.shape_cast %4 : vector<1x512xf32> to vector<1x512xf32>
    %6 = vector.broadcast %5 : vector<1x512xf32> to vector<2x512xf32>
    %c0_4 = arith.constant 0 : index
    %c0_5 = arith.constant 0 : index
    %7 = vector.load %arg7[%c0_4, %c0_5] : memref<2x128xf32, #tpu.memory_space<vmem>>, vector<2x128xf32>
    %c0_6 = arith.constant 0 : index
    %c0_7 = arith.constant 0 : index
    %8 = vector.load %arg8[%c0_6, %c0_7] : memref<2x128xf32, #tpu.memory_space<vmem>>, vector<2x128xf32>
    %c0_8 = arith.constant 0 : index
    %c0_9 = arith.constant 0 : index
    %9 = vector.load %arg9[%c0_8, %c0_9] : memref<2x128xf32, #tpu.memory_space<vmem>>, vector<2x128xf32>
    %c0_10 = arith.constant 0 : index
    %c0_11 = arith.constant 0 : index
    %10 = vector.load %arg10[%c0_10, %c0_11] : memref<2x128xf32, #tpu.memory_space<vmem>>, vector<2x128xf32>
    %c0_12 = arith.constant 0 : index
    %c0_13 = arith.constant 0 : index
    %11 = vector.load %arg11[%c0_12, %c0_13] : memref<2x128xf32, #tpu.memory_space<vmem>>, vector<2x128xf32>
    %c0_i32_14 = arith.constant 0 : i32
    %c0_i32_15 = arith.constant 0 : i32
    %12 = arith.cmpi eq, %arg0, %c0_i32_15 : i32
    %c0_i32_16 = arith.constant 0 : i32
    %13 = arith.cmpi eq, %c0_i32_14, %c0_i32_16 : i32
    %14 = arith.andi %12, %13 : i1
    %15 = tpu.concatenate %7, %9 in 1 : vector<2x128xf32>, vector<2x128xf32> -> vector<2x256xf32>
    %16 = arith.truncf %15 : vector<2x256xf32> to vector<2x256xbf16>
    %cst = arith.constant dense<0.000000e+00> : vector<2x1024xf32>
    %17 = tpu.matmul %16, %3, %cst {dimension_numbers = #tpu.dot_dimension_numbers<[1], [0], [0], [1], [0, 0, 1, 1], [], []>} : vector<2x256xbf16>, vector<256x1024xbf16>, vector<2x1024xf32> -> vector<2x1024xf32>
    %18 = vector.extract_strided_slice %17 {offsets = [0, 512], sizes = [2, 512], strides = [1, 1]} : vector<2x1024xf32> to vector<2x512xf32>
    %19 = arith.addf %18, %6 : vector<2x512xf32>
    %20 = vector.extract_strided_slice %19 {offsets = [0, 0], sizes = [2, 128], strides = [1, 1]} : vector<2x512xf32> to vector<2x128xf32>
    %cst_17 = arith.constant 5.000000e-01 : f32
    %21 = vector.broadcast %cst_17 : f32 to vector<2x128xf32>
    %22 = arith.mulf %21, %20 : vector<2x128xf32>
    %23 = math.tanh %22 : vector<2x128xf32>
    %cst_18 = arith.constant 5.000000e-01 : f32
    %24 = vector.broadcast %cst_18 : f32 to vector<2x128xf32>
    %25 = arith.mulf %24, %23 : vector<2x128xf32>
    %cst_19 = arith.constant 5.000000e-01 : f32
    %26 = vector.broadcast %cst_19 : f32 to vector<2x128xf32>
    %27 = arith.addf %25, %26 : vector<2x128xf32>
    %28 = vector.extract_strided_slice %19 {offsets = [0, 128], sizes = [2, 128], strides = [1, 1]} : vector<2x512xf32> to vector<2x128xf32>
    %cst_20 = arith.constant 5.000000e-01 : f32
    %29 = vector.broadcast %cst_20 : f32 to vector<2x128xf32>
    %30 = arith.mulf %29, %28 : vector<2x128xf32>
    %31 = math.tanh %30 : vector<2x128xf32>
    %cst_21 = arith.constant 5.000000e-01 : f32
    %32 = vector.broadcast %cst_21 : f32 to vector<2x128xf32>
    %33 = arith.mulf %32, %31 : vector<2x128xf32>
    %cst_22 = arith.constant 5.000000e-01 : f32
    %34 = vector.broadcast %cst_22 : f32 to vector<2x128xf32>
    %35 = arith.addf %33, %34 : vector<2x128xf32>
    %36 = vector.extract_strided_slice %19 {offsets = [0, 256], sizes = [2, 128], strides = [1, 1]} : vector<2x512xf32> to vector<2x128xf32>
    %37 = math.tanh %36 : vector<2x128xf32>
    %38 = vector.extract_strided_slice %19 {offsets = [0, 384], sizes = [2, 128], strides = [1, 1]} : vector<2x512xf32> to vector<2x128xf32>
    %cst_23 = arith.constant 5.000000e-01 : f32
    %39 = vector.broadcast %cst_23 : f32 to vector<2x128xf32>
    %40 = arith.mulf %39, %38 : vector<2x128xf32>
    %41 = math.tanh %40 : vector<2x128xf32>
    %cst_24 = arith.constant 5.000000e-01 : f32
    %42 = vector.broadcast %cst_24 : f32 to vector<2x128xf32>
    %43 = arith.mulf %42, %41 : vector<2x128xf32>
    %cst_25 = arith.constant 5.000000e-01 : f32
    %44 = vector.broadcast %cst_25 : f32 to vector<2x128xf32>
    %45 = arith.addf %43, %44 : vector<2x128xf32>
    %46 = arith.mulf %35, %10 : vector<2x128xf32>
    %47 = arith.mulf %27, %37 : vector<2x128xf32>
    %48 = arith.addf %46, %47 : vector<2x128xf32>
    %49 = math.tanh %48 : vector<2x128xf32>
    %50 = arith.mulf %45, %49 : vector<2x128xf32>
    %51 = arith.select %14, %9, %50 : vector<2x128xf32>
    %52 = arith.select %14, %10, %48 : vector<2x128xf32>
    %cst_26 = arith.constant 0.000000e+00 : f32
    %53 = vector.broadcast %cst_26 : f32 to vector<2x128xf32>
    %54 = arith.select %14, %53, %50 : vector<2x128xf32>
    %55 = arith.addf %11, %54 : vector<2x128xf32>
    %56 = arith.index_cast %c0_i32_14 : i32 to index
    %c0_27 = arith.constant 0 : index
    %c0_28 = arith.constant 0 : index
    %57 = vector.load %arg1[%56, %c0_27, %c0_28] : memref<8x2x512xf32, #tpu.memory_space<vmem>>, vector<1x2x512xf32>
    %58 = vector.shape_cast %57 : vector<1x2x512xf32> to vector<2x512xf32>
    %59 = vector.extract_strided_slice %17 {offsets = [0, 0], sizes = [2, 512], strides = [1, 1]} : vector<2x1024xf32> to vector<2x512xf32>
    %60 = arith.addf %58, %59 : vector<2x512xf32>
    %61 = vector.extract_strided_slice %60 {offsets = [0, 0], sizes = [2, 128], strides = [1, 1]} : vector<2x512xf32> to vector<2x128xf32>
    %cst_29 = arith.constant 5.000000e-01 : f32
    %62 = vector.broadcast %cst_29 : f32 to vector<2x128xf32>
    %63 = arith.mulf %62, %61 : vector<2x128xf32>
    %64 = math.tanh %63 : vector<2x128xf32>
    %cst_30 = arith.constant 5.000000e-01 : f32
    %65 = vector.broadcast %cst_30 : f32 to vector<2x128xf32>
    %66 = arith.mulf %65, %64 : vector<2x128xf32>
    %cst_31 = arith.constant 5.000000e-01 : f32
    %67 = vector.broadcast %cst_31 : f32 to vector<2x128xf32>
    %68 = arith.addf %66, %67 : vector<2x128xf32>
    %69 = vector.extract_strided_slice %60 {offsets = [0, 128], sizes = [2, 128], strides = [1, 1]} : vector<2x512xf32> to vector<2x128xf32>
    %cst_32 = arith.constant 5.000000e-01 : f32
    %70 = vector.broadcast %cst_32 : f32 to vector<2x128xf32>
    %71 = arith.mulf %70, %69 : vector<2x128xf32>
    %72 = math.tanh %71 : vector<2x128xf32>
    %cst_33 = arith.constant 5.000000e-01 : f32
    %73 = vector.broadcast %cst_33 : f32 to vector<2x128xf32>
    %74 = arith.mulf %73, %72 : vector<2x128xf32>
    %cst_34 = arith.constant 5.000000e-01 : f32
    %75 = vector.broadcast %cst_34 : f32 to vector<2x128xf32>
    %76 = arith.addf %74, %75 : vector<2x128xf32>
    %77 = vector.extract_strided_slice %60 {offsets = [0, 256], sizes = [2, 128], strides = [1, 1]} : vector<2x512xf32> to vector<2x128xf32>
    %78 = math.tanh %77 : vector<2x128xf32>
    %79 = vector.extract_strided_slice %60 {offsets = [0, 384], sizes = [2, 128], strides = [1, 1]} : vector<2x512xf32> to vector<2x128xf32>
    %cst_35 = arith.constant 5.000000e-01 : f32
    %80 = vector.broadcast %cst_35 : f32 to vector<2x128xf32>
    %81 = arith.mulf %80, %79 : vector<2x128xf32>
    %82 = math.tanh %81 : vector<2x128xf32>
    %cst_36 = arith.constant 5.000000e-01 : f32
    %83 = vector.broadcast %cst_36 : f32 to vector<2x128xf32>
    %84 = arith.mulf %83, %82 : vector<2x128xf32>
    %cst_37 = arith.constant 5.000000e-01 : f32
    %85 = vector.broadcast %cst_37 : f32 to vector<2x128xf32>
    %86 = arith.addf %84, %85 : vector<2x128xf32>
    %87 = arith.mulf %76, %8 : vector<2x128xf32>
    %88 = arith.mulf %68, %78 : vector<2x128xf32>
    %89 = arith.addf %87, %88 : vector<2x128xf32>
    %90 = math.tanh %89 : vector<2x128xf32>
    %91 = arith.mulf %86, %90 : vector<2x128xf32>
    %c1_i32 = arith.constant 1 : i32
    %c0_i32_38 = arith.constant 0 : i32
    %92 = arith.cmpi eq, %arg0, %c0_i32_38 : i32
    %c0_i32_39 = arith.constant 0 : i32
    %93 = arith.cmpi eq, %c1_i32, %c0_i32_39 : i32
    %94 = arith.andi %92, %93 : i1
    %95 = tpu.concatenate %91, %51 in 1 : vector<2x128xf32>, vector<2x128xf32> -> vector<2x256xf32>
    %96 = arith.truncf %95 : vector<2x256xf32> to vector<2x256xbf16>
    %cst_40 = arith.constant dense<0.000000e+00> : vector<2x1024xf32>
    %97 = tpu.matmul %96, %3, %cst_40 {dimension_numbers = #tpu.dot_dimension_numbers<[1], [0], [0], [1], [0, 0, 1, 1], [], []>} : vector<2x256xbf16>, vector<256x1024xbf16>, vector<2x1024xf32> -> vector<2x1024xf32>
    %98 = vector.extract_strided_slice %97 {offsets = [0, 512], sizes = [2, 512], strides = [1, 1]} : vector<2x1024xf32> to vector<2x512xf32>
    %99 = arith.addf %98, %6 : vector<2x512xf32>
    %100 = vector.extract_strided_slice %99 {offsets = [0, 0], sizes = [2, 128], strides = [1, 1]} : vector<2x512xf32> to vector<2x128xf32>
    %cst_41 = arith.constant 5.000000e-01 : f32
    %101 = vector.broadcast %cst_41 : f32 to vector<2x128xf32>
    %102 = arith.mulf %101, %100 : vector<2x128xf32>
    %103 = math.tanh %102 : vector<2x128xf32>
    %cst_42 = arith.constant 5.000000e-01 : f32
    %104 = vector.broadcast %cst_42 : f32 to vector<2x128xf32>
    %105 = arith.mulf %104, %103 : vector<2x128xf32>
    %cst_43 = arith.constant 5.000000e-01 : f32
    %106 = vector.broadcast %cst_43 : f32 to vector<2x128xf32>
    %107 = arith.addf %105, %106 : vector<2x128xf32>
    %108 = vector.extract_strided_slice %99 {offsets = [0, 128], sizes = [2, 128], strides = [1, 1]} : vector<2x512xf32> to vector<2x128xf32>
    %cst_44 = arith.constant 5.000000e-01 : f32
    %109 = vector.broadcast %cst_44 : f32 to vector<2x128xf32>
    %110 = arith.mulf %109, %108 : vector<2x128xf32>
    %111 = math.tanh %110 : vector<2x128xf32>
    %cst_45 = arith.constant 5.000000e-01 : f32
    %112 = vector.broadcast %cst_45 : f32 to vector<2x128xf32>
    %113 = arith.mulf %112, %111 : vector<2x128xf32>
    %cst_46 = arith.constant 5.000000e-01 : f32
    %114 = vector.broadcast %cst_46 : f32 to vector<2x128xf32>
    %115 = arith.addf %113, %114 : vector<2x128xf32>
    %116 = vector.extract_strided_slice %99 {offsets = [0, 256], sizes = [2, 128], strides = [1, 1]} : vector<2x512xf32> to vector<2x128xf32>
    %117 = math.tanh %116 : vector<2x128xf32>
    %118 = vector.extract_strided_slice %99 {offsets = [0, 384], sizes = [2, 128], strides = [1, 1]} : vector<2x512xf32> to vector<2x128xf32>
    %cst_47 = arith.constant 5.000000e-01 : f32
    %119 = vector.broadcast %cst_47 : f32 to vector<2x128xf32>
    %120 = arith.mulf %119, %118 : vector<2x128xf32>
    %121 = math.tanh %120 : vector<2x128xf32>
    %cst_48 = arith.constant 5.000000e-01 : f32
    %122 = vector.broadcast %cst_48 : f32 to vector<2x128xf32>
    %123 = arith.mulf %122, %121 : vector<2x128xf32>
    %cst_49 = arith.constant 5.000000e-01 : f32
    %124 = vector.broadcast %cst_49 : f32 to vector<2x128xf32>
    %125 = arith.addf %123, %124 : vector<2x128xf32>
    %126 = arith.mulf %115, %52 : vector<2x128xf32>
    %127 = arith.mulf %107, %117 : vector<2x128xf32>
    %128 = arith.addf %126, %127 : vector<2x128xf32>
    %129 = math.tanh %128 : vector<2x128xf32>
    %130 = arith.mulf %125, %129 : vector<2x128xf32>
    %131 = arith.select %94, %51, %130 : vector<2x128xf32>
    %132 = arith.select %94, %52, %128 : vector<2x128xf32>
    %cst_50 = arith.constant 0.000000e+00 : f32
    %133 = vector.broadcast %cst_50 : f32 to vector<2x128xf32>
    %134 = arith.select %94, %133, %130 : vector<2x128xf32>
    %135 = arith.addf %55, %134 : vector<2x128xf32>
    %136 = arith.index_cast %c1_i32 : i32 to index
    %c0_51 = arith.constant 0 : index
    %c0_52 = arith.constant 0 : index
    %137 = vector.load %arg1[%136, %c0_51, %c0_52] : memref<8x2x512xf32, #tpu.memory_space<vmem>>, vector<1x2x512xf32>
    %138 = vector.shape_cast %137 : vector<1x2x512xf32> to vector<2x512xf32>
    %139 = vector.extract_strided_slice %97 {offsets = [0, 0], sizes = [2, 512], strides = [1, 1]} : vector<2x1024xf32> to vector<2x512xf32>
    %140 = arith.addf %138, %139 : vector<2x512xf32>
    %141 = vector.extract_strided_slice %140 {offsets = [0, 0], sizes = [2, 128], strides = [1, 1]} : vector<2x512xf32> to vector<2x128xf32>
    %cst_53 = arith.constant 5.000000e-01 : f32
    %142 = vector.broadcast %cst_53 : f32 to vector<2x128xf32>
    %143 = arith.mulf %142, %141 : vector<2x128xf32>
    %144 = math.tanh %143 : vector<2x128xf32>
    %cst_54 = arith.constant 5.000000e-01 : f32
    %145 = vector.broadcast %cst_54 : f32 to vector<2x128xf32>
    %146 = arith.mulf %145, %144 : vector<2x128xf32>
    %cst_55 = arith.constant 5.000000e-01 : f32
    %147 = vector.broadcast %cst_55 : f32 to vector<2x128xf32>
    %148 = arith.addf %146, %147 : vector<2x128xf32>
    %149 = vector.extract_strided_slice %140 {offsets = [0, 128], sizes = [2, 128], strides = [1, 1]} : vector<2x512xf32> to vector<2x128xf32>
    %cst_56 = arith.constant 5.000000e-01 : f32
    %150 = vector.broadcast %cst_56 : f32 to vector<2x128xf32>
    %151 = arith.mulf %150, %149 : vector<2x128xf32>
    %152 = math.tanh %151 : vector<2x128xf32>
    %cst_57 = arith.constant 5.000000e-01 : f32
    %153 = vector.broadcast %cst_57 : f32 to vector<2x128xf32>
    %154 = arith.mulf %153, %152 : vector<2x128xf32>
    %cst_58 = arith.constant 5.000000e-01 : f32
    %155 = vector.broadcast %cst_58 : f32 to vector<2x128xf32>
    %156 = arith.addf %154, %155 : vector<2x128xf32>
    %157 = vector.extract_strided_slice %140 {offsets = [0, 256], sizes = [2, 128], strides = [1, 1]} : vector<2x512xf32> to vector<2x128xf32>
    %158 = math.tanh %157 : vector<2x128xf32>
    %159 = vector.extract_strided_slice %140 {offsets = [0, 384], sizes = [2, 128], strides = [1, 1]} : vector<2x512xf32> to vector<2x128xf32>
    %cst_59 = arith.constant 5.000000e-01 : f32
    %160 = vector.broadcast %cst_59 : f32 to vector<2x128xf32>
    %161 = arith.mulf %160, %159 : vector<2x128xf32>
    %162 = math.tanh %161 : vector<2x128xf32>
    %cst_60 = arith.constant 5.000000e-01 : f32
    %163 = vector.broadcast %cst_60 : f32 to vector<2x128xf32>
    %164 = arith.mulf %163, %162 : vector<2x128xf32>
    %cst_61 = arith.constant 5.000000e-01 : f32
    %165 = vector.broadcast %cst_61 : f32 to vector<2x128xf32>
    %166 = arith.addf %164, %165 : vector<2x128xf32>
    %167 = arith.mulf %156, %89 : vector<2x128xf32>
    %168 = arith.mulf %148, %158 : vector<2x128xf32>
    %169 = arith.addf %167, %168 : vector<2x128xf32>
    %170 = math.tanh %169 : vector<2x128xf32>
    %171 = arith.mulf %166, %170 : vector<2x128xf32>
    %c2_i32 = arith.constant 2 : i32
    %c0_i32_62 = arith.constant 0 : i32
    %172 = arith.cmpi eq, %arg0, %c0_i32_62 : i32
    %c0_i32_63 = arith.constant 0 : i32
    %173 = arith.cmpi eq, %c2_i32, %c0_i32_63 : i32
    %174 = arith.andi %172, %173 : i1
    %175 = tpu.concatenate %171, %131 in 1 : vector<2x128xf32>, vector<2x128xf32> -> vector<2x256xf32>
    %176 = arith.truncf %175 : vector<2x256xf32> to vector<2x256xbf16>
    %cst_64 = arith.constant dense<0.000000e+00> : vector<2x1024xf32>
    %177 = tpu.matmul %176, %3, %cst_64 {dimension_numbers = #tpu.dot_dimension_numbers<[1], [0], [0], [1], [0, 0, 1, 1], [], []>} : vector<2x256xbf16>, vector<256x1024xbf16>, vector<2x1024xf32> -> vector<2x1024xf32>
    %178 = vector.extract_strided_slice %177 {offsets = [0, 512], sizes = [2, 512], strides = [1, 1]} : vector<2x1024xf32> to vector<2x512xf32>
    %179 = arith.addf %178, %6 : vector<2x512xf32>
    %180 = vector.extract_strided_slice %179 {offsets = [0, 0], sizes = [2, 128], strides = [1, 1]} : vector<2x512xf32> to vector<2x128xf32>
    %cst_65 = arith.constant 5.000000e-01 : f32
    %181 = vector.broadcast %cst_65 : f32 to vector<2x128xf32>
    %182 = arith.mulf %181, %180 : vector<2x128xf32>
    %183 = math.tanh %182 : vector<2x128xf32>
    %cst_66 = arith.constant 5.000000e-01 : f32
    %184 = vector.broadcast %cst_66 : f32 to vector<2x128xf32>
    %185 = arith.mulf %184, %183 : vector<2x128xf32>
    %cst_67 = arith.constant 5.000000e-01 : f32
    %186 = vector.broadcast %cst_67 : f32 to vector<2x128xf32>
    %187 = arith.addf %185, %186 : vector<2x128xf32>
    %188 = vector.extract_strided_slice %179 {offsets = [0, 128], sizes = [2, 128], strides = [1, 1]} : vector<2x512xf32> to vector<2x128xf32>
    %cst_68 = arith.constant 5.000000e-01 : f32
    %189 = vector.broadcast %cst_68 : f32 to vector<2x128xf32>
    %190 = arith.mulf %189, %188 : vector<2x128xf32>
    %191 = math.tanh %190 : vector<2x128xf32>
    %cst_69 = arith.constant 5.000000e-01 : f32
    %192 = vector.broadcast %cst_69 : f32 to vector<2x128xf32>
    %193 = arith.mulf %192, %191 : vector<2x128xf32>
    %cst_70 = arith.constant 5.000000e-01 : f32
    %194 = vector.broadcast %cst_70 : f32 to vector<2x128xf32>
    %195 = arith.addf %193, %194 : vector<2x128xf32>
    %196 = vector.extract_strided_slice %179 {offsets = [0, 256], sizes = [2, 128], strides = [1, 1]} : vector<2x512xf32> to vector<2x128xf32>
    %197 = math.tanh %196 : vector<2x128xf32>
    %198 = vector.extract_strided_slice %179 {offsets = [0, 384], sizes = [2, 128], strides = [1, 1]} : vector<2x512xf32> to vector<2x128xf32>
    %cst_71 = arith.constant 5.000000e-01 : f32
    %199 = vector.broadcast %cst_71 : f32 to vector<2x128xf32>
    %200 = arith.mulf %199, %198 : vector<2x128xf32>
    %201 = math.tanh %200 : vector<2x128xf32>
    %cst_72 = arith.constant 5.000000e-01 : f32
    %202 = vector.broadcast %cst_72 : f32 to vector<2x128xf32>
    %203 = arith.mulf %202, %201 : vector<2x128xf32>
    %cst_73 = arith.constant 5.000000e-01 : f32
    %204 = vector.broadcast %cst_73 : f32 to vector<2x128xf32>
    %205 = arith.addf %203, %204 : vector<2x128xf32>
    %206 = arith.mulf %195, %132 : vector<2x128xf32>
    %207 = arith.mulf %187, %197 : vector<2x128xf32>
    %208 = arith.addf %206, %207 : vector<2x128xf32>
    %209 = math.tanh %208 : vector<2x128xf32>
    %210 = arith.mulf %205, %209 : vector<2x128xf32>
    %211 = arith.select %174, %131, %210 : vector<2x128xf32>
    %212 = arith.select %174, %132, %208 : vector<2x128xf32>
    %cst_74 = arith.constant 0.000000e+00 : f32
    %213 = vector.broadcast %cst_74 : f32 to vector<2x128xf32>
    %214 = arith.select %174, %213, %210 : vector<2x128xf32>
    %215 = arith.addf %135, %214 : vector<2x128xf32>
    %216 = arith.index_cast %c2_i32 : i32 to index
    %c0_75 = arith.constant 0 : index
    %c0_76 = arith.constant 0 : index
    %217 = vector.load %arg1[%216, %c0_75, %c0_76] : memref<8x2x512xf32, #tpu.memory_space<vmem>>, vector<1x2x512xf32>
    %218 = vector.shape_cast %217 : vector<1x2x512xf32> to vector<2x512xf32>
    %219 = vector.extract_strided_slice %177 {offsets = [0, 0], sizes = [2, 512], strides = [1, 1]} : vector<2x1024xf32> to vector<2x512xf32>
    %220 = arith.addf %218, %219 : vector<2x512xf32>
    %221 = vector.extract_strided_slice %220 {offsets = [0, 0], sizes = [2, 128], strides = [1, 1]} : vector<2x512xf32> to vector<2x128xf32>
    %cst_77 = arith.constant 5.000000e-01 : f32
    %222 = vector.broadcast %cst_77 : f32 to vector<2x128xf32>
    %223 = arith.mulf %222, %221 : vector<2x128xf32>
    %224 = math.tanh %223 : vector<2x128xf32>
    %cst_78 = arith.constant 5.000000e-01 : f32
    %225 = vector.broadcast %cst_78 : f32 to vector<2x128xf32>
    %226 = arith.mulf %225, %224 : vector<2x128xf32>
    %cst_79 = arith.constant 5.000000e-01 : f32
    %227 = vector.broadcast %cst_79 : f32 to vector<2x128xf32>
    %228 = arith.addf %226, %227 : vector<2x128xf32>
    %229 = vector.extract_strided_slice %220 {offsets = [0, 128], sizes = [2, 128], strides = [1, 1]} : vector<2x512xf32> to vector<2x128xf32>
    %cst_80 = arith.constant 5.000000e-01 : f32
    %230 = vector.broadcast %cst_80 : f32 to vector<2x128xf32>
    %231 = arith.mulf %230, %229 : vector<2x128xf32>
    %232 = math.tanh %231 : vector<2x128xf32>
    %cst_81 = arith.constant 5.000000e-01 : f32
    %233 = vector.broadcast %cst_81 : f32 to vector<2x128xf32>
    %234 = arith.mulf %233, %232 : vector<2x128xf32>
    %cst_82 = arith.constant 5.000000e-01 : f32
    %235 = vector.broadcast %cst_82 : f32 to vector<2x128xf32>
    %236 = arith.addf %234, %235 : vector<2x128xf32>
    %237 = vector.extract_strided_slice %220 {offsets = [0, 256], sizes = [2, 128], strides = [1, 1]} : vector<2x512xf32> to vector<2x128xf32>
    %238 = math.tanh %237 : vector<2x128xf32>
    %239 = vector.extract_strided_slice %220 {offsets = [0, 384], sizes = [2, 128], strides = [1, 1]} : vector<2x512xf32> to vector<2x128xf32>
    %cst_83 = arith.constant 5.000000e-01 : f32
    %240 = vector.broadcast %cst_83 : f32 to vector<2x128xf32>
    %241 = arith.mulf %240, %239 : vector<2x128xf32>
    %242 = math.tanh %241 : vector<2x128xf32>
    %cst_84 = arith.constant 5.000000e-01 : f32
    %243 = vector.broadcast %cst_84 : f32 to vector<2x128xf32>
    %244 = arith.mulf %243, %242 : vector<2x128xf32>
    %cst_85 = arith.constant 5.000000e-01 : f32
    %245 = vector.broadcast %cst_85 : f32 to vector<2x128xf32>
    %246 = arith.addf %244, %245 : vector<2x128xf32>
    %247 = arith.mulf %236, %169 : vector<2x128xf32>
    %248 = arith.mulf %228, %238 : vector<2x128xf32>
    %249 = arith.addf %247, %248 : vector<2x128xf32>
    %250 = math.tanh %249 : vector<2x128xf32>
    %251 = arith.mulf %246, %250 : vector<2x128xf32>
    %c3_i32 = arith.constant 3 : i32
    %c0_i32_86 = arith.constant 0 : i32
    %252 = arith.cmpi eq, %arg0, %c0_i32_86 : i32
    %c0_i32_87 = arith.constant 0 : i32
    %253 = arith.cmpi eq, %c3_i32, %c0_i32_87 : i32
    %254 = arith.andi %252, %253 : i1
    %255 = tpu.concatenate %251, %211 in 1 : vector<2x128xf32>, vector<2x128xf32> -> vector<2x256xf32>
    %256 = arith.truncf %255 : vector<2x256xf32> to vector<2x256xbf16>
    %cst_88 = arith.constant dense<0.000000e+00> : vector<2x1024xf32>
    %257 = tpu.matmul %256, %3, %cst_88 {dimension_numbers = #tpu.dot_dimension_numbers<[1], [0], [0], [1], [0, 0, 1, 1], [], []>} : vector<2x256xbf16>, vector<256x1024xbf16>, vector<2x1024xf32> -> vector<2x1024xf32>
    %258 = vector.extract_strided_slice %257 {offsets = [0, 512], sizes = [2, 512], strides = [1, 1]} : vector<2x1024xf32> to vector<2x512xf32>
    %259 = arith.addf %258, %6 : vector<2x512xf32>
    %260 = vector.extract_strided_slice %259 {offsets = [0, 0], sizes = [2, 128], strides = [1, 1]} : vector<2x512xf32> to vector<2x128xf32>
    %cst_89 = arith.constant 5.000000e-01 : f32
    %261 = vector.broadcast %cst_89 : f32 to vector<2x128xf32>
    %262 = arith.mulf %261, %260 : vector<2x128xf32>
    %263 = math.tanh %262 : vector<2x128xf32>
    %cst_90 = arith.constant 5.000000e-01 : f32
    %264 = vector.broadcast %cst_90 : f32 to vector<2x128xf32>
    %265 = arith.mulf %264, %263 : vector<2x128xf32>
    %cst_91 = arith.constant 5.000000e-01 : f32
    %266 = vector.broadcast %cst_91 : f32 to vector<2x128xf32>
    %267 = arith.addf %265, %266 : vector<2x128xf32>
    %268 = vector.extract_strided_slice %259 {offsets = [0, 128], sizes = [2, 128], strides = [1, 1]} : vector<2x512xf32> to vector<2x128xf32>
    %cst_92 = arith.constant 5.000000e-01 : f32
    %269 = vector.broadcast %cst_92 : f32 to vector<2x128xf32>
    %270 = arith.mulf %269, %268 : vector<2x128xf32>
    %271 = math.tanh %270 : vector<2x128xf32>
    %cst_93 = arith.constant 5.000000e-01 : f32
    %272 = vector.broadcast %cst_93 : f32 to vector<2x128xf32>
    %273 = arith.mulf %272, %271 : vector<2x128xf32>
    %cst_94 = arith.constant 5.000000e-01 : f32
    %274 = vector.broadcast %cst_94 : f32 to vector<2x128xf32>
    %275 = arith.addf %273, %274 : vector<2x128xf32>
    %276 = vector.extract_strided_slice %259 {offsets = [0, 256], sizes = [2, 128], strides = [1, 1]} : vector<2x512xf32> to vector<2x128xf32>
    %277 = math.tanh %276 : vector<2x128xf32>
    %278 = vector.extract_strided_slice %259 {offsets = [0, 384], sizes = [2, 128], strides = [1, 1]} : vector<2x512xf32> to vector<2x128xf32>
    %cst_95 = arith.constant 5.000000e-01 : f32
    %279 = vector.broadcast %cst_95 : f32 to vector<2x128xf32>
    %280 = arith.mulf %279, %278 : vector<2x128xf32>
    %281 = math.tanh %280 : vector<2x128xf32>
    %cst_96 = arith.constant 5.000000e-01 : f32
    %282 = vector.broadcast %cst_96 : f32 to vector<2x128xf32>
    %283 = arith.mulf %282, %281 : vector<2x128xf32>
    %cst_97 = arith.constant 5.000000e-01 : f32
    %284 = vector.broadcast %cst_97 : f32 to vector<2x128xf32>
    %285 = arith.addf %283, %284 : vector<2x128xf32>
    %286 = arith.mulf %275, %212 : vector<2x128xf32>
    %287 = arith.mulf %267, %277 : vector<2x128xf32>
    %288 = arith.addf %286, %287 : vector<2x128xf32>
    %289 = math.tanh %288 : vector<2x128xf32>
    %290 = arith.mulf %285, %289 : vector<2x128xf32>
    %291 = arith.select %254, %211, %290 : vector<2x128xf32>
    %292 = arith.select %254, %212, %288 : vector<2x128xf32>
    %cst_98 = arith.constant 0.000000e+00 : f32
    %293 = vector.broadcast %cst_98 : f32 to vector<2x128xf32>
    %294 = arith.select %254, %293, %290 : vector<2x128xf32>
    %295 = arith.addf %215, %294 : vector<2x128xf32>
    %296 = arith.index_cast %c3_i32 : i32 to index
    %c0_99 = arith.constant 0 : index
    %c0_100 = arith.constant 0 : index
    %297 = vector.load %arg1[%296, %c0_99, %c0_100] : memref<8x2x512xf32, #tpu.memory_space<vmem>>, vector<1x2x512xf32>
    %298 = vector.shape_cast %297 : vector<1x2x512xf32> to vector<2x512xf32>
    %299 = vector.extract_strided_slice %257 {offsets = [0, 0], sizes = [2, 512], strides = [1, 1]} : vector<2x1024xf32> to vector<2x512xf32>
    %300 = arith.addf %298, %299 : vector<2x512xf32>
    %301 = vector.extract_strided_slice %300 {offsets = [0, 0], sizes = [2, 128], strides = [1, 1]} : vector<2x512xf32> to vector<2x128xf32>
    %cst_101 = arith.constant 5.000000e-01 : f32
    %302 = vector.broadcast %cst_101 : f32 to vector<2x128xf32>
    %303 = arith.mulf %302, %301 : vector<2x128xf32>
    %304 = math.tanh %303 : vector<2x128xf32>
    %cst_102 = arith.constant 5.000000e-01 : f32
    %305 = vector.broadcast %cst_102 : f32 to vector<2x128xf32>
    %306 = arith.mulf %305, %304 : vector<2x128xf32>
    %cst_103 = arith.constant 5.000000e-01 : f32
    %307 = vector.broadcast %cst_103 : f32 to vector<2x128xf32>
    %308 = arith.addf %306, %307 : vector<2x128xf32>
    %309 = vector.extract_strided_slice %300 {offsets = [0, 128], sizes = [2, 128], strides = [1, 1]} : vector<2x512xf32> to vector<2x128xf32>
    %cst_104 = arith.constant 5.000000e-01 : f32
    %310 = vector.broadcast %cst_104 : f32 to vector<2x128xf32>
    %311 = arith.mulf %310, %309 : vector<2x128xf32>
    %312 = math.tanh %311 : vector<2x128xf32>
    %cst_105 = arith.constant 5.000000e-01 : f32
    %313 = vector.broadcast %cst_105 : f32 to vector<2x128xf32>
    %314 = arith.mulf %313, %312 : vector<2x128xf32>
    %cst_106 = arith.constant 5.000000e-01 : f32
    %315 = vector.broadcast %cst_106 : f32 to vector<2x128xf32>
    %316 = arith.addf %314, %315 : vector<2x128xf32>
    %317 = vector.extract_strided_slice %300 {offsets = [0, 256], sizes = [2, 128], strides = [1, 1]} : vector<2x512xf32> to vector<2x128xf32>
    %318 = math.tanh %317 : vector<2x128xf32>
    %319 = vector.extract_strided_slice %300 {offsets = [0, 384], sizes = [2, 128], strides = [1, 1]} : vector<2x512xf32> to vector<2x128xf32>
    %cst_107 = arith.constant 5.000000e-01 : f32
    %320 = vector.broadcast %cst_107 : f32 to vector<2x128xf32>
    %321 = arith.mulf %320, %319 : vector<2x128xf32>
    %322 = math.tanh %321 : vector<2x128xf32>
    %cst_108 = arith.constant 5.000000e-01 : f32
    %323 = vector.broadcast %cst_108 : f32 to vector<2x128xf32>
    %324 = arith.mulf %323, %322 : vector<2x128xf32>
    %cst_109 = arith.constant 5.000000e-01 : f32
    %325 = vector.broadcast %cst_109 : f32 to vector<2x128xf32>
    %326 = arith.addf %324, %325 : vector<2x128xf32>
    %327 = arith.mulf %316, %249 : vector<2x128xf32>
    %328 = arith.mulf %308, %318 : vector<2x128xf32>
    %329 = arith.addf %327, %328 : vector<2x128xf32>
    %330 = math.tanh %329 : vector<2x128xf32>
    %331 = arith.mulf %326, %330 : vector<2x128xf32>
    %c4_i32 = arith.constant 4 : i32
    %c0_i32_110 = arith.constant 0 : i32
    %332 = arith.cmpi eq, %arg0, %c0_i32_110 : i32
    %c0_i32_111 = arith.constant 0 : i32
    %333 = arith.cmpi eq, %c4_i32, %c0_i32_111 : i32
    %334 = arith.andi %332, %333 : i1
    %335 = tpu.concatenate %331, %291 in 1 : vector<2x128xf32>, vector<2x128xf32> -> vector<2x256xf32>
    %336 = arith.truncf %335 : vector<2x256xf32> to vector<2x256xbf16>
    %cst_112 = arith.constant dense<0.000000e+00> : vector<2x1024xf32>
    %337 = tpu.matmul %336, %3, %cst_112 {dimension_numbers = #tpu.dot_dimension_numbers<[1], [0], [0], [1], [0, 0, 1, 1], [], []>} : vector<2x256xbf16>, vector<256x1024xbf16>, vector<2x1024xf32> -> vector<2x1024xf32>
    %338 = vector.extract_strided_slice %337 {offsets = [0, 512], sizes = [2, 512], strides = [1, 1]} : vector<2x1024xf32> to vector<2x512xf32>
    %339 = arith.addf %338, %6 : vector<2x512xf32>
    %340 = vector.extract_strided_slice %339 {offsets = [0, 0], sizes = [2, 128], strides = [1, 1]} : vector<2x512xf32> to vector<2x128xf32>
    %cst_113 = arith.constant 5.000000e-01 : f32
    %341 = vector.broadcast %cst_113 : f32 to vector<2x128xf32>
    %342 = arith.mulf %341, %340 : vector<2x128xf32>
    %343 = math.tanh %342 : vector<2x128xf32>
    %cst_114 = arith.constant 5.000000e-01 : f32
    %344 = vector.broadcast %cst_114 : f32 to vector<2x128xf32>
    %345 = arith.mulf %344, %343 : vector<2x128xf32>
    %cst_115 = arith.constant 5.000000e-01 : f32
    %346 = vector.broadcast %cst_115 : f32 to vector<2x128xf32>
    %347 = arith.addf %345, %346 : vector<2x128xf32>
    %348 = vector.extract_strided_slice %339 {offsets = [0, 128], sizes = [2, 128], strides = [1, 1]} : vector<2x512xf32> to vector<2x128xf32>
    %cst_116 = arith.constant 5.000000e-01 : f32
    %349 = vector.broadcast %cst_116 : f32 to vector<2x128xf32>
    %350 = arith.mulf %349, %348 : vector<2x128xf32>
    %351 = math.tanh %350 : vector<2x128xf32>
    %cst_117 = arith.constant 5.000000e-01 : f32
    %352 = vector.broadcast %cst_117 : f32 to vector<2x128xf32>
    %353 = arith.mulf %352, %351 : vector<2x128xf32>
    %cst_118 = arith.constant 5.000000e-01 : f32
    %354 = vector.broadcast %cst_118 : f32 to vector<2x128xf32>
    %355 = arith.addf %353, %354 : vector<2x128xf32>
    %356 = vector.extract_strided_slice %339 {offsets = [0, 256], sizes = [2, 128], strides = [1, 1]} : vector<2x512xf32> to vector<2x128xf32>
    %357 = math.tanh %356 : vector<2x128xf32>
    %358 = vector.extract_strided_slice %339 {offsets = [0, 384], sizes = [2, 128], strides = [1, 1]} : vector<2x512xf32> to vector<2x128xf32>
    %cst_119 = arith.constant 5.000000e-01 : f32
    %359 = vector.broadcast %cst_119 : f32 to vector<2x128xf32>
    %360 = arith.mulf %359, %358 : vector<2x128xf32>
    %361 = math.tanh %360 : vector<2x128xf32>
    %cst_120 = arith.constant 5.000000e-01 : f32
    %362 = vector.broadcast %cst_120 : f32 to vector<2x128xf32>
    %363 = arith.mulf %362, %361 : vector<2x128xf32>
    %cst_121 = arith.constant 5.000000e-01 : f32
    %364 = vector.broadcast %cst_121 : f32 to vector<2x128xf32>
    %365 = arith.addf %363, %364 : vector<2x128xf32>
    %366 = arith.mulf %355, %292 : vector<2x128xf32>
    %367 = arith.mulf %347, %357 : vector<2x128xf32>
    %368 = arith.addf %366, %367 : vector<2x128xf32>
    %369 = math.tanh %368 : vector<2x128xf32>
    %370 = arith.mulf %365, %369 : vector<2x128xf32>
    %371 = arith.select %334, %291, %370 : vector<2x128xf32>
    %372 = arith.select %334, %292, %368 : vector<2x128xf32>
    %cst_122 = arith.constant 0.000000e+00 : f32
    %373 = vector.broadcast %cst_122 : f32 to vector<2x128xf32>
    %374 = arith.select %334, %373, %370 : vector<2x128xf32>
    %375 = arith.addf %295, %374 : vector<2x128xf32>
    %376 = arith.index_cast %c4_i32 : i32 to index
    %c0_123 = arith.constant 0 : index
    %c0_124 = arith.constant 0 : index
    %377 = vector.load %arg1[%376, %c0_123, %c0_124] : memref<8x2x512xf32, #tpu.memory_space<vmem>>, vector<1x2x512xf32>
    %378 = vector.shape_cast %377 : vector<1x2x512xf32> to vector<2x512xf32>
    %379 = vector.extract_strided_slice %337 {offsets = [0, 0], sizes = [2, 512], strides = [1, 1]} : vector<2x1024xf32> to vector<2x512xf32>
    %380 = arith.addf %378, %379 : vector<2x512xf32>
    %381 = vector.extract_strided_slice %380 {offsets = [0, 0], sizes = [2, 128], strides = [1, 1]} : vector<2x512xf32> to vector<2x128xf32>
    %cst_125 = arith.constant 5.000000e-01 : f32
    %382 = vector.broadcast %cst_125 : f32 to vector<2x128xf32>
    %383 = arith.mulf %382, %381 : vector<2x128xf32>
    %384 = math.tanh %383 : vector<2x128xf32>
    %cst_126 = arith.constant 5.000000e-01 : f32
    %385 = vector.broadcast %cst_126 : f32 to vector<2x128xf32>
    %386 = arith.mulf %385, %384 : vector<2x128xf32>
    %cst_127 = arith.constant 5.000000e-01 : f32
    %387 = vector.broadcast %cst_127 : f32 to vector<2x128xf32>
    %388 = arith.addf %386, %387 : vector<2x128xf32>
    %389 = vector.extract_strided_slice %380 {offsets = [0, 128], sizes = [2, 128], strides = [1, 1]} : vector<2x512xf32> to vector<2x128xf32>
    %cst_128 = arith.constant 5.000000e-01 : f32
    %390 = vector.broadcast %cst_128 : f32 to vector<2x128xf32>
    %391 = arith.mulf %390, %389 : vector<2x128xf32>
    %392 = math.tanh %391 : vector<2x128xf32>
    %cst_129 = arith.constant 5.000000e-01 : f32
    %393 = vector.broadcast %cst_129 : f32 to vector<2x128xf32>
    %394 = arith.mulf %393, %392 : vector<2x128xf32>
    %cst_130 = arith.constant 5.000000e-01 : f32
    %395 = vector.broadcast %cst_130 : f32 to vector<2x128xf32>
    %396 = arith.addf %394, %395 : vector<2x128xf32>
    %397 = vector.extract_strided_slice %380 {offsets = [0, 256], sizes = [2, 128], strides = [1, 1]} : vector<2x512xf32> to vector<2x128xf32>
    %398 = math.tanh %397 : vector<2x128xf32>
    %399 = vector.extract_strided_slice %380 {offsets = [0, 384], sizes = [2, 128], strides = [1, 1]} : vector<2x512xf32> to vector<2x128xf32>
    %cst_131 = arith.constant 5.000000e-01 : f32
    %400 = vector.broadcast %cst_131 : f32 to vector<2x128xf32>
    %401 = arith.mulf %400, %399 : vector<2x128xf32>
    %402 = math.tanh %401 : vector<2x128xf32>
    %cst_132 = arith.constant 5.000000e-01 : f32
    %403 = vector.broadcast %cst_132 : f32 to vector<2x128xf32>
    %404 = arith.mulf %403, %402 : vector<2x128xf32>
    %cst_133 = arith.constant 5.000000e-01 : f32
    %405 = vector.broadcast %cst_133 : f32 to vector<2x128xf32>
    %406 = arith.addf %404, %405 : vector<2x128xf32>
    %407 = arith.mulf %396, %329 : vector<2x128xf32>
    %408 = arith.mulf %388, %398 : vector<2x128xf32>
    %409 = arith.addf %407, %408 : vector<2x128xf32>
    %410 = math.tanh %409 : vector<2x128xf32>
    %411 = arith.mulf %406, %410 : vector<2x128xf32>
    %c5_i32 = arith.constant 5 : i32
    %c0_i32_134 = arith.constant 0 : i32
    %412 = arith.cmpi eq, %arg0, %c0_i32_134 : i32
    %c0_i32_135 = arith.constant 0 : i32
    %413 = arith.cmpi eq, %c5_i32, %c0_i32_135 : i32
    %414 = arith.andi %412, %413 : i1
    %415 = tpu.concatenate %411, %371 in 1 : vector<2x128xf32>, vector<2x128xf32> -> vector<2x256xf32>
    %416 = arith.truncf %415 : vector<2x256xf32> to vector<2x256xbf16>
    %cst_136 = arith.constant dense<0.000000e+00> : vector<2x1024xf32>
    %417 = tpu.matmul %416, %3, %cst_136 {dimension_numbers = #tpu.dot_dimension_numbers<[1], [0], [0], [1], [0, 0, 1, 1], [], []>} : vector<2x256xbf16>, vector<256x1024xbf16>, vector<2x1024xf32> -> vector<2x1024xf32>
    %418 = vector.extract_strided_slice %417 {offsets = [0, 512], sizes = [2, 512], strides = [1, 1]} : vector<2x1024xf32> to vector<2x512xf32>
    %419 = arith.addf %418, %6 : vector<2x512xf32>
    %420 = vector.extract_strided_slice %419 {offsets = [0, 0], sizes = [2, 128], strides = [1, 1]} : vector<2x512xf32> to vector<2x128xf32>
    %cst_137 = arith.constant 5.000000e-01 : f32
    %421 = vector.broadcast %cst_137 : f32 to vector<2x128xf32>
    %422 = arith.mulf %421, %420 : vector<2x128xf32>
    %423 = math.tanh %422 : vector<2x128xf32>
    %cst_138 = arith.constant 5.000000e-01 : f32
    %424 = vector.broadcast %cst_138 : f32 to vector<2x128xf32>
    %425 = arith.mulf %424, %423 : vector<2x128xf32>
    %cst_139 = arith.constant 5.000000e-01 : f32
    %426 = vector.broadcast %cst_139 : f32 to vector<2x128xf32>
    %427 = arith.addf %425, %426 : vector<2x128xf32>
    %428 = vector.extract_strided_slice %419 {offsets = [0, 128], sizes = [2, 128], strides = [1, 1]} : vector<2x512xf32> to vector<2x128xf32>
    %cst_140 = arith.constant 5.000000e-01 : f32
    %429 = vector.broadcast %cst_140 : f32 to vector<2x128xf32>
    %430 = arith.mulf %429, %428 : vector<2x128xf32>
    %431 = math.tanh %430 : vector<2x128xf32>
    %cst_141 = arith.constant 5.000000e-01 : f32
    %432 = vector.broadcast %cst_141 : f32 to vector<2x128xf32>
    %433 = arith.mulf %432, %431 : vector<2x128xf32>
    %cst_142 = arith.constant 5.000000e-01 : f32
    %434 = vector.broadcast %cst_142 : f32 to vector<2x128xf32>
    %435 = arith.addf %433, %434 : vector<2x128xf32>
    %436 = vector.extract_strided_slice %419 {offsets = [0, 256], sizes = [2, 128], strides = [1, 1]} : vector<2x512xf32> to vector<2x128xf32>
    %437 = math.tanh %436 : vector<2x128xf32>
    %438 = vector.extract_strided_slice %419 {offsets = [0, 384], sizes = [2, 128], strides = [1, 1]} : vector<2x512xf32> to vector<2x128xf32>
    %cst_143 = arith.constant 5.000000e-01 : f32
    %439 = vector.broadcast %cst_143 : f32 to vector<2x128xf32>
    %440 = arith.mulf %439, %438 : vector<2x128xf32>
    %441 = math.tanh %440 : vector<2x128xf32>
    %cst_144 = arith.constant 5.000000e-01 : f32
    %442 = vector.broadcast %cst_144 : f32 to vector<2x128xf32>
    %443 = arith.mulf %442, %441 : vector<2x128xf32>
    %cst_145 = arith.constant 5.000000e-01 : f32
    %444 = vector.broadcast %cst_145 : f32 to vector<2x128xf32>
    %445 = arith.addf %443, %444 : vector<2x128xf32>
    %446 = arith.mulf %435, %372 : vector<2x128xf32>
    %447 = arith.mulf %427, %437 : vector<2x128xf32>
    %448 = arith.addf %446, %447 : vector<2x128xf32>
    %449 = math.tanh %448 : vector<2x128xf32>
    %450 = arith.mulf %445, %449 : vector<2x128xf32>
    %451 = arith.select %414, %371, %450 : vector<2x128xf32>
    %452 = arith.select %414, %372, %448 : vector<2x128xf32>
    %cst_146 = arith.constant 0.000000e+00 : f32
    %453 = vector.broadcast %cst_146 : f32 to vector<2x128xf32>
    %454 = arith.select %414, %453, %450 : vector<2x128xf32>
    %455 = arith.addf %375, %454 : vector<2x128xf32>
    %456 = arith.index_cast %c5_i32 : i32 to index
    %c0_147 = arith.constant 0 : index
    %c0_148 = arith.constant 0 : index
    %457 = vector.load %arg1[%456, %c0_147, %c0_148] : memref<8x2x512xf32, #tpu.memory_space<vmem>>, vector<1x2x512xf32>
    %458 = vector.shape_cast %457 : vector<1x2x512xf32> to vector<2x512xf32>
    %459 = vector.extract_strided_slice %417 {offsets = [0, 0], sizes = [2, 512], strides = [1, 1]} : vector<2x1024xf32> to vector<2x512xf32>
    %460 = arith.addf %458, %459 : vector<2x512xf32>
    %461 = vector.extract_strided_slice %460 {offsets = [0, 0], sizes = [2, 128], strides = [1, 1]} : vector<2x512xf32> to vector<2x128xf32>
    %cst_149 = arith.constant 5.000000e-01 : f32
    %462 = vector.broadcast %cst_149 : f32 to vector<2x128xf32>
    %463 = arith.mulf %462, %461 : vector<2x128xf32>
    %464 = math.tanh %463 : vector<2x128xf32>
    %cst_150 = arith.constant 5.000000e-01 : f32
    %465 = vector.broadcast %cst_150 : f32 to vector<2x128xf32>
    %466 = arith.mulf %465, %464 : vector<2x128xf32>
    %cst_151 = arith.constant 5.000000e-01 : f32
    %467 = vector.broadcast %cst_151 : f32 to vector<2x128xf32>
    %468 = arith.addf %466, %467 : vector<2x128xf32>
    %469 = vector.extract_strided_slice %460 {offsets = [0, 128], sizes = [2, 128], strides = [1, 1]} : vector<2x512xf32> to vector<2x128xf32>
    %cst_152 = arith.constant 5.000000e-01 : f32
    %470 = vector.broadcast %cst_152 : f32 to vector<2x128xf32>
    %471 = arith.mulf %470, %469 : vector<2x128xf32>
    %472 = math.tanh %471 : vector<2x128xf32>
    %cst_153 = arith.constant 5.000000e-01 : f32
    %473 = vector.broadcast %cst_153 : f32 to vector<2x128xf32>
    %474 = arith.mulf %473, %472 : vector<2x128xf32>
    %cst_154 = arith.constant 5.000000e-01 : f32
    %475 = vector.broadcast %cst_154 : f32 to vector<2x128xf32>
    %476 = arith.addf %474, %475 : vector<2x128xf32>
    %477 = vector.extract_strided_slice %460 {offsets = [0, 256], sizes = [2, 128], strides = [1, 1]} : vector<2x512xf32> to vector<2x128xf32>
    %478 = math.tanh %477 : vector<2x128xf32>
    %479 = vector.extract_strided_slice %460 {offsets = [0, 384], sizes = [2, 128], strides = [1, 1]} : vector<2x512xf32> to vector<2x128xf32>
    %cst_155 = arith.constant 5.000000e-01 : f32
    %480 = vector.broadcast %cst_155 : f32 to vector<2x128xf32>
    %481 = arith.mulf %480, %479 : vector<2x128xf32>
    %482 = math.tanh %481 : vector<2x128xf32>
    %cst_156 = arith.constant 5.000000e-01 : f32
    %483 = vector.broadcast %cst_156 : f32 to vector<2x128xf32>
    %484 = arith.mulf %483, %482 : vector<2x128xf32>
    %cst_157 = arith.constant 5.000000e-01 : f32
    %485 = vector.broadcast %cst_157 : f32 to vector<2x128xf32>
    %486 = arith.addf %484, %485 : vector<2x128xf32>
    %487 = arith.mulf %476, %409 : vector<2x128xf32>
    %488 = arith.mulf %468, %478 : vector<2x128xf32>
    %489 = arith.addf %487, %488 : vector<2x128xf32>
    %490 = math.tanh %489 : vector<2x128xf32>
    %491 = arith.mulf %486, %490 : vector<2x128xf32>
    %c6_i32 = arith.constant 6 : i32
    %c0_i32_158 = arith.constant 0 : i32
    %492 = arith.cmpi eq, %arg0, %c0_i32_158 : i32
    %c0_i32_159 = arith.constant 0 : i32
    %493 = arith.cmpi eq, %c6_i32, %c0_i32_159 : i32
    %494 = arith.andi %492, %493 : i1
    %495 = tpu.concatenate %491, %451 in 1 : vector<2x128xf32>, vector<2x128xf32> -> vector<2x256xf32>
    %496 = arith.truncf %495 : vector<2x256xf32> to vector<2x256xbf16>
    %cst_160 = arith.constant dense<0.000000e+00> : vector<2x1024xf32>
    %497 = tpu.matmul %496, %3, %cst_160 {dimension_numbers = #tpu.dot_dimension_numbers<[1], [0], [0], [1], [0, 0, 1, 1], [], []>} : vector<2x256xbf16>, vector<256x1024xbf16>, vector<2x1024xf32> -> vector<2x1024xf32>
    %498 = vector.extract_strided_slice %497 {offsets = [0, 512], sizes = [2, 512], strides = [1, 1]} : vector<2x1024xf32> to vector<2x512xf32>
    %499 = arith.addf %498, %6 : vector<2x512xf32>
    %500 = vector.extract_strided_slice %499 {offsets = [0, 0], sizes = [2, 128], strides = [1, 1]} : vector<2x512xf32> to vector<2x128xf32>
    %cst_161 = arith.constant 5.000000e-01 : f32
    %501 = vector.broadcast %cst_161 : f32 to vector<2x128xf32>
    %502 = arith.mulf %501, %500 : vector<2x128xf32>
    %503 = math.tanh %502 : vector<2x128xf32>
    %cst_162 = arith.constant 5.000000e-01 : f32
    %504 = vector.broadcast %cst_162 : f32 to vector<2x128xf32>
    %505 = arith.mulf %504, %503 : vector<2x128xf32>
    %cst_163 = arith.constant 5.000000e-01 : f32
    %506 = vector.broadcast %cst_163 : f32 to vector<2x128xf32>
    %507 = arith.addf %505, %506 : vector<2x128xf32>
    %508 = vector.extract_strided_slice %499 {offsets = [0, 128], sizes = [2, 128], strides = [1, 1]} : vector<2x512xf32> to vector<2x128xf32>
    %cst_164 = arith.constant 5.000000e-01 : f32
    %509 = vector.broadcast %cst_164 : f32 to vector<2x128xf32>
    %510 = arith.mulf %509, %508 : vector<2x128xf32>
    %511 = math.tanh %510 : vector<2x128xf32>
    %cst_165 = arith.constant 5.000000e-01 : f32
    %512 = vector.broadcast %cst_165 : f32 to vector<2x128xf32>
    %513 = arith.mulf %512, %511 : vector<2x128xf32>
    %cst_166 = arith.constant 5.000000e-01 : f32
    %514 = vector.broadcast %cst_166 : f32 to vector<2x128xf32>
    %515 = arith.addf %513, %514 : vector<2x128xf32>
    %516 = vector.extract_strided_slice %499 {offsets = [0, 256], sizes = [2, 128], strides = [1, 1]} : vector<2x512xf32> to vector<2x128xf32>
    %517 = math.tanh %516 : vector<2x128xf32>
    %518 = vector.extract_strided_slice %499 {offsets = [0, 384], sizes = [2, 128], strides = [1, 1]} : vector<2x512xf32> to vector<2x128xf32>
    %cst_167 = arith.constant 5.000000e-01 : f32
    %519 = vector.broadcast %cst_167 : f32 to vector<2x128xf32>
    %520 = arith.mulf %519, %518 : vector<2x128xf32>
    %521 = math.tanh %520 : vector<2x128xf32>
    %cst_168 = arith.constant 5.000000e-01 : f32
    %522 = vector.broadcast %cst_168 : f32 to vector<2x128xf32>
    %523 = arith.mulf %522, %521 : vector<2x128xf32>
    %cst_169 = arith.constant 5.000000e-01 : f32
    %524 = vector.broadcast %cst_169 : f32 to vector<2x128xf32>
    %525 = arith.addf %523, %524 : vector<2x128xf32>
    %526 = arith.mulf %515, %452 : vector<2x128xf32>
    %527 = arith.mulf %507, %517 : vector<2x128xf32>
    %528 = arith.addf %526, %527 : vector<2x128xf32>
    %529 = math.tanh %528 : vector<2x128xf32>
    %530 = arith.mulf %525, %529 : vector<2x128xf32>
    %531 = arith.select %494, %451, %530 : vector<2x128xf32>
    %532 = arith.select %494, %452, %528 : vector<2x128xf32>
    %cst_170 = arith.constant 0.000000e+00 : f32
    %533 = vector.broadcast %cst_170 : f32 to vector<2x128xf32>
    %534 = arith.select %494, %533, %530 : vector<2x128xf32>
    %535 = arith.addf %455, %534 : vector<2x128xf32>
    %536 = arith.index_cast %c6_i32 : i32 to index
    %c0_171 = arith.constant 0 : index
    %c0_172 = arith.constant 0 : index
    %537 = vector.load %arg1[%536, %c0_171, %c0_172] : memref<8x2x512xf32, #tpu.memory_space<vmem>>, vector<1x2x512xf32>
    %538 = vector.shape_cast %537 : vector<1x2x512xf32> to vector<2x512xf32>
    %539 = vector.extract_strided_slice %497 {offsets = [0, 0], sizes = [2, 512], strides = [1, 1]} : vector<2x1024xf32> to vector<2x512xf32>
    %540 = arith.addf %538, %539 : vector<2x512xf32>
    %541 = vector.extract_strided_slice %540 {offsets = [0, 0], sizes = [2, 128], strides = [1, 1]} : vector<2x512xf32> to vector<2x128xf32>
    %cst_173 = arith.constant 5.000000e-01 : f32
    %542 = vector.broadcast %cst_173 : f32 to vector<2x128xf32>
    %543 = arith.mulf %542, %541 : vector<2x128xf32>
    %544 = math.tanh %543 : vector<2x128xf32>
    %cst_174 = arith.constant 5.000000e-01 : f32
    %545 = vector.broadcast %cst_174 : f32 to vector<2x128xf32>
    %546 = arith.mulf %545, %544 : vector<2x128xf32>
    %cst_175 = arith.constant 5.000000e-01 : f32
    %547 = vector.broadcast %cst_175 : f32 to vector<2x128xf32>
    %548 = arith.addf %546, %547 : vector<2x128xf32>
    %549 = vector.extract_strided_slice %540 {offsets = [0, 128], sizes = [2, 128], strides = [1, 1]} : vector<2x512xf32> to vector<2x128xf32>
    %cst_176 = arith.constant 5.000000e-01 : f32
    %550 = vector.broadcast %cst_176 : f32 to vector<2x128xf32>
    %551 = arith.mulf %550, %549 : vector<2x128xf32>
    %552 = math.tanh %551 : vector<2x128xf32>
    %cst_177 = arith.constant 5.000000e-01 : f32
    %553 = vector.broadcast %cst_177 : f32 to vector<2x128xf32>
    %554 = arith.mulf %553, %552 : vector<2x128xf32>
    %cst_178 = arith.constant 5.000000e-01 : f32
    %555 = vector.broadcast %cst_178 : f32 to vector<2x128xf32>
    %556 = arith.addf %554, %555 : vector<2x128xf32>
    %557 = vector.extract_strided_slice %540 {offsets = [0, 256], sizes = [2, 128], strides = [1, 1]} : vector<2x512xf32> to vector<2x128xf32>
    %558 = math.tanh %557 : vector<2x128xf32>
    %559 = vector.extract_strided_slice %540 {offsets = [0, 384], sizes = [2, 128], strides = [1, 1]} : vector<2x512xf32> to vector<2x128xf32>
    %cst_179 = arith.constant 5.000000e-01 : f32
    %560 = vector.broadcast %cst_179 : f32 to vector<2x128xf32>
    %561 = arith.mulf %560, %559 : vector<2x128xf32>
    %562 = math.tanh %561 : vector<2x128xf32>
    %cst_180 = arith.constant 5.000000e-01 : f32
    %563 = vector.broadcast %cst_180 : f32 to vector<2x128xf32>
    %564 = arith.mulf %563, %562 : vector<2x128xf32>
    %cst_181 = arith.constant 5.000000e-01 : f32
    %565 = vector.broadcast %cst_181 : f32 to vector<2x128xf32>
    %566 = arith.addf %564, %565 : vector<2x128xf32>
    %567 = arith.mulf %556, %489 : vector<2x128xf32>
    %568 = arith.mulf %548, %558 : vector<2x128xf32>
    %569 = arith.addf %567, %568 : vector<2x128xf32>
    %570 = math.tanh %569 : vector<2x128xf32>
    %571 = arith.mulf %566, %570 : vector<2x128xf32>
    %c7_i32 = arith.constant 7 : i32
    %c0_i32_182 = arith.constant 0 : i32
    %572 = arith.cmpi eq, %arg0, %c0_i32_182 : i32
    %c0_i32_183 = arith.constant 0 : i32
    %573 = arith.cmpi eq, %c7_i32, %c0_i32_183 : i32
    %574 = arith.andi %572, %573 : i1
    %575 = tpu.concatenate %571, %531 in 1 : vector<2x128xf32>, vector<2x128xf32> -> vector<2x256xf32>
    %576 = arith.truncf %575 : vector<2x256xf32> to vector<2x256xbf16>
    %cst_184 = arith.constant dense<0.000000e+00> : vector<2x1024xf32>
    %577 = tpu.matmul %576, %3, %cst_184 {dimension_numbers = #tpu.dot_dimension_numbers<[1], [0], [0], [1], [0, 0, 1, 1], [], []>} : vector<2x256xbf16>, vector<256x1024xbf16>, vector<2x1024xf32> -> vector<2x1024xf32>
    %578 = vector.extract_strided_slice %577 {offsets = [0, 512], sizes = [2, 512], strides = [1, 1]} : vector<2x1024xf32> to vector<2x512xf32>
    %579 = arith.addf %578, %6 : vector<2x512xf32>
    %580 = vector.extract_strided_slice %579 {offsets = [0, 0], sizes = [2, 128], strides = [1, 1]} : vector<2x512xf32> to vector<2x128xf32>
    %cst_185 = arith.constant 5.000000e-01 : f32
    %581 = vector.broadcast %cst_185 : f32 to vector<2x128xf32>
    %582 = arith.mulf %581, %580 : vector<2x128xf32>
    %583 = math.tanh %582 : vector<2x128xf32>
    %cst_186 = arith.constant 5.000000e-01 : f32
    %584 = vector.broadcast %cst_186 : f32 to vector<2x128xf32>
    %585 = arith.mulf %584, %583 : vector<2x128xf32>
    %cst_187 = arith.constant 5.000000e-01 : f32
    %586 = vector.broadcast %cst_187 : f32 to vector<2x128xf32>
    %587 = arith.addf %585, %586 : vector<2x128xf32>
    %588 = vector.extract_strided_slice %579 {offsets = [0, 128], sizes = [2, 128], strides = [1, 1]} : vector<2x512xf32> to vector<2x128xf32>
    %cst_188 = arith.constant 5.000000e-01 : f32
    %589 = vector.broadcast %cst_188 : f32 to vector<2x128xf32>
    %590 = arith.mulf %589, %588 : vector<2x128xf32>
    %591 = math.tanh %590 : vector<2x128xf32>
    %cst_189 = arith.constant 5.000000e-01 : f32
    %592 = vector.broadcast %cst_189 : f32 to vector<2x128xf32>
    %593 = arith.mulf %592, %591 : vector<2x128xf32>
    %cst_190 = arith.constant 5.000000e-01 : f32
    %594 = vector.broadcast %cst_190 : f32 to vector<2x128xf32>
    %595 = arith.addf %593, %594 : vector<2x128xf32>
    %596 = vector.extract_strided_slice %579 {offsets = [0, 256], sizes = [2, 128], strides = [1, 1]} : vector<2x512xf32> to vector<2x128xf32>
    %597 = math.tanh %596 : vector<2x128xf32>
    %598 = vector.extract_strided_slice %579 {offsets = [0, 384], sizes = [2, 128], strides = [1, 1]} : vector<2x512xf32> to vector<2x128xf32>
    %cst_191 = arith.constant 5.000000e-01 : f32
    %599 = vector.broadcast %cst_191 : f32 to vector<2x128xf32>
    %600 = arith.mulf %599, %598 : vector<2x128xf32>
    %601 = math.tanh %600 : vector<2x128xf32>
    %cst_192 = arith.constant 5.000000e-01 : f32
    %602 = vector.broadcast %cst_192 : f32 to vector<2x128xf32>
    %603 = arith.mulf %602, %601 : vector<2x128xf32>
    %cst_193 = arith.constant 5.000000e-01 : f32
    %604 = vector.broadcast %cst_193 : f32 to vector<2x128xf32>
    %605 = arith.addf %603, %604 : vector<2x128xf32>
    %606 = arith.mulf %595, %532 : vector<2x128xf32>
    %607 = arith.mulf %587, %597 : vector<2x128xf32>
    %608 = arith.addf %606, %607 : vector<2x128xf32>
    %609 = math.tanh %608 : vector<2x128xf32>
    %610 = arith.mulf %605, %609 : vector<2x128xf32>
    %611 = arith.select %574, %531, %610 : vector<2x128xf32>
    %612 = arith.select %574, %532, %608 : vector<2x128xf32>
    %cst_194 = arith.constant 0.000000e+00 : f32
    %613 = vector.broadcast %cst_194 : f32 to vector<2x128xf32>
    %614 = arith.select %574, %613, %610 : vector<2x128xf32>
    %615 = arith.addf %535, %614 : vector<2x128xf32>
    %616 = arith.index_cast %c7_i32 : i32 to index
    %c0_195 = arith.constant 0 : index
    %c0_196 = arith.constant 0 : index
    %617 = vector.load %arg1[%616, %c0_195, %c0_196] : memref<8x2x512xf32, #tpu.memory_space<vmem>>, vector<1x2x512xf32>
    %618 = vector.shape_cast %617 : vector<1x2x512xf32> to vector<2x512xf32>
    %619 = vector.extract_strided_slice %577 {offsets = [0, 0], sizes = [2, 512], strides = [1, 1]} : vector<2x1024xf32> to vector<2x512xf32>
    %620 = arith.addf %618, %619 : vector<2x512xf32>
    %621 = vector.extract_strided_slice %620 {offsets = [0, 0], sizes = [2, 128], strides = [1, 1]} : vector<2x512xf32> to vector<2x128xf32>
    %cst_197 = arith.constant 5.000000e-01 : f32
    %622 = vector.broadcast %cst_197 : f32 to vector<2x128xf32>
    %623 = arith.mulf %622, %621 : vector<2x128xf32>
    %624 = math.tanh %623 : vector<2x128xf32>
    %cst_198 = arith.constant 5.000000e-01 : f32
    %625 = vector.broadcast %cst_198 : f32 to vector<2x128xf32>
    %626 = arith.mulf %625, %624 : vector<2x128xf32>
    %cst_199 = arith.constant 5.000000e-01 : f32
    %627 = vector.broadcast %cst_199 : f32 to vector<2x128xf32>
    %628 = arith.addf %626, %627 : vector<2x128xf32>
    %629 = vector.extract_strided_slice %620 {offsets = [0, 128], sizes = [2, 128], strides = [1, 1]} : vector<2x512xf32> to vector<2x128xf32>
    %cst_200 = arith.constant 5.000000e-01 : f32
    %630 = vector.broadcast %cst_200 : f32 to vector<2x128xf32>
    %631 = arith.mulf %630, %629 : vector<2x128xf32>
    %632 = math.tanh %631 : vector<2x128xf32>
    %cst_201 = arith.constant 5.000000e-01 : f32
    %633 = vector.broadcast %cst_201 : f32 to vector<2x128xf32>
    %634 = arith.mulf %633, %632 : vector<2x128xf32>
    %cst_202 = arith.constant 5.000000e-01 : f32
    %635 = vector.broadcast %cst_202 : f32 to vector<2x128xf32>
    %636 = arith.addf %634, %635 : vector<2x128xf32>
    %637 = vector.extract_strided_slice %620 {offsets = [0, 256], sizes = [2, 128], strides = [1, 1]} : vector<2x512xf32> to vector<2x128xf32>
    %638 = math.tanh %637 : vector<2x128xf32>
    %639 = vector.extract_strided_slice %620 {offsets = [0, 384], sizes = [2, 128], strides = [1, 1]} : vector<2x512xf32> to vector<2x128xf32>
    %cst_203 = arith.constant 5.000000e-01 : f32
    %640 = vector.broadcast %cst_203 : f32 to vector<2x128xf32>
    %641 = arith.mulf %640, %639 : vector<2x128xf32>
    %642 = math.tanh %641 : vector<2x128xf32>
    %cst_204 = arith.constant 5.000000e-01 : f32
    %643 = vector.broadcast %cst_204 : f32 to vector<2x128xf32>
    %644 = arith.mulf %643, %642 : vector<2x128xf32>
    %cst_205 = arith.constant 5.000000e-01 : f32
    %645 = vector.broadcast %cst_205 : f32 to vector<2x128xf32>
    %646 = arith.addf %644, %645 : vector<2x128xf32>
    %647 = arith.mulf %636, %569 : vector<2x128xf32>
    %648 = arith.mulf %628, %638 : vector<2x128xf32>
    %649 = arith.addf %647, %648 : vector<2x128xf32>
    %650 = math.tanh %649 : vector<2x128xf32>
    %651 = arith.mulf %646, %650 : vector<2x128xf32>
    %c8_i32 = arith.constant 8 : i32
    %c0_206 = arith.constant 0 : index
    %c0_207 = arith.constant 0 : index
    %652 = vector.load %arg7[%c0_206, %c0_207] : memref<2x128xf32, #tpu.memory_space<vmem>>, vector<2x128xf32>
    tpu.vector_store %arg7[%c0_206, %c0_207], %651 {strides = array<i32>} : memref<2x128xf32, #tpu.memory_space<vmem>>, vector<2x128xf32>,
    %c0_208 = arith.constant 0 : index
    %c0_209 = arith.constant 0 : index
    %653 = vector.load %arg8[%c0_208, %c0_209] : memref<2x128xf32, #tpu.memory_space<vmem>>, vector<2x128xf32>
    tpu.vector_store %arg8[%c0_208, %c0_209], %649 {strides = array<i32>} : memref<2x128xf32, #tpu.memory_space<vmem>>, vector<2x128xf32>,
    %c0_210 = arith.constant 0 : index
    %c0_211 = arith.constant 0 : index
    %654 = vector.load %arg9[%c0_210, %c0_211] : memref<2x128xf32, #tpu.memory_space<vmem>>, vector<2x128xf32>
    tpu.vector_store %arg9[%c0_210, %c0_211], %611 {strides = array<i32>} : memref<2x128xf32, #tpu.memory_space<vmem>>, vector<2x128xf32>,
    %c0_212 = arith.constant 0 : index
    %c0_213 = arith.constant 0 : index
    %655 = vector.load %arg10[%c0_212, %c0_213] : memref<2x128xf32, #tpu.memory_space<vmem>>, vector<2x128xf32>
    tpu.vector_store %arg10[%c0_212, %c0_213], %612 {strides = array<i32>} : memref<2x128xf32, #tpu.memory_space<vmem>>, vector<2x128xf32>,
    %c0_214 = arith.constant 0 : index
    %c0_215 = arith.constant 0 : index
    %656 = vector.load %arg11[%c0_214, %c0_215] : memref<2x128xf32, #tpu.memory_space<vmem>>, vector<2x128xf32>
    tpu.vector_store %arg11[%c0_214, %c0_215], %615 {strides = array<i32>} : memref<2x128xf32, #tpu.memory_space<vmem>>, vector<2x128xf32>,
    %c1_i32_216 = arith.constant 1 : i32
    %657 = arith.cmpi eq, %arg0, %c1_i32_216 : i32
    %658 = arith.extui %657 : i1 to i32
    %c0_i32_217 = arith.constant 0 : i32
    %659 = arith.cmpi ne, %658, %c0_i32_217 : i32
    scf.if %659 {
      %660 = tpu.concatenate %651, %611 in 1 : vector<2x128xf32>, vector<2x128xf32> -> vector<2x256xf32>
      %661 = arith.truncf %660 : vector<2x256xf32> to vector<2x256xbf16>
      %662 = vector.extract_strided_slice %3 {offsets = [0, 512], sizes = [256, 512], strides = [1, 1]} : vector<256x1024xbf16> to vector<256x512xbf16>
      %cst_218 = arith.constant dense<0.000000e+00> : vector<2x512xf32>
      %663 = tpu.matmul %661, %662, %cst_218 {dimension_numbers = #tpu.dot_dimension_numbers<[1], [0], [0], [1], [0, 0, 1, 1], [], []>} : vector<2x256xbf16>, vector<256x512xbf16>, vector<2x512xf32> -> vector<2x512xf32>
      %664 = arith.addf %663, %6 : vector<2x512xf32>
      %665 = vector.extract_strided_slice %664 {offsets = [0, 0], sizes = [2, 128], strides = [1, 1]} : vector<2x512xf32> to vector<2x128xf32>
      %cst_219 = arith.constant 5.000000e-01 : f32
      %666 = vector.broadcast %cst_219 : f32 to vector<2x128xf32>
      %667 = arith.mulf %666, %665 : vector<2x128xf32>
      %668 = math.tanh %667 : vector<2x128xf32>
      %cst_220 = arith.constant 5.000000e-01 : f32
      %669 = vector.broadcast %cst_220 : f32 to vector<2x128xf32>
      %670 = arith.mulf %669, %668 : vector<2x128xf32>
      %cst_221 = arith.constant 5.000000e-01 : f32
      %671 = vector.broadcast %cst_221 : f32 to vector<2x128xf32>
      %672 = arith.addf %670, %671 : vector<2x128xf32>
      %673 = vector.extract_strided_slice %664 {offsets = [0, 128], sizes = [2, 128], strides = [1, 1]} : vector<2x512xf32> to vector<2x128xf32>
      %cst_222 = arith.constant 5.000000e-01 : f32
      %674 = vector.broadcast %cst_222 : f32 to vector<2x128xf32>
      %675 = arith.mulf %674, %673 : vector<2x128xf32>
      %676 = math.tanh %675 : vector<2x128xf32>
      %cst_223 = arith.constant 5.000000e-01 : f32
      %677 = vector.broadcast %cst_223 : f32 to vector<2x128xf32>
      %678 = arith.mulf %677, %676 : vector<2x128xf32>
      %cst_224 = arith.constant 5.000000e-01 : f32
      %679 = vector.broadcast %cst_224 : f32 to vector<2x128xf32>
      %680 = arith.addf %678, %679 : vector<2x128xf32>
      %681 = vector.extract_strided_slice %664 {offsets = [0, 256], sizes = [2, 128], strides = [1, 1]} : vector<2x512xf32> to vector<2x128xf32>
      %682 = math.tanh %681 : vector<2x128xf32>
      %683 = vector.extract_strided_slice %664 {offsets = [0, 384], sizes = [2, 128], strides = [1, 1]} : vector<2x512xf32> to vector<2x128xf32>
      %cst_225 = arith.constant 5.000000e-01 : f32
      %684 = vector.broadcast %cst_225 : f32 to vector<2x128xf32>
      %685 = arith.mulf %684, %683 : vector<2x128xf32>
      %686 = math.tanh %685 : vector<2x128xf32>
      %cst_226 = arith.constant 5.000000e-01 : f32
      %687 = vector.broadcast %cst_226 : f32 to vector<2x128xf32>
      %688 = arith.mulf %687, %686 : vector<2x128xf32>
      %cst_227 = arith.constant 5.000000e-01 : f32
      %689 = vector.broadcast %cst_227 : f32 to vector<2x128xf32>
      %690 = arith.addf %688, %689 : vector<2x128xf32>
      %691 = arith.mulf %680, %612 : vector<2x128xf32>
      %692 = arith.mulf %672, %682 : vector<2x128xf32>
      %693 = arith.addf %691, %692 : vector<2x128xf32>
      %694 = math.tanh %693 : vector<2x128xf32>
      %695 = arith.mulf %690, %694 : vector<2x128xf32>
      %696 = arith.addf %615, %695 : vector<2x128xf32>
      %cst_228 = arith.constant 6.250000e-02 : f32
      %697 = vector.broadcast %cst_228 : f32 to vector<2x128xf32>
      %698 = arith.mulf %696, %697 : vector<2x128xf32>
      %c0_229 = arith.constant 0 : index
      %c0_230 = arith.constant 0 : index
      %699 = vector.load %arg4[%c0_229, %c0_230] : memref<2x128xf32, #tpu.memory_space<vmem>>, vector<2x128xf32>
      tpu.vector_store %arg4[%c0_229, %c0_230], %698 {strides = array<i32>} : memref<2x128xf32, #tpu.memory_space<vmem>>, vector<2x128xf32>,
      %c0_231 = arith.constant 0 : index
      %c0_232 = arith.constant 0 : index
      %c0_233 = arith.constant 0 : index
      %700 = vector.load %arg5[%c0_231, %c0_232, %c0_233] : memref<2x2x128xf32, #tpu.memory_space<vmem>>, vector<1x2x128xf32>
      %701 = vector.shape_cast %700 : vector<1x2x128xf32> to vector<2x128xf32>
      %702 = vector.shape_cast %651 : vector<2x128xf32> to vector<1x2x128xf32>
      tpu.vector_store %arg5[%c0_231, %c0_232, %c0_233], %702 {strides = array<i32>} : memref<2x2x128xf32, #tpu.memory_space<vmem>>, vector<1x2x128xf32>,
      %c1 = arith.constant 1 : index
      %c0_234 = arith.constant 0 : index
      %c0_235 = arith.constant 0 : index
      %703 = vector.load %arg5[%c1, %c0_234, %c0_235] : memref<2x2x128xf32, #tpu.memory_space<vmem>>, vector<1x2x128xf32>
      %704 = vector.shape_cast %703 : vector<1x2x128xf32> to vector<2x128xf32>
      %705 = vector.shape_cast %695 : vector<2x128xf32> to vector<1x2x128xf32>
      tpu.vector_store %arg5[%c1, %c0_234, %c0_235], %705 {strides = array<i32>} : memref<2x2x128xf32, #tpu.memory_space<vmem>>, vector<1x2x128xf32>,
      %c0_236 = arith.constant 0 : index
      %c0_237 = arith.constant 0 : index
      %c0_238 = arith.constant 0 : index
      %706 = vector.load %arg6[%c0_236, %c0_237, %c0_238] : memref<2x2x128xf32, #tpu.memory_space<vmem>>, vector<1x2x128xf32>
      %707 = vector.shape_cast %706 : vector<1x2x128xf32> to vector<2x128xf32>
      %708 = vector.shape_cast %649 : vector<2x128xf32> to vector<1x2x128xf32>
      tpu.vector_store %arg6[%c0_236, %c0_237, %c0_238], %708 {strides = array<i32>} : memref<2x2x128xf32, #tpu.memory_space<vmem>>, vector<1x2x128xf32>,
      %c1_239 = arith.constant 1 : index
      %c0_240 = arith.constant 0 : index
      %c0_241 = arith.constant 0 : index
      %709 = vector.load %arg6[%c1_239, %c0_240, %c0_241] : memref<2x2x128xf32, #tpu.memory_space<vmem>>, vector<1x2x128xf32>
      %710 = vector.shape_cast %709 : vector<1x2x128xf32> to vector<2x128xf32>
      %711 = vector.shape_cast %693 : vector<2x128xf32> to vector<1x2x128xf32>
      tpu.vector_store %arg6[%c1_239, %c0_240, %c0_241], %711 {strides = array<i32>} : memref<2x2x128xf32, #tpu.memory_space<vmem>>, vector<1x2x128xf32>,
    } else {
    }
    return
  }
  func.func @transform_0(%arg0: i32) -> (i32, i32, i32) {
    %c0_i32 = arith.constant 0 : i32
    %c0_i32_0 = arith.constant 0 : i32
    %c0_i32_1 = arith.constant 0 : i32
    return %arg0, %c0_i32, %c0_i32_0 : i32, i32, i32
  }
  func.func @transform_1(%arg0: i32) -> (i32, i32) {
    %c0_i32 = arith.constant 0 : i32
    %c0_i32_0 = arith.constant 0 : i32
    %c0_i32_1 = arith.constant 0 : i32
    return %c0_i32, %c0_i32_0 : i32, i32
  }
  func.func @transform_2(%arg0: i32) -> (i32, i32) {
    %c0_i32 = arith.constant 0 : i32
    %c0_i32_0 = arith.constant 0 : i32
    %c0_i32_1 = arith.constant 0 : i32
    return %c0_i32, %c0_i32_0 : i32, i32
  }
  func.func @transform_3(%arg0: i32) -> (i32, i32) {
    %c0_i32 = arith.constant 0 : i32
    %c0_i32_0 = arith.constant 0 : i32
    %c0_i32_1 = arith.constant 0 : i32
    return %c0_i32, %c0_i32_0 : i32, i32
  }
  func.func @transform_4(%arg0: i32) -> (i32, i32, i32) {
    %c0_i32 = arith.constant 0 : i32
    %c0_i32_0 = arith.constant 0 : i32
    %c0_i32_1 = arith.constant 0 : i32
    %c0_i32_2 = arith.constant 0 : i32
    return %c0_i32, %c0_i32_0, %c0_i32_1 : i32, i32, i32
  }
  func.func @transform_5(%arg0: i32) -> (i32, i32, i32) {
    %c0_i32 = arith.constant 0 : i32
    %c0_i32_0 = arith.constant 0 : i32
    %c0_i32_1 = arith.constant 0 : i32
    %c0_i32_2 = arith.constant 0 : i32
    return %c0_i32, %c0_i32_0, %c0_i32_1 : i32, i32, i32
  }
}

</mosaic_0001>

<bundles_post_ra>
// kernel: tpu_custom_call.1
= control target key start
LH: loop header
LB: loop body
LE: loop exit
PB: predicated region body
PF: predicated region fallthrough
CT: control target
= control target key end

     0   :  { %11 = vsyncpa [#allocation8], 0  ;;  %s5648_s0 = inlined_call_operand.hbm [shape: f32[16,2,512], index: 0, kind: input, shape index: {}]   ;;  %s5649_s1 = inlined_call_operand.hbm [shape: bf16[256,1024], index: 1, kind: input, shape index: {}]   ;;  %s5650_s2 = inlined_call_operand.hbm [shape: f32[1,512], index: 2, kind: input, shape index: {}]   ;;  %s5651_s3 = inlined_call_operand.hbm [shape: f32[2,128], index: 3, kind: output, shape index: {0}]   ;;  %s5652_s4 = inlined_call_operand.hbm [shape: f32[2,2,128], index: 4, kind: output, shape index: {1}]   ;;  %s5653_s5 = inlined_call_operand.hbm [shape: f32[2,2,128], index: 5, kind: output, shape index: {2}]  }
   0x1   :  { %13 = vsyncpa [#allocation8 + $0x1], 0 }
   0x2   :  { %14 = vsyncpa [#allocation11], 0 }
   0x3   :  { %15 = vsyncpa [#allocation9], 0 }
   0x4   :  { %16 = vsyncpa [#allocation15], 0  ;;  %s3883_s18 = smov 0   ;;  %s3885_s19 = smov 0  }
   0x5   :  { %s3887_s20 = smov 0   ;;  %s3889_s21 = smov 0  }
   0x6 LB: > { %s3902_s22 = sadd.s32 4294967295, %s3837_s21   ;;  %p42_p0 = scmp.ne.s32.totalorder %s3829_s19, %s3825_s18  ;;  %s3837_s21 = sphi %s3889_s21, %s6759_s21   ;;  %s3833_s20 = sphi %s3887_s20, %s6758_s20   ;;  %s3829_s19 = sphi %s3885_s19, %s6757_s19   ;;  %s3825_s18 = sphi %s3883_s18, %s6756_s18  }
   0x7   : > { %p5654_p1 = scmp.eq.s32.totalorder %s3902_s22, 0  ;;  %p3221_p2 = scmp.ge.s32.totalorder %s3837_s21, 1 }
   0x8   : > { %p158_p3 = scmp.lt.s32.totalorder %s3837_s21, 3  ;;  %s3839_s25 = smov [#allocation10]  }
   0x9   : > { %p3911_p5 = por %p5654_p1, %p42_p0  ;;  %s170_s26 = sshll.u32 %s3839_s25, 4  ;;  %s171_s26 = int_to_ptr.vmem [resolvable:$true] %s170_s26 }
   0xa   : > { %p3915_p6 = pnand %p3221_p2, %p158_p3  ;;  %s3840_s28 = smov [#allocation12]  }
   0xb   : > { %s5937_s23 = scalar_select %p3911_p5, 1, 0 }
   0xc   : > { %s5938_s24 = scalar_select %p3915_p6, 1, 0 }
   0xd   : > { %p3402_p7 = pneg %p3915_p6  ;;  %s184_s29 = sshll.u32 %s3840_s28, 4  ;;  %s185_s29 = int_to_ptr.vmem [resolvable:$true] %s184_s29 }
   0xe   : > { %s3650_s30 = scalar_lea.vmem %s171_s26, 16384  ;;  %p3658_p13 = scmp.lt.s32.totalorder %s171_s26, %s171_s26 }
   0xf   : > { %p3923_p8 = pnand %p3402_p7, %p5654_p1  ;;  %p3651_p10 = scmp.ne.s32.totalorder %s171_s26, %s3650_s30 }
  0x10   : > { %p3659_p0 = scmp.lt.s32.totalorder %s3650_s30, %s3650_s30 }
  0x11   : > { %p3641_p9 = pneg %p3923_p8 }
  0x12   : > { %p3660_p2 = por %p3659_p0, %p3658_p13 }
  0x13   : > { %p3653_p11 = pnand %p3651_p10, %p3641_p9 }
  0x15   : > { %p3654_p12 = pneg %p3653_p11 }
  0x17   : > { %p3661_p3 = pnand %p3660_p2, %p3654_p12 }
  0x19   : > { %3664 = shalt.err (!%p3661_p3)
}
  0x1a   : > { %s3841_s6 = smov 512   ;;  %s3842_s7 = smov 32  }
  0x1b   : > { %3405 = dma.hbm_to_vmem [thread:$0]  (!%p3923_p8), %s5649_s1, 16384, %s171_s26, [#allocation11], %s3841_s6, %s3841_s6, %s3842_s7  }
  0x1c   : > { %s3676_s10 = scalar_lea.vmem %s185_s29, 64  ;;  %p3684_p4 = scmp.lt.s32.totalorder %s185_s29, %s185_s29 }
  0x1d   : > { %p3677_p7 = scmp.ne.s32.totalorder %s185_s29, %s3676_s10  ;;  %p3685_p1 = scmp.lt.s32.totalorder %s3676_s10, %s3676_s10 }
  0x1f   : > { %p3679_p10 = pnand %p3677_p7, %p3641_p9  ;;  %p3686_p13 = por %p3685_p1, %p3684_p4 }
  0x21   : > { %p3680_p11 = pneg %p3679_p10 }
  0x23   : > { %p3687_p12 = pnand %p3686_p13, %p3680_p11 }
  0x25   : > { %3690 = shalt.err (!%p3687_p12)
}
  0x26   : > { %3408 = dma.hbm_to_vmem [thread:$0]  (!%p3923_p8), %s5650_s2, 64, %s185_s29, [#allocation11]  }
  0x27   : > { %s3946_s13 = sadd.s32 1, %s3837_s21   ;;  %s29_s14 = sadd.s32 1, %s3833_s20 }
  0x28   : > { %s26_s15 = ssub.s32 %s3837_s21, %s3946_s13  ;;  %p36_p1 = scmp.ne.s32.totalorder %s3833_s20, %s3829_s19 }
  0x29   : > { %p27_p4 = scmp.eq.s32.totalorder %s26_s15, 0  ;;  %p37_p9 = scmp.eq.s32.totalorder %s3837_s21, 0 }
  0x2a   : > { %p3415_p0 = scmp.lt.s32.totalorder %s3837_s21, 2  ;;  %s195_s16 = sand.u32 1, %s3833_s20  }
  0x2b   : > { %s3957_s17 = scalar_select %p27_p4, %s3833_s20, %s29_s14  }
  0x2c   : > { %p38_p2 = por %p37_p9, %p36_p1  ;;  %s3225_s18 = sshll.u32 %s195_s16, 6 }
  0x2d   : > { %s3379_s25 = sshll.u32 %s3837_s21, 10  ;;  %s199_s29 = scalar_lea.vmem [#allocation7], %s3225_s18 }
  0x2e   : > { %s3963_s28 = scalar_lea.hbm %s5648_s0, %s3379_s25  ;;  %s207_s30 = sshll.u32 %s199_s29, 4  ;;  %s3969_s30 = int_to_ptr.vmem [resolvable:$true] %s207_s30 }
  0x2f   : > { %p3965_p8 = pnand %p3415_p0, %p38_p2  ;;  %s3971_s7 = scalar_lea.sflag [#allocation8], %s195_s16 }
  0x30   : > { %s3691_s21 = scalar_lea.hbm %s3963_s28, 1024  ;;  %s3696_s10 = scalar_lea.hbm %s5648_s0, 2048 }
  0x31   : > { %p3692_p3 = scmp.ne.s32.totalorder %s3963_s28, %s3691_s21  ;;  %p3693_p7 = pneg %p3965_p8 }
  0x32   : > { %p3697_p13 = scmp.lt.s32.totalorder %s3963_s28, %s5648_s0  ;;  %p3698_p12 = scmp.lt.s32.totalorder %s3696_s10, %s3691_s21 }
  0x33   : > { %p3694_p10 = pnand %p3693_p7, %p3692_p3 }
  0x34   : > { %p3699_p1 = por %p3698_p12, %p3697_p13 }
  0x35   : > { %p3695_p11 = pneg %p3694_p10 }
  0x37   : > { %p3700_p4 = pnand %p3699_p1, %p3695_p11 }
  0x39   : > { %3703 = shalt.err (!%p3700_p4)
}
  0x3a   : > { %s3704_s14 = scalar_lea.vmem %s3969_s30, 1024  ;;  %s3843_s15 = smov [#allocation7]  }
  0x3b   : > { %p3705_p9 = scmp.ne.s32.totalorder %s3969_s30, %s3704_s14  ;;  %s3709_s16 = sshll.u32 %s3843_s15, 4  ;;  %s3710_s16 = int_to_ptr.vmem [resolvable:$false] %s3709_s16 }
  0x3c   : > { %s3711_s18 = scalar_lea.vmem %s3710_s16, 2048  ;;  %p3712_p3 = scmp.lt.s32.totalorder %s3969_s30, %s3710_s16 }
  0x3d   : > { %p3707_p0 = pnand %p3705_p9, %p3693_p7  ;;  %p3713_p10 = scmp.lt.s32.totalorder %s3711_s18, %s3704_s14 }
  0x3f   : > { %p3708_p2 = pneg %p3707_p0  ;;  %p3714_p5 = por %p3713_p10, %p3712_p3 }
  0x41   : > { %p3715_p6 = pnand %p3714_p5, %p3708_p2 }
  0x43   : > { %3718 = shalt.err (!%p3715_p6)
}
  0x44   : > { %s3844_s25 = smov 128   ;;  %s3845_s26 = smov 8  }
  0x45   : > { %3412 = dma.hbm_to_vmem [thread:$0]  (!%p3965_p8), %s3963_s28, 1024, %s3969_s30, %s3971_s7, %s3844_s25, %s3844_s25, %s3845_s26  }
  0x46   : > { %p5941_p7 = scmp.ne.s32.totalorder %s5938_s24, 0 }
  0x48   : > { %219 = sbr.rel (%p5941_p7) target bundleno = 2945 (0xb81), region = 32 }
  0x4d   : > { %s221_s27 = sand.u32 1, %s3829_s19   ;;  %p5942_p5 = scmp.ne.s32.totalorder %s5937_s23, 0 }
  0x4e   : > { %s3230_s29 = sshll.u32 %s221_s27, 6  ;;  %s222_s21 = scalar_lea.sflag [#allocation8], %s221_s27 }
  0x4f   : > { %s3995_s8 = scalar_lea.vmem [#allocation7], %s3230_s29 }
  0x50   : > { %3808 = dma.done.wait (%p5942_p5), %s222_s21, 1024  }
  0x51   : > { %3810 = vsyncadd (%p5942_p5), %s222_s21, 4294966272  ;;  %p5943_p6 = scmp.eq.s32.totalorder %s3902_s22, 0 }
  0x53   : > { %3812 = dma.done.wait (%p5943_p6), [#allocation11], 16448   ;;  %p5944_p8 = pmov %p5943_p6 }
  0x54   : > { %p5945_p11 = scmp.ne.s32.totalorder %s3902_s22, 0 }
  0x55   : > { %3814 = vsyncadd (%p5944_p8), [#allocation11], 4294950848 }
  0x56   : > { %259 = sbr.rel (%p5945_p11) target bundleno = 95 (0x5f), region = 48 }
  0x5b   : > { %v3846_v0 = vmov 0.0  }
  0x5c   : > { %260 = vst [vmem:[#allocation2] sm:$0x3] %v3846_v0  ;;  %261 = vst [vmem:[#allocation3] sm:$0x3] %v3846_v0 }
  0x5d   : > { %262 = vst [vmem:[#allocation4] sm:$0x3] %v3846_v0  ;;  %263 = vst [vmem:[#allocation5] sm:$0x3] %v3846_v0 }
  0x5e   : > { %264 = vst [vmem:[#allocation6] sm:$0x3] %v3846_v0 }
  0x5f PF: > { %v321_v1 = vld [vmem:[#allocation10 + $0x1c0] sm:$0xff]  ;;  %v322_v3 = vld [vmem:[#allocation10 + $0x1c8] sm:$0xff]  ;;  %p6101_p13 = scmp.eq.s32.totalorder %s3902_s22, 0  ;;  %p3369_p12 = scmp.ne.s32.totalorder %s3902_s22, 1 }
  0x60   : > { %v325_v2 = vld [vmem:[#allocation10 + $0x1e0] sm:$0xff]  ;;  %v326_v5 = vld [vmem:[#allocation10 + $0x1e8] sm:$0xff] }
  0x61   : > { %v4007_v4 = vcombine.high %v321_v1, %v325_v2  ;;  %v4009_v6 = vcombine.low %v321_v1, %v325_v2  ;;  %v313_v7 = vld [vmem:[#allocation10 + $0x180] sm:$0xff]  ;;  %v4011_v9 = vcombine.high %v322_v3, %v326_v5  ;;  %v4013_v10 = vcombine.low %v322_v3, %v326_v5  ;;  %v314_v12 = vld [vmem:[#allocation10 + $0x188] sm:$0xff]  ;;  %s1248_s23 = scalar_select %p6101_p13, 1, 0 }
  0x62   : > { %v317_v8 = vld [vmem:[#allocation10 + $0x1a0] sm:$0xff]  ;;  %v318_v13 = vld [vmem:[#allocation10 + $0x1a8] sm:$0xff] }
  0x63   : > { %5946 = vst [vmem:[#allocation21_spill] sm:$0xff] %v4007_v4  ;;  %5947 = vst [vmem:[#allocation22_spill] sm:$0xff] %v4009_v6  ;;  %v4015_v11 = vcombine.high %v313_v7, %v317_v8  ;;  %v305_v14 = vld [vmem:[#allocation10 + $0x140] sm:$0xff]  ;;  %1062 = vmatprep.subr.bf16.mxu0 %v4007_v4  ;;  %v4018_v15 = vcombine.high %v314_v12, %v318_v13  ;;  %v306_v17 = vld [vmem:[#allocation10 + $0x148] sm:$0xff]  ;;  %1103 = vmatprep.subr.bf16.mxu1 %v4011_v9 }
  0x64   : > { %5948 = vst [vmem:[#allocation23_spill] sm:$0xff] %v4011_v9  ;;  %5949 = vst [vmem:[#allocation24_spill] sm:$0xff] %v4013_v10  ;;  %v309_v16 = vld [vmem:[#allocation10 + $0x160] sm:$0xff]  ;;  %v310_v18 = vld [vmem:[#allocation10 + $0x168] sm:$0xff]  ;;  %1063 = vmatpush1.bf16.msra.mxu0 %v4009_v6  ;;  %v4022_v19 = vcombine.low %v313_v7, %v317_v8  ;;  %1104 = vmatpush1.bf16.msra.mxu1 %v4013_v10  ;;  %v4026_v20 = vcombine.low %v314_v12, %v318_v13 }
  0x65   : > { %5950 = vst [vmem:[#allocation25_spill] sm:$0xff] %v4015_v11  ;;  %5951 = vst [vmem:[#allocation26_spill] sm:$0xff] %v4018_v15  ;;  %1064 = vmatprep.subr.bf16.mxu0 %v4015_v11  ;;  %v4028_v21 = vcombine.high %v305_v14, %v309_v16  ;;  %1105 = vmatprep.subr.bf16.mxu1 %v4018_v15  ;;  %v4031_v22 = vcombine.high %v306_v17, %v310_v18  ;;  %v297_v23 = vld [vmem:[#allocation10 + $0x100] sm:$0xff]  ;;  %v298_v25 = vld [vmem:[#allocation10 + $0x108] sm:$0xff] }
  0x66   : > { %5952 = vst [vmem:[#allocation27_spill] sm:$0xff] %v4022_v19  ;;  %5953 = vst [vmem:[#allocation28_spill] sm:$0xff] %v4026_v20  ;;  %v301_v24 = vld [vmem:[#allocation10 + $0x120] sm:$0xff]  ;;  %v302_v26 = vld [vmem:[#allocation10 + $0x128] sm:$0xff]  ;;  %v4034_v27 = vcombine.low %v305_v14, %v309_v16  ;;  %v4038_v28 = vcombine.low %v306_v17, %v310_v18 }
  0x67   : > { %5954 = vst [vmem:[#allocation29_spill] sm:$0xff] %v4028_v21  ;;  %5955 = vst [vmem:[#allocation30_spill] sm:$0xff] %v4031_v22  ;;  %v4040_v29 = vcombine.high %v297_v23, %v301_v24  ;;  %v4043_v30 = vcombine.high %v298_v25, %v302_v26  ;;  %v289_v31 = vld [vmem:[#allocation10 + $0xc0] sm:$0xff]  ;;  %v290_v33 = vld [vmem:[#allocation10 + $0xc8] sm:$0xff]  ;;  %v4046_v35 = vcombine.low %v297_v23, %v301_v24 }
  0x68   : > { %1065 = vmatpush1.bf16.msra.mxu0 %v4022_v19  ;;  %5956 = vst [vmem:[#allocation31_spill] sm:$0xff] %v4034_v27  ;;  %1106 = vmatpush1.bf16.msra.mxu1 %v4026_v20  ;;  %5957 = vst [vmem:[#allocation32_spill] sm:$0xff] %v4038_v28  ;;  %v293_v32 = vld [vmem:[#allocation10 + $0xe0] sm:$0xff]  ;;  %v294_v34 = vld [vmem:[#allocation10 + $0xe8] sm:$0xff]  ;;  %v4050_v36 = vcombine.low %v298_v25, %v302_v26 }
  0x69   : > { %1066 = vmatprep.subr.bf16.mxu0 %v4028_v21  ;;  %5958 = vst [vmem:[#allocation33_spill] sm:$0xff] %v4040_v29  ;;  %1107 = vmatprep.subr.bf16.mxu1 %v4031_v22  ;;  %5959 = vst [vmem:[#allocation34_spill] sm:$0xff] %v4043_v30  ;;  %v4052_v37 = vcombine.high %v289_v31, %v293_v32  ;;  %v4055_v38 = vcombine.high %v290_v33, %v294_v34  ;;  %v281_v39 = vld [vmem:[#allocation10 + $0x80] sm:$0xff]  ;;  %v282_v41 = vld [vmem:[#allocation10 + $0x88] sm:$0xff] }
  0x6a   : > { %5960 = vst [vmem:[#allocation35_spill] sm:$0xff] %v4046_v35  ;;  %5961 = vst [vmem:[#allocation36_spill] sm:$0xff] %v4050_v36  ;;  %v285_v40 = vld [vmem:[#allocation10 + $0xa0] sm:$0xff]  ;;  %v286_v42 = vld [vmem:[#allocation10 + $0xa8] sm:$0xff]  ;;  %v4058_v43 = vcombine.low %v289_v31, %v293_v32  ;;  %v4062_v44 = vcombine.low %v290_v33, %v294_v34 }
  0x6b   : > { %5962 = vst [vmem:[#allocation37_spill] sm:$0xff] %v4052_v37  ;;  %5963 = vst [vmem:[#allocation38_spill] sm:$0xff] %v4055_v38  ;;  %v4064_v45 = vcombine.high %v281_v39, %v285_v40  ;;  %v4067_v46 = vcombine.high %v282_v41, %v286_v42  ;;  %v273_v47 = vld [vmem:[#allocation10 + $0x40] sm:$0xff]  ;;  %v274_v49 = vld [vmem:[#allocation10 + $0x48] sm:$0xff]  ;;  %v4070_v51 = vcombine.low %v281_v39, %v285_v40 }
  0x6c   : > { %1067 = vmatpush1.bf16.msra.mxu0 %v4034_v27  ;;  %1108 = vmatpush1.bf16.msra.mxu1 %v4038_v28  ;;  %5964 = vst [vmem:[#allocation39_spill] sm:$0xff] %v4058_v43  ;;  %5965 = vst [vmem:[#allocation40_spill] sm:$0xff] %v4062_v44  ;;  %v277_v48 = vld [vmem:[#allocation10 + $0x60] sm:$0xff]  ;;  %v278_v50 = vld [vmem:[#allocation10 + $0x68] sm:$0xff]  ;;  %v4074_v52 = vcombine.low %v282_v41, %v286_v42 }
  0x6d   : > { %1068 = vmatprep.subr.bf16.mxu0 %v4040_v29  ;;  %1109 = vmatprep.subr.bf16.mxu1 %v4043_v30  ;;  %5966 = vst [vmem:[#allocation41_spill] sm:$0xff] %v4064_v45  ;;  %5967 = vst [vmem:[#allocation42_spill] sm:$0xff] %v4067_v46  ;;  %v4076_v53 = vcombine.high %v273_v47, %v277_v48  ;;  %v4078_v54 = vld [vmem:[#allocation4] sm:$0x3]  ;;  %v4081_v55 = vcombine.high %v274_v49, %v278_v50  ;;  %v265_v56 = vld [vmem:[#allocation10] sm:$0xff] }
  0x6e   : > { %5968 = vst [vmem:[#allocation43_spill] sm:$0xff] %v4070_v51  ;;  %5969 = vst [vmem:[#allocation44_spill] sm:$0xff] %v4074_v52  ;;  %v269_v57 = vld [vmem:[#allocation10 + $0x20] sm:$0xff]  ;;  %v4085_v58 = vpack.c.bf16 %v4078_v54, %v4078_v54  ;;  %v266_v59 = vld [vmem:[#allocation10 + $0x8] sm:$0xff]  ;;  %v4088_v61 = vcombine.low %v273_v47, %v277_v48  ;;  %v4093_v62 = vcombine.low %v274_v49, %v278_v50 }
  0x6f   : > { %5970 = vst [vmem:[#allocation45_spill] sm:$0xff] %v4076_v53  ;;  %5971 = vst [vmem:[#allocation46_spill] sm:$0xff] %v4078_v54  ;;  %v270_v60 = vld [vmem:[#allocation10 + $0x28] sm:$0xff]  ;;  %v4095_v63 = vcombine.high %v265_v56, %v269_v57  ;;  %v385_v1 = vld [vmem:[#allocation10 + $0x3c0] sm:$0xff]  ;;  %v4102_v7 = vcombine.low %v265_v56, %v269_v57 }
  0x70   : > { %1069 = vmatpush1.bf16.msra.mxu0 %v4046_v35  ;;  %1110 = vmatpush1.bf16.msra.mxu1 %v4050_v36  ;;  %5972 = vst [vmem:[#allocation47_spill] sm:$0xff] %v4081_v55  ;;  %5973 = vst [vmem:[#allocation48_spill] sm:$0xff] %v4088_v61  ;;  %v4098_v0 = vcombine.high %v266_v59, %v270_v60  ;;  %v389_v2 = vld [vmem:[#allocation10 + $0x3e0] sm:$0xff]  ;;  %v386_v3 = vld [vmem:[#allocation10 + $0x3c8] sm:$0xff]  ;;  %v4106_v8 = vcombine.low %v266_v59, %v270_v60 }
  0x71   : > { %1070 = vmatprep.subr.bf16.mxu0 %v4052_v37  ;;  %1111 = vmatprep.subr.bf16.mxu1 %v4055_v38  ;;  %5974 = vst [vmem:[#allocation49_spill] sm:$0xff] %v4093_v62  ;;  %5975 = vst [vmem:[#allocation50_spill] sm:$0xff] %v4095_v63  ;;  %v390_v5 = vld [vmem:[#allocation10 + $0x3e8] sm:$0xff]  ;;  %v4108_v12 = vcombine.high %v385_v1, %v389_v2  ;;  %v377_v14 = vld [vmem:[#allocation10 + $0x380] sm:$0xff]  ;;  %v4114_v23 = vcombine.low %v385_v1, %v389_v2 }
  0x72   : > { %1094 = vmatprep.mubr.bf16.mxu0 %v4085_v58  ;;  %5976 = vst [vmem:[#allocation51_spill] sm:$0xff] %v4098_v0  ;;  %1135 = vmatprep.mubr.bf16.mxu1 %v4085_v58  ;;  %5977 = vst [vmem:[#allocation52_spill] sm:$0xff] %v4102_v7  ;;  %v4111_v13 = vcombine.high %v386_v3, %v390_v5  ;;  %v381_v16 = vld [vmem:[#allocation10 + $0x3a0] sm:$0xff]  ;;  %v378_v17 = vld [vmem:[#allocation10 + $0x388] sm:$0xff]  ;;  %v4118_v24 = vcombine.low %v386_v3, %v390_v5 }
  0x73   : > { %5978 = vst [vmem:[#allocation53_spill] sm:$0xff] %v4106_v8  ;;  %5979 = vst [vmem:[#allocation54_spill] sm:$0xff] %v4108_v12  ;;  %v382_v18 = vld [vmem:[#allocation10 + $0x3a8] sm:$0xff]  ;;  %v4120_v25 = vcombine.high %v377_v14, %v381_v16  ;;  %v369_v31 = vld [vmem:[#allocation10 + $0x340] sm:$0xff]  ;;  %v4126_v39 = vcombine.low %v377_v14, %v381_v16 }
  0x74   : > { %1071 = vmatpush1.bf16.msra.mxu0 %v4058_v43  ;;  %1112 = vmatpush1.bf16.msra.mxu1 %v4062_v44  ;;  %5980 = vst [vmem:[#allocation55_spill] sm:$0xff] %v4111_v13  ;;  %5981 = vst [vmem:[#allocation56_spill] sm:$0xff] %v4114_v23  ;;  %v4123_v26 = vcombine.high %v378_v17, %v382_v18  ;;  %v373_v32 = vld [vmem:[#allocation10 + $0x360] sm:$0xff]  ;;  %v370_v33 = vld [vmem:[#allocation10 + $0x348] sm:$0xff]  ;;  %v4130_v40 = vcombine.low %v378_v17, %v382_v18 }
  0x75   : > { %1072 = vmatprep.subr.bf16.mxu0 %v4064_v45  ;;  %1113 = vmatprep.subr.bf16.mxu1 %v4067_v46  ;;  %5982 = vst [vmem:[#allocation57_spill] sm:$0xff] %v4118_v24  ;;  %5983 = vst [vmem:[#allocation58_spill] sm:$0xff] %v4120_v25  ;;  %v374_v34 = vld [vmem:[#allocation10 + $0x368] sm:$0xff]  ;;  %v4132_v41 = vcombine.high %v369_v31, %v373_v32  ;;  %v361_v47 = vld [vmem:[#allocation10 + $0x300] sm:$0xff]  ;;  %v4138_v56 = vcombine.low %v369_v31, %v373_v32 }
  0x76   : > { %5984 = vst [vmem:[#allocation59_spill] sm:$0xff] %v4123_v26  ;;  %5985 = vst [vmem:[#allocation60_spill] sm:$0xff] %v4126_v39  ;;  %v4135_v42 = vcombine.high %v370_v33, %v374_v34  ;;  %v365_v48 = vld [vmem:[#allocation10 + $0x320] sm:$0xff]  ;;  %v362_v49 = vld [vmem:[#allocation10 + $0x308] sm:$0xff]  ;;  %v4142_v57 = vcombine.low %v370_v33, %v374_v34 }
  0x77   : > { %5986 = vst [vmem:[#allocation61_spill] sm:$0xff] %v4130_v40  ;;  %5987 = vst [vmem:[#allocation62_spill] sm:$0xff] %v4132_v41  ;;  %v366_v50 = vld [vmem:[#allocation10 + $0x328] sm:$0xff]  ;;  %v4144_v59 = vcombine.high %v361_v47, %v365_v48  ;;  %v353_v1 = vld [vmem:[#allocation10 + $0x2c0] sm:$0xff]  ;;  %v4150_v14 = vcombine.low %v361_v47, %v365_v48 }
  0x78   : > { %1073 = vmatpush1.bf16.msra.mxu0 %v4070_v51  ;;  %1114 = vmatpush1.bf16.msra.mxu1 %v4074_v52  ;;  %5988 = vst [vmem:[#allocation63_spill] sm:$0xff] %v4135_v42  ;;  %5989 = vst [vmem:[#allocation64_spill] sm:$0xff] %v4138_v56  ;;  %v4147_v60 = vcombine.high %v362_v49, %v366_v50  ;;  %v357_v2 = vld [vmem:[#allocation10 + $0x2e0] sm:$0xff]  ;;  %v354_v3 = vld [vmem:[#allocation10 + $0x2c8] sm:$0xff]  ;;  %v4154_v16 = vcombine.low %v362_v49, %v366_v50 }
  0x79   : > { %1074 = vmatprep.subr.bf16.mxu0 %v4076_v53  ;;  %1115 = vmatprep.subr.bf16.mxu1 %v4081_v55  ;;  %5990 = vst [vmem:[#allocation65_spill] sm:$0xff] %v4142_v57  ;;  %5991 = vst [vmem:[#allocation66_spill] sm:$0xff] %v4144_v59  ;;  %v358_v5 = vld [vmem:[#allocation10 + $0x2e8] sm:$0xff]  ;;  %v4156_v17 = vcombine.high %v353_v1, %v357_v2  ;;  %v345_v31 = vld [vmem:[#allocation10 + $0x280] sm:$0xff]  ;;  %v4162_v47 = vcombine.low %v353_v1, %v357_v2 }
  0x7a   : > { %5992 = vst [vmem:[#allocation67_spill] sm:$0xff] %v4147_v60  ;;  %5993 = vst [vmem:[#allocation68_spill] sm:$0xff] %v4150_v14  ;;  %v4159_v18 = vcombine.high %v354_v3, %v358_v5  ;;  %v349_v32 = vld [vmem:[#allocation10 + $0x2a0] sm:$0xff]  ;;  %v346_v33 = vld [vmem:[#allocation10 + $0x288] sm:$0xff]  ;;  %v4166_v48 = vcombine.low %v354_v3, %v358_v5 }
  0x7b   : > { %5994 = vst [vmem:[#allocation69_spill] sm:$0xff] %v4154_v16  ;;  %5995 = vst [vmem:[#allocation70_spill] sm:$0xff] %v4156_v17  ;;  %v350_v34 = vld [vmem:[#allocation10 + $0x2a8] sm:$0xff]  ;;  %v4168_v49 = vcombine.high %v345_v31, %v349_v32  ;;  %v337_v54 = vld [vmem:[#allocation10 + $0x240] sm:$0xff]  ;;  %v4174_v1 = vcombine.low %v345_v31, %v349_v32 }
  0x7c   : > { %1075 = vmatpush1.bf16.msra.mxu0 %v4088_v61  ;;  %1116 = vmatpush1.bf16.msra.mxu1 %v4093_v62  ;;  %5996 = vst [vmem:[#allocation71_spill] sm:$0xff] %v4159_v18  ;;  %5997 = vst [vmem:[#allocation72_spill] sm:$0xff] %v4162_v47  ;;  %v4171_v50 = vcombine.high %v346_v33, %v350_v34  ;;  %v4178_v2 = vcombine.low %v346_v33, %v350_v34 }
  0x7d   : > { %1076 = vmatprep.subr.bf16.mxu0 %v4095_v63  ;;  %1117 = vmatprep.subr.bf16.mxu1 %v4098_v0  ;;  %5998 = vst [vmem:[#allocation73_spill] sm:$0xff] %v4166_v48  ;;  %5999 = vst [vmem:[#allocation74_spill] sm:$0xff] %v4168_v49 }
  0x7e   : > { %6000 = vst [vmem:[#allocation75_spill] sm:$0xff] %v4171_v50  ;;  %6001 = vst [vmem:[#allocation76_spill] sm:$0xff] %v4174_v1 }
  0x7f   : > { %6002 = vst [vmem:[#allocation77_spill] sm:$0xff] %v4178_v2 }
  0x80   : > { %1077 = vmatpush1.bf16.msra.mxu0 %v4102_v7  ;;  %1118 = vmatpush1.bf16.msra.mxu1 %v4106_v8 }
  0x81   : > { %1078 = vmatprep.subr.bf16.mxu0 %v4108_v12  ;;  %1119 = vmatprep.subr.bf16.mxu1 %v4111_v13 }
  0x84   : > { %1079 = vmatpush2.bf16.msra.mxu0 %v4114_v23  ;;  %1120 = vmatpush2.bf16.msra.mxu1 %v4118_v24 }
  0x85   : > { %1080 = vmatprep.subr.bf16.mxu0 %v4120_v25  ;;  %1121 = vmatprep.subr.bf16.mxu1 %v4123_v26 }
  0x88   : > { %1081 = vmatpush2.bf16.msra.mxu0 %v4126_v39  ;;  %1122 = vmatpush2.bf16.msra.mxu1 %v4130_v40 }
  0x89   : > { %1082 = vmatprep.subr.bf16.mxu0 %v4132_v41  ;;  %1123 = vmatprep.subr.bf16.mxu1 %v4135_v42 }
  0x8c   : > { %1083 = vmatpush2.bf16.msra.mxu0 %v4138_v56  ;;  %1124 = vmatpush2.bf16.msra.mxu1 %v4142_v57  ;;  %v342_v57 = vld [vmem:[#allocation10 + $0x268] sm:$0xff] }
  0x8d   : > { %1084 = vmatprep.subr.bf16.mxu0 %v4144_v59  ;;  %1125 = vmatprep.subr.bf16.mxu1 %v4147_v60  ;;  %v341_v60 = vld [vmem:[#allocation10 + $0x260] sm:$0xff]  ;;  %v338_v59 = vld [vmem:[#allocation10 + $0x248] sm:$0xff] }
  0x8e   : > { %v4180_v3 = vcombine.high %v337_v54, %v341_v60  ;;  %v4183_v5 = vcombine.high %v338_v59, %v342_v57  ;;  %v4186_v31 = vcombine.low %v337_v54, %v341_v60  ;;  %v4190_v32 = vcombine.low %v338_v59, %v342_v57  ;;  %v415_v60 = vld [vmem:[#allocation2] sm:$0x3] }
  0x90   : > { %1085 = vmatpush2.bf16.msra.mxu0 %v4150_v14  ;;  %1126 = vmatpush2.bf16.msra.mxu1 %v4154_v16  ;;  %6003 = vst [vmem:[#allocation78_spill] sm:$0xff] %v4180_v3  ;;  %6004 = vst [vmem:[#allocation79_spill] sm:$0xff] %v4183_v5  ;;  %v330_v16 = vld [vmem:[#allocation10 + $0x208] sm:$0xff] }
  0x91   : > { %1086 = vmatprep.subr.bf16.mxu0 %v4156_v17  ;;  %1127 = vmatprep.subr.bf16.mxu1 %v4159_v18  ;;  %v329_v18 = vld [vmem:[#allocation10 + $0x200] sm:$0xff]  ;;  %v334_v14 = vld [vmem:[#allocation10 + $0x228] sm:$0xff]  ;;  %6005 = vst [vmem:[#allocation80_spill] sm:$0xff] %v4186_v31  ;;  %6006 = vst [vmem:[#allocation81_spill] sm:$0xff] %v4190_v32 }
  0x92   : > { %v333_v17 = vld [vmem:[#allocation10 + $0x220] sm:$0xff]  ;;  %v4195_v34 = vcombine.high %v330_v16, %v334_v14  ;;  %v4202_v57 = vcombine.low %v330_v16, %v334_v14 }
  0x93   : > { %v4192_v33 = vcombine.high %v329_v18, %v333_v17  ;;  %v4198_v54 = vcombine.low %v329_v18, %v333_v17  ;;  %v320_v17 = vld [vmem:[#allocation10 + $0x1b8] sm:$0xff] }
  0x94   : > { %1087 = vmatpush2.bf16.msra.mxu0 %v4162_v47  ;;  %1128 = vmatpush2.bf16.msra.mxu1 %v4166_v48  ;;  %6008 = vst [vmem:[#allocation83_spill] sm:$0xff] %v4195_v34  ;;  %v324_v48 = vld [vmem:[#allocation10 + $0x1d8] sm:$0xff]  ;;  %6010 = vst [vmem:[#allocation85_spill] sm:$0xff] %v4202_v57 }
  0x95   : > { %1088 = vmatprep.subr.bf16.mxu0 %v4168_v49  ;;  %1129 = vmatprep.subr.bf16.mxu1 %v4171_v50  ;;  %6007 = vst [vmem:[#allocation82_spill] sm:$0xff] %v4192_v33  ;;  %v323_v50 = vld [vmem:[#allocation10 + $0x1d0] sm:$0xff]  ;;  %v328_v47 = vld [vmem:[#allocation10 + $0x1f8] sm:$0xff]  ;;  %6009 = vst [vmem:[#allocation84_spill] sm:$0xff] %v4198_v54 }
  0x96   : > { %v327_v49 = vld [vmem:[#allocation10 + $0x1f0] sm:$0xff]  ;;  %v4216_v14 = vcombine.low %v324_v48, %v328_v47 }
  0x97   : > { %v4204_v59 = vcombine.high %v323_v50, %v327_v49  ;;  %v4212_v18 = vcombine.low %v323_v50, %v327_v49 }
  0x98   : > { %1089 = vmatpush2.bf16.msra.mxu0 %v4174_v1  ;;  %1130 = vmatpush2.bf16.msra.mxu1 %v4178_v2  ;;  %v319_v2 = vld [vmem:[#allocation10 + $0x1b0] sm:$0xff]  ;;  %v4209_v1 = vpack.c.bf16 %v415_v60, %v415_v60  ;;  %6014 = vst [vmem:[#allocation89_spill] sm:$0xff] %v4216_v14 }
  0x99   : > { %1090 = vmatprep.subr.bf16.mxu0 %v4180_v3  ;;  %1131 = vmatprep.subr.bf16.mxu1 %v4183_v5  ;;  %6011 = vst [vmem:[#allocation86_spill] sm:$0xff] %v4204_v59  ;;  %v4207_v5 = vcombine.high %v324_v48, %v328_v47  ;;  %v315_v3 = vld [vmem:[#allocation10 + $0x190] sm:$0xff]  ;;  %6013 = vst [vmem:[#allocation88_spill] sm:$0xff] %v4212_v18 }
  0x9a   : > { %v4218_v16 = vcombine.high %v315_v3, %v319_v2  ;;  %v307_v60 = vld [vmem:[#allocation10 + $0x150] sm:$0xff]  ;;  %v4226_v49 = vcombine.low %v315_v3, %v319_v2 }
  0x9b   : > { %6012 = vst [vmem:[#allocation87_spill] sm:$0xff] %v4207_v5 }
  0x9c   : > { %1091 = vmatpush2.bf16.msra.mxu0 %v4186_v31  ;;  %1132 = vmatpush2.bf16.msra.mxu1 %v4190_v32  ;;  %v316_v31 = vld [vmem:[#allocation10 + $0x198] sm:$0xff]  ;;  %6015 = vst [vmem:[#allocation90_spill] sm:$0xff] %v4218_v16  ;;  %6017 = vst [vmem:[#allocation92_spill] sm:$0xff] %v4226_v49 }
  0x9d   : > { %1092 = vmatprep.subr.bf16.mxu0 %v4192_v33  ;;  %1133 = vmatprep.subr.bf16.mxu1 %v4195_v34  ;;  %v4221_v34 = vcombine.high %v316_v31, %v320_v17  ;;  %v311_v33 = vld [vmem:[#allocation10 + $0x170] sm:$0xff]  ;;  %v308_v32 = vld [vmem:[#allocation10 + $0x158] sm:$0xff]  ;;  %v4230_v47 = vcombine.low %v316_v31, %v320_v17 }
  0x9e   : > { %v4232_v48 = vcombine.high %v307_v60, %v311_v33  ;;  %v4240_v2 = vcombine.low %v307_v60, %v311_v33 }
  0x9f   : > { %6016 = vst [vmem:[#allocation91_spill] sm:$0xff] %v4221_v34  ;;  %6018 = vst [vmem:[#allocation93_spill] sm:$0xff] %v4230_v47 }
  0xa0   : > { %1093 = vmatpush2.bf16.msra.mxu0 %v4198_v54  ;;  %1134 = vmatpush2.bf16.msra.mxu1 %v4202_v57  ;;  %v312_v54 = vld [vmem:[#allocation10 + $0x178] sm:$0xff]  ;;  %6019 = vst [vmem:[#allocation94_spill] sm:$0xff] %v4232_v48  ;;  %6021 = vst [vmem:[#allocation96_spill] sm:$0xff] %v4240_v2 }
  0xa1   : > { %1144 = vmatprep.subr.bf16.mxu0 %v4204_v59  ;;  %1185 = vmatprep.subr.bf16.mxu1 %v4207_v5  ;;  %v4235_v50 = vcombine.high %v308_v32, %v312_v54  ;;  %v299_v5 = vld [vmem:[#allocation10 + $0x110] sm:$0xff]  ;;  %v300_v57 = vld [vmem:[#allocation10 + $0x118] sm:$0xff]  ;;  %v4244_v3 = vcombine.low %v308_v32, %v312_v54 }
  0xa2   : > { %v303_v59 = vld [vmem:[#allocation10 + $0x130] sm:$0xff] }
  0xa3   : > { %1095 = vmatmul.mubr.bf16.vlgmr.msra.gmra.mxu0 %v4209_v1  ;;  %1136 = vmatmul.mubr.bf16.vlgmr.msra.gmra.mxu1 %v4209_v1  ;;  %6020 = vst [vmem:[#allocation95_spill] sm:$0xff] %v4235_v50  ;;  %6022 = vst [vmem:[#allocation97_spill] sm:$0xff] %v4244_v3  ;;  %v4246_v31 = vcombine.high %v299_v5, %v303_v59  ;;  %v4252_v33 = vcombine.low %v299_v5, %v303_v59 }
  0xa4   : > { %1145 = vmatpush1.bf16.msra.mxu0 %v4212_v18  ;;  %1186 = vmatpush1.bf16.msra.mxu1 %v4216_v14  ;;  %v304_v18 = vld [vmem:[#allocation10 + $0x138] sm:$0xff] }
  0xa5   : > { %1146 = vmatprep.subr.bf16.mxu0 %v4218_v16  ;;  %1187 = vmatprep.subr.bf16.mxu1 %v4221_v34  ;;  %6023 = vst [vmem:[#allocation98_spill] sm:$0xff] %v4246_v31  ;;  %v4249_v17 = vcombine.high %v300_v57, %v304_v18  ;;  %v291_v34 = vld [vmem:[#allocation10 + $0xd0] sm:$0xff]  ;;  %v292_v14 = vld [vmem:[#allocation10 + $0xd8] sm:$0xff]  ;;  %6025 = vst [vmem:[#allocation100_spill] sm:$0xff] %v4252_v33  ;;  %v4256_v32 = vcombine.low %v300_v57, %v304_v18 }
  0xa6   : > { %1176 = vmatprep.mubr.bf16.mxu0 %v4085_v58  ;;  %1217 = vmatprep.mubr.bf16.mxu1 %v4085_v58  ;;  %v295_v16 = vld [vmem:[#allocation10 + $0xf0] sm:$0xff]  ;;  %v296_v58 = vld [vmem:[#allocation10 + $0xf8] sm:$0xff] }
  0xa7   : > { %6024 = vst [vmem:[#allocation99_spill] sm:$0xff] %v4249_v17  ;;  %6026 = vst [vmem:[#allocation101_spill] sm:$0xff] %v4256_v32  ;;  %v4258_v54 = vcombine.high %v291_v34, %v295_v16  ;;  %v4261_v60 = vcombine.high %v292_v14, %v296_v58  ;;  %v4264_v5 = vcombine.low %v291_v34, %v295_v16 }
  0xa8   : > { %1147 = vmatpush1.bf16.msra.mxu0 %v4226_v49  ;;  %1188 = vmatpush1.bf16.msra.mxu1 %v4230_v47  ;;  %v284_v47 = vld [vmem:[#allocation10 + $0x98] sm:$0xff]  ;;  %v4268_v57 = vcombine.low %v292_v14, %v296_v58 }
  0xa9   : > { %1148 = vmatprep.subr.bf16.mxu0 %v4232_v48  ;;  %1189 = vmatprep.subr.bf16.mxu1 %v4235_v50  ;;  %6027 = vst [vmem:[#allocation102_spill] sm:$0xff] %v4258_v54  ;;  %6028 = vst [vmem:[#allocation103_spill] sm:$0xff] %v4261_v60  ;;  %v283_v50 = vld [vmem:[#allocation10 + $0x90] sm:$0xff]  ;;  %v288_v49 = vld [vmem:[#allocation10 + $0xb8] sm:$0xff] }
  0xaa   : > { %v287_v48 = vld [vmem:[#allocation10 + $0xb0] sm:$0xff]  ;;  %6029 = vst [vmem:[#allocation104_spill] sm:$0xff] %v4264_v5  ;;  %6030 = vst [vmem:[#allocation105_spill] sm:$0xff] %v4268_v57  ;;  %v4273_v18 = vcombine.high %v284_v47, %v288_v49  ;;  %v4280_v14 = vcombine.low %v284_v47, %v288_v49 }
  0xab   : > { %v4270_v59 = vcombine.high %v283_v50, %v287_v48  ;;  %v4276_v34 = vcombine.low %v283_v50, %v287_v48 }
  0xac   : > { %1149 = vmatpush1.bf16.msra.mxu0 %v4240_v2  ;;  %1190 = vmatpush1.bf16.msra.mxu1 %v4244_v3  ;;  %6032 = vst [vmem:[#allocation107_spill] sm:$0xff] %v4273_v18  ;;  %v276_v3 = vld [vmem:[#allocation10 + $0x58] sm:$0xff]  ;;  %6034 = vst [vmem:[#allocation109_spill] sm:$0xff] %v4280_v14 }
  0xad   : > { %1150 = vmatprep.subr.bf16.mxu0 %v4246_v31  ;;  %1191 = vmatprep.subr.bf16.mxu1 %v4249_v17  ;;  %6031 = vst [vmem:[#allocation106_spill] sm:$0xff] %v4270_v59  ;;  %v275_v17 = vld [vmem:[#allocation10 + $0x50] sm:$0xff]  ;;  %v280_v2 = vld [vmem:[#allocation10 + $0x78] sm:$0xff]  ;;  %6033 = vst [vmem:[#allocation108_spill] sm:$0xff] %v4276_v34 }
  0xae   : > { %v279_v31 = vld [vmem:[#allocation10 + $0x70] sm:$0xff]  ;;  %v4285_v58 = vcombine.high %v276_v3, %v280_v2  ;;  %v4292_v49 = vcombine.low %v276_v3, %v280_v2 }
  0xaf   : > { %v4282_v16 = vcombine.high %v275_v17, %v279_v31  ;;  %v4288_v48 = vcombine.low %v275_v17, %v279_v31 }
  0xb0   : > { %1151 = vmatpush1.bf16.msra.mxu0 %v4252_v33  ;;  %1192 = vmatpush1.bf16.msra.mxu1 %v4256_v32  ;;  %6036 = vst [vmem:[#allocation111_spill] sm:$0xff] %v4285_v58  ;;  %v268_v32 = vld [vmem:[#allocation10 + $0x18] sm:$0xff]  ;;  %6038 = vst [vmem:[#allocation113_spill] sm:$0xff] %v4292_v49 }
  0xb1   : > { %1152 = vmatprep.subr.bf16.mxu0 %v4258_v54  ;;  %1193 = vmatprep.subr.bf16.mxu1 %v4261_v60  ;;  %6035 = vst [vmem:[#allocation110_spill] sm:$0xff] %v4282_v16  ;;  %v267_v60 = vld [vmem:[#allocation10 + $0x10] sm:$0xff]  ;;  %v272_v33 = vld [vmem:[#allocation10 + $0x38] sm:$0xff]  ;;  %6037 = vst [vmem:[#allocation112_spill] sm:$0xff] %v4288_v48 }
  0xb2   : > { %v271_v54 = vld [vmem:[#allocation10 + $0x30] sm:$0xff]  ;;  %v4297_v50 = vcombine.high %v268_v32, %v272_v33  ;;  %v4304_v2 = vcombine.low %v268_v32, %v272_v33 }
  0xb3   : > { %v4294_v47 = vcombine.high %v267_v60, %v271_v54  ;;  %v4300_v31 = vcombine.low %v267_v60, %v271_v54 }
  0xb4   : > { %1153 = vmatpush1.bf16.msra.mxu0 %v4264_v5  ;;  %1194 = vmatpush1.bf16.msra.mxu1 %v4268_v57  ;;  %6040 = vst [vmem:[#allocation115_spill] sm:$0xff] %v4297_v50  ;;  %v388_v57 = vld [vmem:[#allocation10 + $0x3d8] sm:$0xff]  ;;  %6042 = vst [vmem:[#allocation117_spill] sm:$0xff] %v4304_v2 }
  0xb5   : > { %1154 = vmatprep.subr.bf16.mxu0 %v4270_v59  ;;  %1195 = vmatprep.subr.bf16.mxu1 %v4273_v18  ;;  %6039 = vst [vmem:[#allocation114_spill] sm:$0xff] %v4294_v47  ;;  %v387_v18 = vld [vmem:[#allocation10 + $0x3d0] sm:$0xff]  ;;  %v392_v5 = vld [vmem:[#allocation10 + $0x3f8] sm:$0xff]  ;;  %6041 = vst [vmem:[#allocation116_spill] sm:$0xff] %v4300_v31 }
  0xb6   : > { %v391_v59 = vld [vmem:[#allocation10 + $0x3f0] sm:$0xff]  ;;  %v4309_v17 = vcombine.high %v388_v57, %v392_v5  ;;  %v4316_v33 = vcombine.low %v388_v57, %v392_v5 }
  0xb7   : > { %v4306_v3 = vcombine.high %v387_v18, %v391_v59  ;;  %v4312_v54 = vcombine.low %v387_v18, %v391_v59 }
  0xb8   : > { %1155 = vmatpush1.bf16.msra.mxu0 %v4276_v34  ;;  %1196 = vmatpush1.bf16.msra.mxu1 %v4280_v14  ;;  %6044 = vst [vmem:[#allocation119_spill] sm:$0xff] %v4309_v17  ;;  %v380_v14 = vld [vmem:[#allocation10 + $0x398] sm:$0xff]  ;;  %6046 = vst [vmem:[#allocation121_spill] sm:$0xff] %v4316_v33 }
  0xb9   : > { %1156 = vmatprep.subr.bf16.mxu0 %v4282_v16  ;;  %1197 = vmatprep.subr.bf16.mxu1 %v4285_v58  ;;  %6043 = vst [vmem:[#allocation118_spill] sm:$0xff] %v4306_v3  ;;  %v379_v58 = vld [vmem:[#allocation10 + $0x390] sm:$0xff]  ;;  %v384_v34 = vld [vmem:[#allocation10 + $0x3b8] sm:$0xff]  ;;  %6045 = vst [vmem:[#allocation120_spill] sm:$0xff] %v4312_v54 }
  0xba   : > { %v383_v16 = vld [vmem:[#allocation10 + $0x3b0] sm:$0xff]  ;;  %v4321_v60 = vcombine.high %v380_v14, %v384_v34  ;;  %v4328_v5 = vcombine.low %v380_v14, %v384_v34 }
  0xbb   : > { %v4318_v32 = vcombine.high %v379_v58, %v383_v16  ;;  %v4324_v59 = vcombine.low %v379_v58, %v383_v16 }
  0xbc   : > { %1157 = vmatpush1.bf16.msra.mxu0 %v4288_v48  ;;  %1198 = vmatpush1.bf16.msra.mxu1 %v4292_v49  ;;  %6048 = vst [vmem:[#allocation123_spill] sm:$0xff] %v4321_v60  ;;  %v372_v49 = vld [vmem:[#allocation10 + $0x358] sm:$0xff]  ;;  %6050 = vst [vmem:[#allocation125_spill] sm:$0xff] %v4328_v5 }
  0xbd   : > { %1158 = vmatprep.subr.bf16.mxu0 %v4294_v47  ;;  %1199 = vmatprep.subr.bf16.mxu1 %v4297_v50  ;;  %6047 = vst [vmem:[#allocation122_spill] sm:$0xff] %v4318_v32  ;;  %v371_v50 = vld [vmem:[#allocation10 + $0x350] sm:$0xff]  ;;  %v376_v48 = vld [vmem:[#allocation10 + $0x378] sm:$0xff]  ;;  %6049 = vst [vmem:[#allocation124_spill] sm:$0xff] %v4324_v59 }
  0xbe   : > { %v375_v47 = vld [vmem:[#allocation10 + $0x370] sm:$0xff]  ;;  %v4333_v18 = vcombine.high %v372_v49, %v376_v48  ;;  %v4340_v34 = vcombine.low %v372_v49, %v376_v48 }
  0xbf   : > { %v4330_v57 = vcombine.high %v371_v50, %v375_v47  ;;  %v4336_v16 = vcombine.low %v371_v50, %v375_v47 }
  0xc0   : > { %1159 = vmatpush1.bf16.msra.mxu0 %v4300_v31  ;;  %1200 = vmatpush1.bf16.msra.mxu1 %v4304_v2  ;;  %6052 = vst [vmem:[#allocation127_spill] sm:$0xff] %v4333_v18  ;;  %v364_v2 = vld [vmem:[#allocation10 + $0x318] sm:$0xff]  ;;  %6054 = vst [vmem:[#allocation129_spill] sm:$0xff] %v4340_v34 }
  0xc1   : > { %1160 = vmatprep.subr.bf16.mxu0 %v4306_v3  ;;  %1201 = vmatprep.subr.bf16.mxu1 %v4309_v17  ;;  %6051 = vst [vmem:[#allocation126_spill] sm:$0xff] %v4330_v57  ;;  %v363_v17 = vld [vmem:[#allocation10 + $0x310] sm:$0xff]  ;;  %v368_v31 = vld [vmem:[#allocation10 + $0x338] sm:$0xff]  ;;  %6053 = vst [vmem:[#allocation128_spill] sm:$0xff] %v4336_v16 }
  0xc2   : > { %v367_v3 = vld [vmem:[#allocation10 + $0x330] sm:$0xff]  ;;  %v4345_v58 = vcombine.high %v364_v2, %v368_v31  ;;  %v4352_v48 = vcombine.low %v364_v2, %v368_v31 }
  0xc3   : > { %v4342_v14 = vcombine.high %v363_v17, %v367_v3  ;;  %v4348_v47 = vcombine.low %v363_v17, %v367_v3 }
  0xc4   : > { %1161 = vmatpush2.bf16.msra.mxu0 %v4312_v54  ;;  %1202 = vmatpush2.bf16.msra.mxu1 %v4316_v33  ;;  %6056 = vst [vmem:[#allocation131_spill] sm:$0xff] %v4345_v58  ;;  %v356_v33 = vld [vmem:[#allocation10 + $0x2d8] sm:$0xff]  ;;  %6058 = vst [vmem:[#allocation133_spill] sm:$0xff] %v4352_v48 }
  0xc5   : > { %1162 = vmatprep.subr.bf16.mxu0 %v4318_v32  ;;  %1203 = vmatprep.subr.bf16.mxu1 %v4321_v60  ;;  %6055 = vst [vmem:[#allocation130_spill] sm:$0xff] %v4342_v14  ;;  %v355_v60 = vld [vmem:[#allocation10 + $0x2d0] sm:$0xff]  ;;  %v360_v54 = vld [vmem:[#allocation10 + $0x2f8] sm:$0xff]  ;;  %6057 = vst [vmem:[#allocation132_spill] sm:$0xff] %v4348_v47 }
  0xc6   : > { %v359_v32 = vld [vmem:[#allocation10 + $0x2f0] sm:$0xff]  ;;  %v4357_v50 = vcombine.high %v356_v33, %v360_v54  ;;  %v4364_v31 = vcombine.low %v356_v33, %v360_v54 }
  0xc7   : > { %v4354_v49 = vcombine.high %v355_v60, %v359_v32  ;;  %v4360_v3 = vcombine.low %v355_v60, %v359_v32 }
  0xc8   : > { %1163 = vmatpush2.bf16.msra.mxu0 %v4324_v59  ;;  %1204 = vmatpush2.bf16.msra.mxu1 %v4328_v5  ;;  %6060 = vst [vmem:[#allocation135_spill] sm:$0xff] %v4357_v50  ;;  %v348_v5 = vld [vmem:[#allocation10 + $0x298] sm:$0xff]  ;;  %6062 = vst [vmem:[#allocation137_spill] sm:$0xff] %v4364_v31 }
  0xc9   : > { %1164 = vmatprep.subr.bf16.mxu0 %v4330_v57  ;;  %1205 = vmatprep.subr.bf16.mxu1 %v4333_v18  ;;  %6059 = vst [vmem:[#allocation134_spill] sm:$0xff] %v4354_v49  ;;  %v347_v18 = vld [vmem:[#allocation10 + $0x290] sm:$0xff]  ;;  %v352_v59 = vld [vmem:[#allocation10 + $0x2b8] sm:$0xff]  ;;  %6061 = vst [vmem:[#allocation136_spill] sm:$0xff] %v4360_v3 }
  0xca   : > { %v351_v57 = vld [vmem:[#allocation10 + $0x2b0] sm:$0xff]  ;;  %v4369_v17 = vcombine.high %v348_v5, %v352_v59  ;;  %v4376_v54 = vcombine.low %v348_v5, %v352_v59 }
  0xcb   : > { %v4366_v2 = vcombine.high %v347_v18, %v351_v57  ;;  %v4372_v32 = vcombine.low %v347_v18, %v351_v57 }
  0xcc   : > { %1165 = vmatpush2.bf16.msra.mxu0 %v4336_v16  ;;  %1206 = vmatpush2.bf16.msra.mxu1 %v4340_v34  ;;  %6064 = vst [vmem:[#allocation139_spill] sm:$0xff] %v4369_v17  ;;  %v340_v34 = vld [vmem:[#allocation10 + $0x258] sm:$0xff]  ;;  %6066 = vst [vmem:[#allocation141_spill] sm:$0xff] %v4376_v54 }
  0xcd   : > { %1166 = vmatprep.subr.bf16.mxu0 %v4342_v14  ;;  %1207 = vmatprep.subr.bf16.mxu1 %v4345_v58  ;;  %6063 = vst [vmem:[#allocation138_spill] sm:$0xff] %v4366_v2  ;;  %v339_v58 = vld [vmem:[#allocation10 + $0x250] sm:$0xff]  ;;  %v344_v16 = vld [vmem:[#allocation10 + $0x278] sm:$0xff]  ;;  %6065 = vst [vmem:[#allocation140_spill] sm:$0xff] %v4372_v32 }
  0xce   : > { %v343_v14 = vld [vmem:[#allocation10 + $0x270] sm:$0xff]  ;;  %v4381_v60 = vcombine.high %v340_v34, %v344_v16  ;;  %v4388_v59 = vcombine.low %v340_v34, %v344_v16  ;;  %v6077_v34 = vld [vmem:[#allocation67_spill] sm:$0xff] }
  0xcf   : > { %v4378_v33 = vcombine.high %v339_v58, %v343_v14  ;;  %v4384_v57 = vcombine.low %v339_v58, %v343_v14  ;;  %v6076_v16 = vld [vmem:[#allocation66_spill] sm:$0xff]  ;;  %v6078_v58 = vld [vmem:[#allocation68_spill] sm:$0xff] }
  0xd0   : > { %1167 = vmatpush2.bf16.msra.mxu0 %v4348_v47  ;;  %1208 = vmatpush2.bf16.msra.mxu1 %v4352_v48  ;;  %6068 = vst [vmem:[#allocation143_spill] sm:$0xff] %v4381_v60  ;;  %v332_v48 = vld [vmem:[#allocation10 + $0x218] sm:$0xff]  ;;  %6070 = vst [vmem:[#allocation145_spill] sm:$0xff] %v4388_v59 }
  0xd1   : > { %1168 = vmatprep.subr.bf16.mxu0 %v4354_v49  ;;  %1209 = vmatprep.subr.bf16.mxu1 %v4357_v50  ;;  %6067 = vst [vmem:[#allocation142_spill] sm:$0xff] %v4378_v33  ;;  %v331_v50 = vld [vmem:[#allocation10 + $0x210] sm:$0xff]  ;;  %v336_v47 = vld [vmem:[#allocation10 + $0x238] sm:$0xff]  ;;  %6069 = vst [vmem:[#allocation144_spill] sm:$0xff] %v4384_v57 }
  0xd2   : > { %v335_v49 = vld [vmem:[#allocation10 + $0x230] sm:$0xff]  ;;  %v4393_v18 = vcombine.high %v332_v48, %v336_v47  ;;  %v4400_v14 = vcombine.low %v332_v48, %v336_v47 }
  0xd3   : > { %v4390_v5 = vcombine.high %v331_v50, %v335_v49  ;;  %v6079_v47 = vld [vmem:[#allocation69_spill] sm:$0xff]  ;;  %v6080_v48 = vld [vmem:[#allocation70_spill] sm:$0xff] }
  0xd4   : > { %1169 = vmatpush2.bf16.msra.mxu0 %v4360_v3  ;;  %1210 = vmatpush2.bf16.msra.mxu1 %v4364_v31  ;;  %6072 = vst [vmem:[#allocation147_spill] sm:$0xff] %v4393_v18  ;;  %6074 = vst [vmem:[#allocation149_spill] sm:$0xff] %v4400_v14 }
  0xd5   : > { %1170 = vmatprep.subr.bf16.mxu0 %v4366_v2  ;;  %1211 = vmatprep.subr.bf16.mxu1 %v4369_v17  ;;  %6071 = vst [vmem:[#allocation146_spill] sm:$0xff] %v4390_v5  ;;  %v4396_v17 = vcombine.low %v331_v50, %v335_v49  ;;  %v6081_v49 = vld [vmem:[#allocation71_spill] sm:$0xff]  ;;  %v6082_v50 = vld [vmem:[#allocation72_spill] sm:$0xff] }
  0xd7   : > { %6073 = vst [vmem:[#allocation148_spill] sm:$0xff] %v4396_v17 }
  0xd8   : > { %1171 = vmatpush2.bf16.msra.mxu0 %v4372_v32  ;;  %1212 = vmatpush2.bf16.msra.mxu1 %v4376_v54 }
  0xd9   : > { %1172 = vmatprep.subr.bf16.mxu0 %v4378_v33  ;;  %1213 = vmatprep.subr.bf16.mxu1 %v4381_v60 }
  0xdc   : > { %1173 = vmatpush2.bf16.msra.mxu0 %v4384_v57  ;;  %1214 = vmatpush2.bf16.msra.mxu1 %v4388_v59 }
  0xdd   : > { %1174 = vmatprep.subr.bf16.mxu0 %v4390_v5  ;;  %1215 = vmatprep.subr.bf16.mxu1 %v4393_v18 }
  0xe0   : > { %1175 = vmatpush2.bf16.msra.mxu0 %v4396_v17  ;;  %1216 = vmatpush2.bf16.msra.mxu1 %v4400_v14 }
  0xe1   : > { %1306 = vmatprep.subr.bf16.mxu0 %v4007_v4  ;;  %1347 = vmatprep.subr.bf16.mxu1 %v4011_v9 }
  0xe3   : > { %1177 = vmatmul.mubr.bf16.vlgmr.msra.gmra.mxu0 %v4209_v1  ;;  %1218 = vmatmul.mubr.bf16.vlgmr.msra.gmra.mxu1 %v4209_v1  ;;  %v6075_v1 = vld [vmem:[#allocation65_spill] sm:$0xff] }
  0xe4   : > { %1307 = vmatpush1.bf16.msra.mxu0 %v4009_v6  ;;  %1348 = vmatpush1.bf16.msra.mxu1 %v4013_v10 }
  0xe5   : > { %1308 = vmatprep.subr.bf16.mxu0 %v4015_v11  ;;  %1349 = vmatprep.subr.bf16.mxu1 %v4018_v15 }
  0xe8   : > { %1309 = vmatpush1.bf16.msra.mxu0 %v4022_v19  ;;  %1350 = vmatpush1.bf16.msra.mxu1 %v4026_v20 }
  0xe9   : > { %1310 = vmatprep.subr.bf16.mxu0 %v4028_v21  ;;  %1351 = vmatprep.subr.bf16.mxu1 %v4031_v22 }
  0xec   : > { %1311 = vmatpush1.bf16.msra.mxu0 %v4034_v27  ;;  %1352 = vmatpush1.bf16.msra.mxu1 %v4038_v28 }
  0xed   : > { %1312 = vmatprep.subr.bf16.mxu0 %v4040_v29  ;;  %1353 = vmatprep.subr.bf16.mxu1 %v4043_v30 }
  0xf0   : > { %1313 = vmatpush1.bf16.msra.mxu0 %v4046_v35  ;;  %1354 = vmatpush1.bf16.msra.mxu1 %v4050_v36 }
  0xf1   : > { %1314 = vmatprep.subr.bf16.mxu0 %v4052_v37  ;;  %1355 = vmatprep.subr.bf16.mxu1 %v4055_v38 }
  0xf4   : > { %1315 = vmatpush1.bf16.msra.mxu0 %v4058_v43  ;;  %1356 = vmatpush1.bf16.msra.mxu1 %v4062_v44 }
  0xf5   : > { %1316 = vmatprep.subr.bf16.mxu0 %v4064_v45  ;;  %1357 = vmatprep.subr.bf16.mxu1 %v4067_v46 }
  0xf8   : > { %1317 = vmatpush1.bf16.msra.mxu0 %v4070_v51  ;;  %1358 = vmatpush1.bf16.msra.mxu1 %v4074_v52 }
  0xf9   : > { %1318 = vmatprep.subr.bf16.mxu0 %v4076_v53  ;;  %1359 = vmatprep.subr.bf16.mxu1 %v4081_v55 }
  0xfc   : > { %1319 = vmatpush1.bf16.msra.mxu0 %v4088_v61  ;;  %1360 = vmatpush1.bf16.msra.mxu1 %v4093_v62 }
  0xfd   : > { %1320 = vmatprep.subr.bf16.mxu0 %v4095_v63  ;;  %1361 = vmatprep.subr.bf16.mxu1 %v4098_v0  ;;  %v393_v0 = vld [vmem:[#allocation12] sm:$0xf] }
 0x100   : > { %1321 = vmatpush1.bf16.msra.mxu0 %v4102_v7  ;;  %1362 = vmatpush1.bf16.msra.mxu1 %v4106_v8  ;;  %v1255_v8 = vld [vmem:[%s3995_s8] sm:$0xff] }
 0x101   : > { %1322 = vmatprep.subr.bf16.mxu0 %v4108_v12  ;;  %1363 = vmatprep.subr.bf16.mxu1 %v4111_v13 }
 0x104   : > { %1323 = vmatpush2.bf16.msra.mxu0 %v4114_v23  ;;  %1364 = vmatpush2.bf16.msra.mxu1 %v4118_v24 }
 0x105   : > { %1324 = vmatprep.subr.bf16.mxu0 %v4120_v25  ;;  %1365 = vmatprep.subr.bf16.mxu1 %v4123_v26  ;;  %v3847_v25 = vmov 1983009808  }
 0x108   : > { %1325 = vmatpush2.bf16.msra.mxu0 %v4126_v39  ;;  %1366 = vmatpush2.bf16.msra.mxu1 %v4130_v40 }
 0x109   : > { %1326 = vmatprep.subr.bf16.mxu0 %v4132_v41  ;;  %1367 = vmatprep.subr.bf16.mxu1 %v4135_v42  ;;  %v6083_v41 = vld [vmem:[#allocation73_spill] sm:$0xff]  ;;  %v6084_v42 = vld [vmem:[#allocation74_spill] sm:$0xff] }
 0x10c   : > { %1327 = vmatpush2.bf16.msra.mxu0 %v4138_v56  ;;  %1368 = vmatpush2.bf16.msra.mxu1 %v6075_v1  ;;  %v6085_v56 = vld [vmem:[#allocation75_spill] sm:$0xff]  ;;  %v6086_v1 = vld [vmem:[#allocation76_spill] sm:$0xff] }
 0x10d   : > { %1328 = vmatprep.subr.bf16.mxu0 %v6076_v16  ;;  %1369 = vmatprep.subr.bf16.mxu1 %v6077_v34  ;;  %v6087_v16 = vld [vmem:[#allocation77_spill] sm:$0xff]  ;;  %v6088_v34 = vld [vmem:[#allocation78_spill] sm:$0xff] }
 0x110   : > { %1329 = vmatpush2.bf16.msra.mxu0 %v6078_v58  ;;  %1370 = vmatpush2.bf16.msra.mxu1 %v6079_v47  ;;  %v6089_v58 = vld [vmem:[#allocation79_spill] sm:$0xff]  ;;  %v6090_v47 = vld [vmem:[#allocation80_spill] sm:$0xff] }
 0x111   : > { %1330 = vmatprep.subr.bf16.mxu0 %v6080_v48  ;;  %1371 = vmatprep.subr.bf16.mxu1 %v6081_v49  ;;  %v6091_v48 = vld [vmem:[#allocation81_spill] sm:$0xff]  ;;  %v6092_v49 = vld [vmem:[#allocation82_spill] sm:$0xff] }
 0x114   : > { %1331 = vmatpush2.bf16.msra.mxu0 %v6082_v50  ;;  %1372 = vmatpush2.bf16.msra.mxu1 %v6083_v41  ;;  %v6093_v50 = vld [vmem:[#allocation83_spill] sm:$0xff]  ;;  %v6094_v41 = vld [vmem:[#allocation84_spill] sm:$0xff] }
 0x115   : > { %1332 = vmatprep.subr.bf16.mxu0 %v6084_v42  ;;  %1373 = vmatprep.subr.bf16.mxu1 %v6085_v56  ;;  %v6095_v42 = vld [vmem:[#allocation85_spill] sm:$0xff]  ;;  %v6096_v56 = vld [vmem:[#allocation86_spill] sm:$0xff] }
 0x118   : > { %1333 = vmatpush2.bf16.msra.mxu0 %v6086_v1  ;;  %1374 = vmatpush2.bf16.msra.mxu1 %v6087_v16  ;;  %v6097_v1 = vld [vmem:[#allocation87_spill] sm:$0xff] }
 0x119   : > { %1334 = vmatprep.subr.bf16.mxu0 %v6088_v34  ;;  %1375 = vmatprep.subr.bf16.mxu1 %v6089_v58 }
 0x11c   : > { %1335 = vmatpush2.bf16.msra.mxu0 %v6090_v47  ;;  %1376 = vmatpush2.bf16.msra.mxu1 %v6091_v48 }
 0x11d   : > { %1336 = vmatprep.subr.bf16.mxu0 %v6092_v49  ;;  %1377 = vmatprep.subr.bf16.mxu1 %v6093_v50  ;;  %v395_v49 = vlaneseq  ;;  %v1263_v50 = vunpack.c.l.s4 %v3847_v25 }
 0x11f   : > { %v396_v24 = vshrl.u32 %v395_v49, 7 }
 0x120   : > { %1337 = vmatpush2.bf16.msra.mxu0 %v6094_v41  ;;  %1378 = vmatpush2.bf16.msra.mxu1 %v6095_v42  ;;  %v1264_v41 = vunpack.c.0.s8 %v1263_v50 }
 0x121   : > { %1388 = vmatprep.subr.bf16.mxu0 %v6096_v56  ;;  %1429 = vmatprep.subr.bf16.mxu1 %v6097_v1  ;;  %v401_v25 = vsub.s32 1, %v396_v24 }
 0x122   : > { %v4473_v42 = vsub.s32 %v1264_v41, %v396_v24 }
 0x123   : > { %v4480_v41 = vrot.slane %v393_v0, %v401_v25 }
 0x124   : > { %6098 = vst [vmem:[#allocation150_spill] sm:$0xff] %v4473_v42 }
 0x125   : > { %6100 = vst [vmem:[#allocation152_spill] sm:$0xff] %v4480_v41 }
 0x163   : > { %v1096_v16 = vpop.f32.mrf.mxu0  ;;  %v1137_v34 = vpop.f32.mrf.mxu1 }
 0x165   : > { %v1098_v40 = vpop.f32.mrf.mxu0  ;;  %v1139_v58 = vpop.f32.mrf.mxu1 }
 0x166   : > { %v1260_v23 = vcombine.low %v1096_v16, %v1098_v40  ;;  %v1261_v56 = vcombine.low %v1137_v34, %v1139_v58  ;;  %v405_v40 = vsub.s32 2, %v396_v24 }
 0x167   : > { %v1100_v47 = vpop.f32.mrf.mxu0  ;;  %v1141_v39 = vpop.f32.mrf.mxu1 }
 0x168   : > { %v1268_v1 = vrot.slane %v1260_v23, %v4473_v42  ;;  %v1275_v13 = vrot.slane %v1261_v56, %v4473_v42  ;;  %v4483_v56 = vrot.slane %v393_v0, %v405_v40 }
 0x169   : > { %v1101_v48 = vpop.f32.mrf.mxu0  ;;  %v1142_v26 = vpop.f32.mrf.mxu1 }
 0x16a   : > { %v1276_v12 = vcombine.low %v1268_v1, %v1275_v13  ;;  %v397_v26 = vsub.s32 0, %v396_v24 }
 0x16c   : > { %v1278_v7 = vadd.f32 %v1276_v12, %v1255_v8  ;;  %v4478_v49 = vrot.slane %v393_v0, %v397_v26 }
 0x16e   : > { %v1284_v47 = vrot.slane %v1278_v7, 2  ;;  %v1279_v48 = vmul.f32 0.5, %v1278_v7  ;;  %6099 = vst [vmem:[#allocation151_spill] sm:$0xff] %v4478_v49  ;;  %v1290_v8 = vrot.slane %v1278_v7, 4 }
 0x170   : > { %v1286_v39 = vmul.f32 0.5, %v1284_v47 }
 0x172   : > { %3469 = vtanh.f32 %v1286_v39 }
 0x173   : > { %3471 = vtanh.f32 %v1279_v48  ;;  %v409_v48 = vsub.s32 3, %v396_v24 }
 0x17f   : > { %v3470_v40 = vpop.eup %3469 }
 0x180   : > { %v1288_v42 = vmul.f32 0.5, %v3470_v40 }
 0x1a3   : > { %v1178_v16 = vpop.f32.mrf.mxu0  ;;  %v1219_v13 = vpop.f32.mrf.mxu1 }
 0x1a4   : > { %v1226_v23 = vadd.f32 %v1178_v16, %v4478_v49  ;;  %v1228_v39 = vadd.f32 %v1219_v13, %v4483_v56  ;;  %v4487_v49 = vrot.slane %v393_v0, %v409_v48 }
 0x1a5   : > { %v1180_v12 = vpop.f32.mrf.mxu0  ;;  %v1221_v58 = vpop.f32.mrf.mxu1 }
 0x1a6   : > { %v1230_v1 = vmul.f32 0.5, %v1226_v23  ;;  %v1227_v34 = vadd.f32 %v1180_v12, %v4480_v41  ;;  %v3472_v23 = vpop.eup %3471  ;;  %v1293_v12 = vrot.slane %v1278_v7, 6 }
 0x1a7   : > { %v1182_v50 = vpop.f32.mrf.mxu0  ;;  %v1223_v26 = vpop.f32.mrf.mxu1  ;;  %v1281_v41 = vmul.f32 0.5, %v3472_v23  ;;  %v4492_v23 = vld [vmem:[#allocation5] sm:$0x3] }
 0x1a8   : > { %3473 = vtanh.f32 %v1230_v1  ;;  %v1234_v47 = vmul.f32 0.5, %v1227_v34  ;;  %v1229_v1 = vadd.f32 %v1221_v58, %v4487_v49  ;;  %v1289_v34 = vadd.f32 0.5, %v1288_v42  ;;  %v416_v50 = vld [vmem:[#allocation3] sm:$0x3] }
 0x1a9   : > { %3475 = vtanh.f32 %v1290_v8  ;;  %v1183_v25 = vpop.f32.mrf.mxu0  ;;  %v1224_v16 = vpop.f32.mrf.mxu1  ;;  %v1295_v13 = vmul.f32 0.5, %v1293_v12  ;;  %v1282_v24 = vadd.f32 0.5, %v1281_v41  ;;  %v1249_v41 = vstv %s1248_s23 }
 0x1aa   : > { %3477 = vtanh.f32 %v1234_v47  ;;  %v1239_v26 = vmul.f32 0.5, %v1229_v1  ;;  %v1299_v47 = vmul.f32 %v1289_v34, %v416_v50  ;;  %vm4497_vm0 = vcmp.eq.s32.totalorder %v1249_v41, 1  ;;  %v6196_v34 = vld [vmem:[#allocation91_spill] sm:$0xff] }
 0x1ab   : > { %3479 = vtanh.f32 %v1228_v39 }
 0x1ac   : > { %3481 = vtanh.f32 %v1295_v13  ;;  %v6118_v13 = vld [vmem:[#allocation101_spill] sm:$0xff] }
 0x1ad   : > { %3483 = vtanh.f32 %v1239_v26 }
 0x1b5   : > { %v3474_v8 = vpop.eup %3473 }
 0x1b6   : > { %v3476_v25 = vpop.eup %3475  ;;  %v1232_v16 = vmul.f32 0.5, %v3474_v8 }
 0x1b7   : > { %v3478_v39 = vpop.eup %3477  ;;  %v1300_v0 = vmul.f32 %v3476_v25, %v1282_v24 }
 0x1b8   : > { %v1233_v48 = vadd.f32 0.5, %v1232_v16  ;;  %v1236_v40 = vmul.f32 0.5, %v3478_v39  ;;  %v3480_v7 = vpop.eup %3479 }
 0x1b9   : > { %v4494_v42 = vadd.f32 %v1300_v0, %v1299_v47  ;;  %v3482_v24 = vpop.eup %3481 }
 0x1ba   : > { %v1237_v58 = vadd.f32 0.5, %v1236_v40  ;;  %v1244_v1 = vmul.f32 %v3480_v7, %v1233_v48  ;;  %v3484_v26 = vpop.eup %3483  ;;  %v1297_v25 = vmul.f32 0.5, %v3482_v24  ;;  %v6105_v24 = vld [vmem:[#allocation88_spill] sm:$0xff]  ;;  %v6116_v7 = vld [vmem:[#allocation99_spill] sm:$0xff] }
 0x1bb   : > { %3485 = vtanh.f32 %v4494_v42  ;;  %v1241_v8 = vmul.f32 0.5, %v3484_v26  ;;  %v6106_v26 = vld [vmem:[#allocation89_spill] sm:$0xff] }
 0x1bc   : > { %v1243_v12 = vmul.f32 %v1237_v58, %v4492_v23  ;;  %v1298_v39 = vadd.f32 0.5, %v1297_v25  ;;  %v6104_v58 = vld [vmem:[#allocation46_spill] sm:$0xff]  ;;  %v6108_v25 = vld [vmem:[#allocation91_spill] sm:$0xff] }
 0x1bd   : > { %v1242_v16 = vadd.f32 0.5, %v1241_v8  ;;  %v6107_v8 = vld [vmem:[#allocation90_spill] sm:$0xff] }
 0x1be   : > { %v4501_v50 = vadd.f32 %v1244_v1, %v1243_v12 }
 0x1c0   : > { %3487 = vtanh.f32 %v4501_v50 }
 0x1c8   : > { %v3486_v47 = vpop.eup %3485 }
 0x1c9   : > { %v1303_v40 = vmul.f32 %v3486_v47, %v1298_v39  ;;  %v6109_v47 = vld [vmem:[#allocation92_spill] sm:$0xff]  ;;  %v6111_v39 = vld [vmem:[#allocation94_spill] sm:$0xff] }
 0x1cb   : > { %v4518_v1 = vpack.c.bf16 %v1303_v40, %v1303_v40  ;;  %v6113_v40 = vld [vmem:[#allocation96_spill] sm:$0xff] }
 0x1cd   : > { %v3488_v0 = vpop.eup %3487 }
 0x1ce   : > { %v4509_v48 = vmul.f32 %v3488_v0, %v1242_v16  ;;  %v6110_v16 = vld [vmem:[#allocation93_spill] sm:$0xff]  ;;  %v6112_v0 = vld [vmem:[#allocation95_spill] sm:$0xff] }
 0x1d0   : > { %v1251_v41 = vsel %vm4497_vm0, %v6104_v58, %v4509_v48  ;;  %v6114_v58 = vld [vmem:[#allocation97_spill] sm:$0xff] }
 0x1d1   : > { %v1305_v12 = vpack.c.bf16 %v1251_v41, %v1251_v41  ;;  %v6115_v41 = vld [vmem:[#allocation98_spill] sm:$0xff] }
 0x1d3   : > { %1338 = vmatprep.mubr.bf16.mxu0 %v1305_v12  ;;  %1379 = vmatprep.mubr.bf16.mxu1 %v1305_v12 }
 0x1d4   : > { %1339 = vmatmul.mubr.bf16.vlgmr.msra.gmra.mxu0 %v4518_v1  ;;  %1380 = vmatmul.mubr.bf16.vlgmr.msra.gmra.mxu1 %v4518_v1 }
 0x1d5   : > { %1389 = vmatpush1.bf16.msra.mxu0 %v6105_v24  ;;  %1430 = vmatpush1.bf16.msra.mxu1 %v6106_v26 }
 0x1d6   : > { %1420 = vmatprep.mubr.bf16.mxu0 %v1305_v12  ;;  %1461 = vmatprep.mubr.bf16.mxu1 %v1305_v12  ;;  %v6117_v12 = vld [vmem:[#allocation100_spill] sm:$0xff] }
 0x1d7   : > { %1390 = vmatprep.subr.bf16.mxu0 %v6107_v8  ;;  %1431 = vmatprep.subr.bf16.mxu1 %v6108_v25  ;;  %v6119_v25 = vld [vmem:[#allocation102_spill] sm:$0xff] }
 0x1d9   : > { %1391 = vmatpush1.bf16.msra.mxu0 %v6109_v47  ;;  %1432 = vmatpush1.bf16.msra.mxu1 %v6110_v16  ;;  %v6120_v47 = vld [vmem:[#allocation103_spill] sm:$0xff]  ;;  %v6121_v16 = vld [vmem:[#allocation104_spill] sm:$0xff] }
 0x1da   : > { %1392 = vmatprep.subr.bf16.mxu0 %v6111_v39  ;;  %1433 = vmatprep.subr.bf16.mxu1 %v6112_v0  ;;  %v6122_v39 = vld [vmem:[#allocation105_spill] sm:$0xff]  ;;  %v6123_v0 = vld [vmem:[#allocation106_spill] sm:$0xff] }
 0x1dd   : > { %1393 = vmatpush1.bf16.msra.mxu0 %v6113_v40  ;;  %1434 = vmatpush1.bf16.msra.mxu1 %v6114_v58  ;;  %v6124_v40 = vld [vmem:[#allocation107_spill] sm:$0xff]  ;;  %v6125_v58 = vld [vmem:[#allocation108_spill] sm:$0xff] }
 0x1de   : > { %1394 = vmatprep.subr.bf16.mxu0 %v6115_v41  ;;  %1435 = vmatprep.subr.bf16.mxu1 %v6116_v7  ;;  %v6126_v41 = vld [vmem:[#allocation109_spill] sm:$0xff]  ;;  %v6127_v7 = vld [vmem:[#allocation110_spill] sm:$0xff] }
 0x1e1   : > { %1395 = vmatpush1.bf16.msra.mxu0 %v6117_v12  ;;  %1436 = vmatpush1.bf16.msra.mxu1 %v6118_v13  ;;  %v6128_v12 = vld [vmem:[#allocation111_spill] sm:$0xff]  ;;  %v6129_v13 = vld [vmem:[#allocation112_spill] sm:$0xff] }
 0x1e2   : > { %1396 = vmatprep.subr.bf16.mxu0 %v6119_v25  ;;  %1437 = vmatprep.subr.bf16.mxu1 %v6120_v47  ;;  %v6130_v25 = vld [vmem:[#allocation113_spill] sm:$0xff]  ;;  %v6131_v47 = vld [vmem:[#allocation114_spill] sm:$0xff] }
 0x1e5   : > { %1397 = vmatpush1.bf16.msra.mxu0 %v6121_v16  ;;  %1438 = vmatpush1.bf16.msra.mxu1 %v6122_v39  ;;  %v6132_v16 = vld [vmem:[#allocation115_spill] sm:$0xff]  ;;  %v6133_v39 = vld [vmem:[#allocation116_spill] sm:$0xff] }
 0x1e6   : > { %1398 = vmatprep.subr.bf16.mxu0 %v6123_v0  ;;  %1439 = vmatprep.subr.bf16.mxu1 %v6124_v40  ;;  %v6134_v0 = vld [vmem:[#allocation117_spill] sm:$0xff]  ;;  %v6135_v40 = vld [vmem:[#allocation118_spill] sm:$0xff] }
 0x1e9   : > { %1399 = vmatpush1.bf16.msra.mxu0 %v6125_v58  ;;  %1440 = vmatpush1.bf16.msra.mxu1 %v6126_v41  ;;  %v6136_v58 = vld [vmem:[#allocation119_spill] sm:$0xff]  ;;  %v6137_v41 = vld [vmem:[#allocation120_spill] sm:$0xff] }
 0x1ea   : > { %1400 = vmatprep.subr.bf16.mxu0 %v6127_v7  ;;  %1441 = vmatprep.subr.bf16.mxu1 %v6128_v12  ;;  %v6138_v7 = vld [vmem:[#allocation121_spill] sm:$0xff]  ;;  %v6139_v12 = vld [vmem:[#allocation122_spill] sm:$0xff] }
 0x1ed   : > { %1401 = vmatpush1.bf16.msra.mxu0 %v6129_v13  ;;  %1442 = vmatpush1.bf16.msra.mxu1 %v6130_v25  ;;  %v6140_v13 = vld [vmem:[#allocation123_spill] sm:$0xff]  ;;  %v6141_v25 = vld [vmem:[#allocation124_spill] sm:$0xff] }
 0x1ee   : > { %1402 = vmatprep.subr.bf16.mxu0 %v6131_v47  ;;  %1443 = vmatprep.subr.bf16.mxu1 %v6132_v16  ;;  %v6142_v47 = vld [vmem:[#allocation125_spill] sm:$0xff]  ;;  %v6143_v16 = vld [vmem:[#allocation126_spill] sm:$0xff] }
 0x1f1   : > { %1403 = vmatpush1.bf16.msra.mxu0 %v6133_v39  ;;  %1444 = vmatpush1.bf16.msra.mxu1 %v6134_v0  ;;  %v6144_v39 = vld [vmem:[#allocation127_spill] sm:$0xff]  ;;  %v6145_v0 = vld [vmem:[#allocation128_spill] sm:$0xff] }
 0x1f2   : > { %1404 = vmatprep.subr.bf16.mxu0 %v6135_v40  ;;  %1445 = vmatprep.subr.bf16.mxu1 %v6136_v58  ;;  %v6146_v40 = vld [vmem:[#allocation129_spill] sm:$0xff]  ;;  %v6147_v58 = vld [vmem:[#allocation130_spill] sm:$0xff] }
 0x1f5   : > { %1405 = vmatpush2.bf16.msra.mxu0 %v6137_v41  ;;  %1446 = vmatpush2.bf16.msra.mxu1 %v6138_v7  ;;  %v6148_v41 = vld [vmem:[#allocation131_spill] sm:$0xff]  ;;  %v6149_v7 = vld [vmem:[#allocation132_spill] sm:$0xff] }
 0x1f6   : > { %1406 = vmatprep.subr.bf16.mxu0 %v6139_v12  ;;  %1447 = vmatprep.subr.bf16.mxu1 %v6140_v13  ;;  %v6150_v12 = vld [vmem:[#allocation133_spill] sm:$0xff]  ;;  %v6151_v13 = vld [vmem:[#allocation134_spill] sm:$0xff] }
 0x1f9   : > { %1407 = vmatpush2.bf16.msra.mxu0 %v6141_v25  ;;  %1448 = vmatpush2.bf16.msra.mxu1 %v6142_v47  ;;  %v6152_v25 = vld [vmem:[#allocation135_spill] sm:$0xff] }
 0x1fa   : > { %1408 = vmatprep.subr.bf16.mxu0 %v6143_v16  ;;  %1449 = vmatprep.subr.bf16.mxu1 %v6144_v39 }
 0x1fd   : > { %1409 = vmatpush2.bf16.msra.mxu0 %v6145_v0  ;;  %1450 = vmatpush2.bf16.msra.mxu1 %v6146_v40  ;;  %v6153_v0 = vld [vmem:[#allocation139_spill] sm:$0xff] }
 0x1fe   : > { %1410 = vmatprep.subr.bf16.mxu0 %v6147_v58  ;;  %1451 = vmatprep.subr.bf16.mxu1 %v6148_v41 }
 0x201   : > { %1411 = vmatpush2.bf16.msra.mxu0 %v6149_v7  ;;  %1452 = vmatpush2.bf16.msra.mxu1 %v6150_v12 }
 0x202   : > { %1412 = vmatprep.subr.bf16.mxu0 %v6151_v13  ;;  %1453 = vmatprep.subr.bf16.mxu1 %v6152_v25 }
 0x205   : > { %1413 = vmatpush2.bf16.msra.mxu0 %v4360_v3  ;;  %1454 = vmatpush2.bf16.msra.mxu1 %v4364_v31 }
 0x206   : > { %1414 = vmatprep.subr.bf16.mxu0 %v4366_v2  ;;  %1455 = vmatprep.subr.bf16.mxu1 %v6153_v0 }
 0x209   : > { %1415 = vmatpush2.bf16.msra.mxu0 %v4372_v32  ;;  %1456 = vmatpush2.bf16.msra.mxu1 %v4376_v54 }
 0x20a   : > { %1416 = vmatprep.subr.bf16.mxu0 %v4378_v33  ;;  %1457 = vmatprep.subr.bf16.mxu1 %v4381_v60 }
 0x20d   : > { %1417 = vmatpush2.bf16.msra.mxu0 %v4384_v57  ;;  %1458 = vmatpush2.bf16.msra.mxu1 %v4388_v59 }
 0x20e   : > { %1418 = vmatprep.subr.bf16.mxu0 %v4390_v5  ;;  %1459 = vmatprep.subr.bf16.mxu1 %v4393_v18 }
 0x211   : > { %1419 = vmatpush2.bf16.msra.mxu0 %v4396_v17  ;;  %1460 = vmatpush2.bf16.msra.mxu1 %v4400_v14 }
 0x212   : > { %1545 = vmatprep.subr.bf16.mxu0 %v4007_v4  ;;  %1586 = vmatprep.subr.bf16.mxu1 %v4011_v9 }
 0x214   : > { %1421 = vmatmul.mubr.bf16.vlgmr.msra.gmra.mxu0 %v4518_v1  ;;  %1462 = vmatmul.mubr.bf16.vlgmr.msra.gmra.mxu1 %v4518_v1  ;;  %v6154_v1 = vld [vmem:[#allocation51_spill] sm:$0xff] }
 0x215   : > { %1546 = vmatpush1.bf16.msra.mxu0 %v4009_v6  ;;  %1587 = vmatpush1.bf16.msra.mxu1 %v4013_v10 }
 0x216   : > { %1547 = vmatprep.subr.bf16.mxu0 %v4015_v11  ;;  %1588 = vmatprep.subr.bf16.mxu1 %v4018_v15 }
 0x219   : > { %1548 = vmatpush1.bf16.msra.mxu0 %v4022_v19  ;;  %1589 = vmatpush1.bf16.msra.mxu1 %v4026_v20 }
 0x21a   : > { %1549 = vmatprep.subr.bf16.mxu0 %v4028_v21  ;;  %1590 = vmatprep.subr.bf16.mxu1 %v4031_v22 }
 0x21d   : > { %1550 = vmatpush1.bf16.msra.mxu0 %v4034_v27  ;;  %1591 = vmatpush1.bf16.msra.mxu1 %v4038_v28 }
 0x21e   : > { %1551 = vmatprep.subr.bf16.mxu0 %v4040_v29  ;;  %1592 = vmatprep.subr.bf16.mxu1 %v4043_v30  ;;  %v3362_v30 = vld [vmem:[%s3995_s8 + $0x8] sm:$0xff] }
 0x221   : > { %1552 = vmatpush1.bf16.msra.mxu0 %v4046_v35  ;;  %1593 = vmatpush1.bf16.msra.mxu1 %v4050_v36 }
 0x222   : > { %1553 = vmatprep.subr.bf16.mxu0 %v4052_v37  ;;  %1594 = vmatprep.subr.bf16.mxu1 %v4055_v38 }
 0x225   : > { %1554 = vmatpush1.bf16.msra.mxu0 %v4058_v43  ;;  %1595 = vmatpush1.bf16.msra.mxu1 %v4062_v44  ;;  %v6155_v44 = vld [vmem:[#allocation52_spill] sm:$0xff] }
 0x226   : > { %1555 = vmatprep.subr.bf16.mxu0 %v4064_v45  ;;  %1596 = vmatprep.subr.bf16.mxu1 %v4067_v46  ;;  %v6156_v45 = vld [vmem:[#allocation53_spill] sm:$0xff]  ;;  %v6157_v46 = vld [vmem:[#allocation54_spill] sm:$0xff] }
 0x229   : > { %1556 = vmatpush1.bf16.msra.mxu0 %v4070_v51  ;;  %1597 = vmatpush1.bf16.msra.mxu1 %v4074_v52  ;;  %v6158_v51 = vld [vmem:[#allocation55_spill] sm:$0xff]  ;;  %v6159_v52 = vld [vmem:[#allocation56_spill] sm:$0xff] }
 0x22a   : > { %1557 = vmatprep.subr.bf16.mxu0 %v4076_v53  ;;  %1598 = vmatprep.subr.bf16.mxu1 %v4081_v55  ;;  %v6160_v53 = vld [vmem:[#allocation57_spill] sm:$0xff]  ;;  %v6161_v55 = vld [vmem:[#allocation58_spill] sm:$0xff] }
 0x22d   : > { %1558 = vmatpush1.bf16.msra.mxu0 %v4088_v61  ;;  %1599 = vmatpush1.bf16.msra.mxu1 %v4093_v62  ;;  %v6162_v61 = vld [vmem:[#allocation59_spill] sm:$0xff]  ;;  %v6163_v62 = vld [vmem:[#allocation60_spill] sm:$0xff] }
 0x22e   : > { %1559 = vmatprep.subr.bf16.mxu0 %v4095_v63  ;;  %1600 = vmatprep.subr.bf16.mxu1 %v6154_v1  ;;  %v6164_v63 = vld [vmem:[#allocation61_spill] sm:$0xff]  ;;  %v6165_v1 = vld [vmem:[#allocation62_spill] sm:$0xff] }
 0x231   : > { %1560 = vmatpush1.bf16.msra.mxu0 %v6155_v44  ;;  %1601 = vmatpush1.bf16.msra.mxu1 %v6156_v45  ;;  %v6166_v44 = vld [vmem:[#allocation63_spill] sm:$0xff]  ;;  %v6167_v45 = vld [vmem:[#allocation64_spill] sm:$0xff] }
 0x232   : > { %1561 = vmatprep.subr.bf16.mxu0 %v6157_v46  ;;  %1602 = vmatprep.subr.bf16.mxu1 %v6158_v51  ;;  %v6168_v46 = vld [vmem:[#allocation65_spill] sm:$0xff]  ;;  %v6169_v51 = vld [vmem:[#allocation66_spill] sm:$0xff] }
 0x235   : > { %1562 = vmatpush2.bf16.msra.mxu0 %v6159_v52  ;;  %1603 = vmatpush2.bf16.msra.mxu1 %v6160_v53  ;;  %v6170_v52 = vld [vmem:[#allocation67_spill] sm:$0xff]  ;;  %v6171_v53 = vld [vmem:[#allocation68_spill] sm:$0xff] }
 0x236   : > { %1563 = vmatprep.subr.bf16.mxu0 %v6161_v55  ;;  %1604 = vmatprep.subr.bf16.mxu1 %v6162_v61  ;;  %v6172_v55 = vld [vmem:[#allocation69_spill] sm:$0xff]  ;;  %v6173_v61 = vld [vmem:[#allocation70_spill] sm:$0xff] }
 0x239   : > { %1564 = vmatpush2.bf16.msra.mxu0 %v6163_v62  ;;  %1605 = vmatpush2.bf16.msra.mxu1 %v6164_v63  ;;  %v6174_v62 = vld [vmem:[#allocation71_spill] sm:$0xff]  ;;  %v6175_v63 = vld [vmem:[#allocation72_spill] sm:$0xff] }
 0x23a   : > { %1565 = vmatprep.subr.bf16.mxu0 %v6165_v1  ;;  %1606 = vmatprep.subr.bf16.mxu1 %v6166_v44  ;;  %v6176_v1 = vld [vmem:[#allocation73_spill] sm:$0xff]  ;;  %v6177_v44 = vld [vmem:[#allocation74_spill] sm:$0xff] }
 0x23d   : > { %1566 = vmatpush2.bf16.msra.mxu0 %v6167_v45  ;;  %1607 = vmatpush2.bf16.msra.mxu1 %v6168_v46  ;;  %v6178_v45 = vld [vmem:[#allocation75_spill] sm:$0xff]  ;;  %v6179_v46 = vld [vmem:[#allocation76_spill] sm:$0xff] }
 0x23e   : > { %1567 = vmatprep.subr.bf16.mxu0 %v6169_v51  ;;  %1608 = vmatprep.subr.bf16.mxu1 %v6170_v52  ;;  %v6180_v51 = vld [vmem:[#allocation77_spill] sm:$0xff]  ;;  %v6181_v52 = vld [vmem:[#allocation78_spill] sm:$0xff] }
 0x241   : > { %1568 = vmatpush2.bf16.msra.mxu0 %v6171_v53  ;;  %1609 = vmatpush2.bf16.msra.mxu1 %v6172_v55  ;;  %v6182_v53 = vld [vmem:[#allocation79_spill] sm:$0xff]  ;;  %v6183_v55 = vld [vmem:[#allocation80_spill] sm:$0xff] }
 0x242   : > { %1569 = vmatprep.subr.bf16.mxu0 %v6173_v61  ;;  %1610 = vmatprep.subr.bf16.mxu1 %v6174_v62  ;;  %v6184_v61 = vld [vmem:[#allocation81_spill] sm:$0xff]  ;;  %v6185_v62 = vld [vmem:[#allocation82_spill] sm:$0xff] }
 0x245   : > { %1570 = vmatpush2.bf16.msra.mxu0 %v6175_v63  ;;  %1611 = vmatpush2.bf16.msra.mxu1 %v6176_v1  ;;  %v6186_v63 = vld [vmem:[#allocation83_spill] sm:$0xff]  ;;  %v6187_v1 = vld [vmem:[#allocation84_spill] sm:$0xff] }
 0x246   : > { %1571 = vmatprep.subr.bf16.mxu0 %v6177_v44  ;;  %1612 = vmatprep.subr.bf16.mxu1 %v6178_v45  ;;  %v6188_v44 = vld [vmem:[#allocation85_spill] sm:$0xff]  ;;  %v6189_v45 = vld [vmem:[#allocation86_spill] sm:$0xff] }
 0x249   : > { %1572 = vmatpush2.bf16.msra.mxu0 %v6179_v46  ;;  %1613 = vmatpush2.bf16.msra.mxu1 %v6180_v51  ;;  %v6190_v51 = vld [vmem:[#allocation87_spill] sm:$0xff] }
 0x24a   : > { %1573 = vmatprep.subr.bf16.mxu0 %v6181_v52  ;;  %1614 = vmatprep.subr.bf16.mxu1 %v6182_v53 }
 0x24d   : > { %1574 = vmatpush2.bf16.msra.mxu0 %v6183_v55  ;;  %1615 = vmatpush2.bf16.msra.mxu1 %v6184_v61 }
 0x24e   : > { %1575 = vmatprep.subr.bf16.mxu0 %v6185_v62  ;;  %1616 = vmatprep.subr.bf16.mxu1 %v6186_v63  ;;  %v6191_v63 = vld [vmem:[#allocation150_spill] sm:$0xff] }
 0x251   : > { %1576 = vmatpush2.bf16.msra.mxu0 %v6187_v1  ;;  %1617 = vmatpush2.bf16.msra.mxu1 %v6188_v44 }
 0x252   : > { %1627 = vmatprep.subr.bf16.mxu0 %v6189_v45  ;;  %1668 = vmatprep.subr.bf16.mxu1 %v6190_v51 }
 0x294   : > { %v1340_v52 = vpop.f32.mrf.mxu0  ;;  %v1381_v46 = vpop.f32.mrf.mxu1 }
 0x296   : > { %v1342_v53 = vpop.f32.mrf.mxu0  ;;  %v1383_v43 = vpop.f32.mrf.mxu1 }
 0x297   : > { %v1499_v62 = vcombine.low %v1340_v52, %v1342_v53  ;;  %v1500_v36 = vcombine.low %v1381_v46, %v1383_v43  ;;  %v6193_v46 = vld [vmem:[#allocation152_spill] sm:$0xff] }
 0x298   : > { %v1344_v55 = vpop.f32.mrf.mxu0  ;;  %v1385_v38 = vpop.f32.mrf.mxu1 }
 0x299   : > { %v1507_v35 = vrot.slane %v1499_v62, %v6191_v63  ;;  %v1514_v1 = vrot.slane %v1500_v36, %v6191_v63  ;;  %v6192_v55 = vld [vmem:[#allocation151_spill] sm:$0xff] }
 0x29a   : > { %v1345_v61 = vpop.f32.mrf.mxu0  ;;  %v1386_v37 = vpop.f32.mrf.mxu1 }
 0x29b   : > { %v1515_v44 = vcombine.low %v1507_v35, %v1514_v1 }
 0x29d   : > { %v1517_v29 = vadd.f32 %v3362_v30, %v1515_v44 }
 0x29f   : > { %v1523_v45 = vrot.slane %v1517_v29, 2  ;;  %v1518_v51 = vmul.f32 0.5, %v1517_v29  ;;  %v1529_v61 = vrot.slane %v1517_v29, 4 }
 0x2a1   : > { %v1525_v28 = vmul.f32 0.5, %v1523_v45 }
 0x2a3   : > { %3489 = vtanh.f32 %v1525_v28 }
 0x2a4   : > { %3491 = vtanh.f32 %v1518_v51 }
 0x2b0   : > { %v3490_v45 = vpop.eup %3489 }
 0x2b1   : > { %v3492_v51 = vpop.eup %3491  ;;  %v1527_v1 = vmul.f32 0.5, %v3490_v45 }
 0x2b3   : > { %v1528_v63 = vadd.f32 0.5, %v1527_v1 }
 0x2d4   : > { %v1422_v27 = vpop.f32.mrf.mxu0  ;;  %v1463_v22 = vpop.f32.mrf.mxu1 }
 0x2d5   : > { %v1470_v38 = vadd.f32 %v1422_v27, %v6192_v55  ;;  %v1472_v28 = vadd.f32 %v1463_v22, %v4483_v56  ;;  %v1520_v27 = vmul.f32 0.5, %v3492_v51  ;;  %v1532_v55 = vrot.slane %v1517_v29, 6 }
 0x2d6   : > { %v1424_v37 = vpop.f32.mrf.mxu0  ;;  %v1465_v52 = vpop.f32.mrf.mxu1 }
 0x2d7   : > { %v1474_v43 = vmul.f32 0.5, %v1470_v38  ;;  %v1471_v53 = vadd.f32 %v1424_v37, %v6193_v46  ;;  %v1473_v38 = vadd.f32 %v1465_v52, %v4487_v49  ;;  %v1521_v37 = vadd.f32 0.5, %v1520_v27 }
 0x2d8   : > { %v1426_v62 = vpop.f32.mrf.mxu0  ;;  %v1467_v36 = vpop.f32.mrf.mxu1 }
 0x2d9   : > { %3493 = vtanh.f32 %v1474_v43  ;;  %v1478_v35 = vmul.f32 0.5, %v1471_v53  ;;  %v1534_v62 = vmul.f32 0.5, %v1532_v55  ;;  %v1483_v36 = vmul.f32 0.5, %v1473_v38 }
 0x2da   : > { %3495 = vtanh.f32 %v1529_v61  ;;  %v1427_v30 = vpop.f32.mrf.mxu0  ;;  %v1468_v44 = vpop.f32.mrf.mxu1  ;;  %v1538_v61 = vmul.f32 %v1528_v63, %v4494_v42  ;;  %v6194_v55 = vsel %vm4497_vm0, %v4492_v23, %v4501_v50  ;;  %v6195_v23 = vsel %vm4497_vm0, 0.0, %v4509_v48  ;;  %v6197_v48 = vld [vmem:[#allocation92_spill] sm:$0xff] }
 0x2db   : > { %3497 = vtanh.f32 %v1478_v35 }
 0x2dc   : > { %3499 = vtanh.f32 %v1472_v28 }
 0x2dd   : > { %3501 = vtanh.f32 %v1534_v62 }
 0x2de   : > { %3503 = vtanh.f32 %v1483_v36 }
 0x2e6   : > { %v3494_v43 = vpop.eup %3493 }
 0x2e7   : > { %v3496_v53 = vpop.eup %3495  ;;  %v1476_v30 = vmul.f32 0.5, %v3494_v43 }
 0x2e8   : > { %v3498_v44 = vpop.eup %3497  ;;  %v1539_v46 = vmul.f32 %v3496_v53, %v1521_v37  ;;  %v419_v37 = vld [vmem:[#allocation6] sm:$0x3] }
 0x2e9   : > { %v1477_v22 = vadd.f32 0.5, %v1476_v30  ;;  %v1480_v35 = vmul.f32 0.5, %v3498_v44  ;;  %v3500_v28 = vpop.eup %3499  ;;  %v1254_v50 = vadd.f32 %v6195_v23, %v419_v37  ;;  %v6209_v37 = vld [vmem:[#allocation104_spill] sm:$0xff]  ;;  %v6214_v23 = vld [vmem:[#allocation109_spill] sm:$0xff] }
 0x2ea   : > { %v4660_v45 = vadd.f32 %v1539_v46, %v1538_v61  ;;  %v3502_v42 = vpop.eup %3501 }
 0x2eb   : > { %v1481_v29 = vadd.f32 0.5, %v1480_v35  ;;  %v1488_v51 = vmul.f32 %v3500_v28, %v1477_v22  ;;  %v3504_v1 = vpop.eup %3503  ;;  %v1536_v27 = vmul.f32 0.5, %v3502_v42  ;;  %v6198_v35 = vld [vmem:[#allocation93_spill] sm:$0xff]  ;;  %v6200_v28 = vld [vmem:[#allocation95_spill] sm:$0xff] }
 0x2ec   : > { %3505 = vtanh.f32 %v4660_v45  ;;  %v1485_v46 = vmul.f32 0.5, %v3504_v1  ;;  %v6204_v42 = vld [vmem:[#allocation99_spill] sm:$0xff]  ;;  %v6205_v1 = vld [vmem:[#allocation100_spill] sm:$0xff] }
 0x2ed   : > { %v1487_v52 = vmul.f32 %v1481_v29, %v6194_v55  ;;  %v1537_v62 = vadd.f32 0.5, %v1536_v27  ;;  %v6199_v29 = vld [vmem:[#allocation94_spill] sm:$0xff]  ;;  %v6201_v55 = vld [vmem:[#allocation96_spill] sm:$0xff]  ;;  %v6206_v27 = vld [vmem:[#allocation101_spill] sm:$0xff] }
 0x2ee   : > { %v1486_v36 = vadd.f32 0.5, %v1485_v46  ;;  %v6207_v46 = vld [vmem:[#allocation102_spill] sm:$0xff] }
 0x2ef   : > { %v4668_v63 = vadd.f32 %v1488_v51, %v1487_v52  ;;  %v6202_v52 = vld [vmem:[#allocation97_spill] sm:$0xff]  ;;  %v6203_v51 = vld [vmem:[#allocation98_spill] sm:$0xff] }
 0x2f1   : > { %3507 = vtanh.f32 %v4668_v63 }
 0x2f9   : > { %v3506_v38 = vpop.eup %3505 }
 0x2fa   : > { %v1542_v61 = vmul.f32 %v3506_v38, %v1537_v62  ;;  %v6208_v38 = vld [vmem:[#allocation103_spill] sm:$0xff]  ;;  %v6210_v62 = vld [vmem:[#allocation105_spill] sm:$0xff] }
 0x2fc   : > { %v4677_v22 = vpack.c.bf16 %v1542_v61, %v1542_v61  ;;  %v6213_v61 = vld [vmem:[#allocation108_spill] sm:$0xff] }
 0x2fe   : > { %v3508_v43 = vpop.eup %3507 }
 0x2ff   : > { %v1491_v53 = vmul.f32 %v3508_v43, %v1486_v36  ;;  %v6211_v36 = vld [vmem:[#allocation106_spill] sm:$0xff]  ;;  %v6212_v43 = vld [vmem:[#allocation107_spill] sm:$0xff] }
 0x301   : > { %v4675_v30 = vadd.f32 %v1491_v53, %v1254_v50  ;;  %v1544_v44 = vpack.c.bf16 %v1491_v53, %v1491_v53  ;;  %v6215_v50 = vld [vmem:[#allocation110_spill] sm:$0xff]  ;;  %v6216_v53 = vld [vmem:[#allocation111_spill] sm:$0xff] }
 0x303   : > { %1577 = vmatprep.mubr.bf16.mxu0 %v1544_v44  ;;  %1618 = vmatprep.mubr.bf16.mxu1 %v1544_v44 }
 0x304   : > { %1578 = vmatmul.mubr.bf16.vlgmr.msra.gmra.mxu0 %v4677_v22  ;;  %1619 = vmatmul.mubr.bf16.vlgmr.msra.gmra.mxu1 %v4677_v22 }
 0x305   : > { %1628 = vmatpush1.bf16.msra.mxu0 %v6105_v24  ;;  %1669 = vmatpush1.bf16.msra.mxu1 %v6106_v26 }
 0x306   : > { %1659 = vmatprep.mubr.bf16.mxu0 %v1544_v44  ;;  %1700 = vmatprep.mubr.bf16.mxu1 %v1544_v44  ;;  %v6217_v44 = vld [vmem:[#allocation112_spill] sm:$0xff] }
 0x307   : > { %1629 = vmatprep.subr.bf16.mxu0 %v6107_v8  ;;  %1670 = vmatprep.subr.bf16.mxu1 %v6196_v34 }
 0x309   : > { %1630 = vmatpush1.bf16.msra.mxu0 %v6197_v48  ;;  %1671 = vmatpush1.bf16.msra.mxu1 %v6198_v35 }
 0x30a   : > { %1631 = vmatprep.subr.bf16.mxu0 %v6199_v29  ;;  %1672 = vmatprep.subr.bf16.mxu1 %v6200_v28 }
 0x30d   : > { %1632 = vmatpush1.bf16.msra.mxu0 %v6201_v55  ;;  %1673 = vmatpush1.bf16.msra.mxu1 %v6202_v52 }
 0x30e   : > { %1633 = vmatprep.subr.bf16.mxu0 %v6203_v51  ;;  %1674 = vmatprep.subr.bf16.mxu1 %v6204_v42 }
 0x311   : > { %1634 = vmatpush1.bf16.msra.mxu0 %v6205_v1  ;;  %1675 = vmatpush1.bf16.msra.mxu1 %v6206_v27 }
 0x312   : > { %1635 = vmatprep.subr.bf16.mxu0 %v6207_v46  ;;  %1676 = vmatprep.subr.bf16.mxu1 %v6208_v38  ;;  %v6218_v46 = vld [vmem:[#allocation113_spill] sm:$0xff]  ;;  %v6219_v38 = vld [vmem:[#allocation114_spill] sm:$0xff] }
 0x315   : > { %1636 = vmatpush1.bf16.msra.mxu0 %v6209_v37  ;;  %1677 = vmatpush1.bf16.msra.mxu1 %v6210_v62  ;;  %v6220_v37 = vld [vmem:[#allocation115_spill] sm:$0xff]  ;;  %v6221_v62 = vld [vmem:[#allocation116_spill] sm:$0xff] }
 0x316   : > { %1637 = vmatprep.subr.bf16.mxu0 %v6211_v36  ;;  %1678 = vmatprep.subr.bf16.mxu1 %v6212_v43  ;;  %v6222_v36 = vld [vmem:[#allocation117_spill] sm:$0xff]  ;;  %v6223_v43 = vld [vmem:[#allocation118_spill] sm:$0xff] }
 0x319   : > { %1638 = vmatpush1.bf16.msra.mxu0 %v6213_v61  ;;  %1679 = vmatpush1.bf16.msra.mxu1 %v6214_v23  ;;  %v6224_v61 = vld [vmem:[#allocation119_spill] sm:$0xff]  ;;  %v6225_v23 = vld [vmem:[#allocation120_spill] sm:$0xff] }
 0x31a   : > { %1639 = vmatprep.subr.bf16.mxu0 %v6215_v50  ;;  %1680 = vmatprep.subr.bf16.mxu1 %v6216_v53  ;;  %v6226_v50 = vld [vmem:[#allocation121_spill] sm:$0xff]  ;;  %v6227_v53 = vld [vmem:[#allocation122_spill] sm:$0xff] }
 0x31d   : > { %1640 = vmatpush1.bf16.msra.mxu0 %v6217_v44  ;;  %1681 = vmatpush1.bf16.msra.mxu1 %v6218_v46  ;;  %v6228_v44 = vld [vmem:[#allocation123_spill] sm:$0xff]  ;;  %v6229_v46 = vld [vmem:[#allocation124_spill] sm:$0xff] }
 0x31e   : > { %1641 = vmatprep.subr.bf16.mxu0 %v6219_v38  ;;  %1682 = vmatprep.subr.bf16.mxu1 %v6220_v37 }
 0x321   : > { %1642 = vmatpush1.bf16.msra.mxu0 %v6221_v62  ;;  %1683 = vmatpush1.bf16.msra.mxu1 %v6222_v36  ;;  %v6230_v36 = vld [vmem:[#allocation128_spill] sm:$0xff] }
 0x322   : > { %1643 = vmatprep.subr.bf16.mxu0 %v6223_v43  ;;  %1684 = vmatprep.subr.bf16.mxu1 %v6224_v61 }
 0x325   : > { %1644 = vmatpush2.bf16.msra.mxu0 %v6225_v23  ;;  %1685 = vmatpush2.bf16.msra.mxu1 %v6226_v50 }
 0x326   : > { %1645 = vmatprep.subr.bf16.mxu0 %v6227_v53  ;;  %1686 = vmatprep.subr.bf16.mxu1 %v6228_v44 }
 0x329   : > { %1646 = vmatpush2.bf16.msra.mxu0 %v6229_v46  ;;  %1687 = vmatpush2.bf16.msra.mxu1 %v6142_v47 }
 0x32a   : > { %1647 = vmatprep.subr.bf16.mxu0 %v6143_v16  ;;  %1688 = vmatprep.subr.bf16.mxu1 %v6144_v39 }
 0x32d   : > { %1648 = vmatpush2.bf16.msra.mxu0 %v6230_v36  ;;  %1689 = vmatpush2.bf16.msra.mxu1 %v6146_v40 }
 0x32e   : > { %1649 = vmatprep.subr.bf16.mxu0 %v6147_v58  ;;  %1690 = vmatprep.subr.bf16.mxu1 %v6148_v41 }
 0x331   : > { %1650 = vmatpush2.bf16.msra.mxu0 %v6149_v7  ;;  %1691 = vmatpush2.bf16.msra.mxu1 %v6150_v12 }
 0x332   : > { %1651 = vmatprep.subr.bf16.mxu0 %v6151_v13  ;;  %1692 = vmatprep.subr.bf16.mxu1 %v6152_v25 }
 0x335   : > { %1652 = vmatpush2.bf16.msra.mxu0 %v4360_v3  ;;  %1693 = vmatpush2.bf16.msra.mxu1 %v4364_v31 }
 0x336   : > { %1653 = vmatprep.subr.bf16.mxu0 %v4366_v2  ;;  %1694 = vmatprep.subr.bf16.mxu1 %v6153_v0 }
 0x339   : > { %1654 = vmatpush2.bf16.msra.mxu0 %v4372_v32  ;;  %1695 = vmatpush2.bf16.msra.mxu1 %v4376_v54 }
 0x33a   : > { %1655 = vmatprep.subr.bf16.mxu0 %v4378_v33  ;;  %1696 = vmatprep.subr.bf16.mxu1 %v4381_v60  ;;  %v3363_v60 = vld [vmem:[%s3995_s8 + $0x10] sm:$0xff] }
 0x33d   : > { %1656 = vmatpush2.bf16.msra.mxu0 %v4384_v57  ;;  %1697 = vmatpush2.bf16.msra.mxu1 %v4388_v59 }
 0x33e   : > { %1657 = vmatprep.subr.bf16.mxu0 %v4390_v5  ;;  %1698 = vmatprep.subr.bf16.mxu1 %v4393_v18 }
 0x341   : > { %1658 = vmatpush2.bf16.msra.mxu0 %v4396_v17  ;;  %1699 = vmatpush2.bf16.msra.mxu1 %v4400_v14  ;;  %v6233_v14 = vld [vmem:[#allocation32_spill] sm:$0xff] }
 0x342   : > { %1784 = vmatprep.subr.bf16.mxu0 %v4007_v4  ;;  %1825 = vmatprep.subr.bf16.mxu1 %v4011_v9  ;;  %v6231_v4 = vld [vmem:[#allocation30_spill] sm:$0xff]  ;;  %v6232_v9 = vld [vmem:[#allocation31_spill] sm:$0xff] }
 0x344   : > { %1660 = vmatmul.mubr.bf16.vlgmr.msra.gmra.mxu0 %v4677_v22  ;;  %1701 = vmatmul.mubr.bf16.vlgmr.msra.gmra.mxu1 %v4677_v22  ;;  %v6234_v22 = vld [vmem:[#allocation33_spill] sm:$0xff] }
 0x345   : > { %1785 = vmatpush1.bf16.msra.mxu0 %v4009_v6  ;;  %1826 = vmatpush1.bf16.msra.mxu1 %v4013_v10  ;;  %v6235_v6 = vld [vmem:[#allocation34_spill] sm:$0xff]  ;;  %v6236_v10 = vld [vmem:[#allocation35_spill] sm:$0xff] }
 0x346   : > { %1786 = vmatprep.subr.bf16.mxu0 %v4015_v11  ;;  %1827 = vmatprep.subr.bf16.mxu1 %v4018_v15  ;;  %v6237_v11 = vld [vmem:[#allocation36_spill] sm:$0xff]  ;;  %v6238_v15 = vld [vmem:[#allocation37_spill] sm:$0xff] }
 0x349   : > { %1787 = vmatpush1.bf16.msra.mxu0 %v4022_v19  ;;  %1828 = vmatpush1.bf16.msra.mxu1 %v4026_v20  ;;  %v6239_v19 = vld [vmem:[#allocation38_spill] sm:$0xff]  ;;  %v6240_v20 = vld [vmem:[#allocation39_spill] sm:$0xff] }
 0x34a   : > { %1788 = vmatprep.subr.bf16.mxu0 %v4028_v21  ;;  %1829 = vmatprep.subr.bf16.mxu1 %v6231_v4  ;;  %v6241_v21 = vld [vmem:[#allocation40_spill] sm:$0xff]  ;;  %v6242_v4 = vld [vmem:[#allocation41_spill] sm:$0xff] }
 0x34d   : > { %1789 = vmatpush1.bf16.msra.mxu0 %v6232_v9  ;;  %1830 = vmatpush1.bf16.msra.mxu1 %v6233_v14  ;;  %v6243_v9 = vld [vmem:[#allocation42_spill] sm:$0xff]  ;;  %v6244_v14 = vld [vmem:[#allocation43_spill] sm:$0xff] }
 0x34e   : > { %1790 = vmatprep.subr.bf16.mxu0 %v6234_v22  ;;  %1831 = vmatprep.subr.bf16.mxu1 %v6235_v6  ;;  %v6245_v22 = vld [vmem:[#allocation44_spill] sm:$0xff]  ;;  %v6246_v6 = vld [vmem:[#allocation45_spill] sm:$0xff] }
 0x351   : > { %1791 = vmatpush1.bf16.msra.mxu0 %v6236_v10  ;;  %1832 = vmatpush1.bf16.msra.mxu1 %v6237_v11  ;;  %v6247_v10 = vld [vmem:[#allocation47_spill] sm:$0xff]  ;;  %v6248_v11 = vld [vmem:[#allocation48_spill] sm:$0xff] }
 0x352   : > { %1792 = vmatprep.subr.bf16.mxu0 %v6238_v15  ;;  %1833 = vmatprep.subr.bf16.mxu1 %v6239_v19  ;;  %v6249_v15 = vld [vmem:[#allocation49_spill] sm:$0xff]  ;;  %v6250_v19 = vld [vmem:[#allocation50_spill] sm:$0xff] }
 0x355   : > { %1793 = vmatpush1.bf16.msra.mxu0 %v6240_v20  ;;  %1834 = vmatpush1.bf16.msra.mxu1 %v6241_v21  ;;  %v6251_v20 = vld [vmem:[#allocation51_spill] sm:$0xff]  ;;  %v6252_v21 = vld [vmem:[#allocation52_spill] sm:$0xff] }
 0x356   : > { %1794 = vmatprep.subr.bf16.mxu0 %v6242_v4  ;;  %1835 = vmatprep.subr.bf16.mxu1 %v6243_v9  ;;  %v6253_v4 = vld [vmem:[#allocation53_spill] sm:$0xff]  ;;  %v6254_v9 = vld [vmem:[#allocation54_spill] sm:$0xff] }
 0x359   : > { %1795 = vmatpush1.bf16.msra.mxu0 %v6244_v14  ;;  %1836 = vmatpush1.bf16.msra.mxu1 %v6245_v22  ;;  %v6255_v14 = vld [vmem:[#allocation55_spill] sm:$0xff]  ;;  %v6256_v22 = vld [vmem:[#allocation56_spill] sm:$0xff] }
 0x35a   : > { %1796 = vmatprep.subr.bf16.mxu0 %v6246_v6  ;;  %1837 = vmatprep.subr.bf16.mxu1 %v6247_v10  ;;  %v6257_v6 = vld [vmem:[#allocation57_spill] sm:$0xff]  ;;  %v6258_v10 = vld [vmem:[#allocation58_spill] sm:$0xff] }
 0x35d   : > { %1797 = vmatpush1.bf16.msra.mxu0 %v6248_v11  ;;  %1838 = vmatpush1.bf16.msra.mxu1 %v6249_v15  ;;  %v6259_v11 = vld [vmem:[#allocation59_spill] sm:$0xff]  ;;  %v6260_v15 = vld [vmem:[#allocation60_spill] sm:$0xff] }
 0x35e   : > { %1798 = vmatprep.subr.bf16.mxu0 %v6250_v19  ;;  %1839 = vmatprep.subr.bf16.mxu1 %v6251_v20  ;;  %v6261_v19 = vld [vmem:[#allocation61_spill] sm:$0xff]  ;;  %v6262_v20 = vld [vmem:[#allocation62_spill] sm:$0xff] }
 0x361   : > { %1799 = vmatpush1.bf16.msra.mxu0 %v6252_v21  ;;  %1840 = vmatpush1.bf16.msra.mxu1 %v6253_v4  ;;  %v6263_v21 = vld [vmem:[#allocation63_spill] sm:$0xff]  ;;  %v6264_v4 = vld [vmem:[#allocation64_spill] sm:$0xff] }
 0x362   : > { %1800 = vmatprep.subr.bf16.mxu0 %v6254_v9  ;;  %1841 = vmatprep.subr.bf16.mxu1 %v6255_v14  ;;  %v6265_v9 = vld [vmem:[#allocation65_spill] sm:$0xff]  ;;  %v6266_v14 = vld [vmem:[#allocation66_spill] sm:$0xff] }
 0x365   : > { %1801 = vmatpush2.bf16.msra.mxu0 %v6256_v22  ;;  %1842 = vmatpush2.bf16.msra.mxu1 %v6257_v6  ;;  %v6267_v22 = vld [vmem:[#allocation67_spill] sm:$0xff]  ;;  %v6268_v6 = vld [vmem:[#allocation68_spill] sm:$0xff] }
 0x366   : > { %1802 = vmatprep.subr.bf16.mxu0 %v6258_v10  ;;  %1843 = vmatprep.subr.bf16.mxu1 %v6259_v11  ;;  %v6269_v10 = vld [vmem:[#allocation69_spill] sm:$0xff]  ;;  %v6270_v11 = vld [vmem:[#allocation70_spill] sm:$0xff] }
 0x369   : > { %1803 = vmatpush2.bf16.msra.mxu0 %v6260_v15  ;;  %1844 = vmatpush2.bf16.msra.mxu1 %v6261_v19  ;;  %v6271_v15 = vld [vmem:[#allocation71_spill] sm:$0xff]  ;;  %v6272_v19 = vld [vmem:[#allocation72_spill] sm:$0xff] }
 0x36a   : > { %1804 = vmatprep.subr.bf16.mxu0 %v6262_v20  ;;  %1845 = vmatprep.subr.bf16.mxu1 %v6263_v21  ;;  %v6273_v20 = vld [vmem:[#allocation73_spill] sm:$0xff]  ;;  %v6274_v21 = vld [vmem:[#allocation74_spill] sm:$0xff] }
 0x36d   : > { %1805 = vmatpush2.bf16.msra.mxu0 %v6264_v4  ;;  %1846 = vmatpush2.bf16.msra.mxu1 %v6265_v9  ;;  %v6275_v4 = vld [vmem:[#allocation75_spill] sm:$0xff]  ;;  %v6276_v9 = vld [vmem:[#allocation76_spill] sm:$0xff] }
 0x36e   : > { %1806 = vmatprep.subr.bf16.mxu0 %v6266_v14  ;;  %1847 = vmatprep.subr.bf16.mxu1 %v6267_v22  ;;  %v6277_v14 = vld [vmem:[#allocation77_spill] sm:$0xff]  ;;  %v6278_v22 = vld [vmem:[#allocation78_spill] sm:$0xff] }
 0x371   : > { %1807 = vmatpush2.bf16.msra.mxu0 %v6268_v6  ;;  %1848 = vmatpush2.bf16.msra.mxu1 %v6269_v10  ;;  %v6279_v6 = vld [vmem:[#allocation79_spill] sm:$0xff]  ;;  %v6280_v10 = vld [vmem:[#allocation80_spill] sm:$0xff] }
 0x372   : > { %1808 = vmatprep.subr.bf16.mxu0 %v6270_v11  ;;  %1849 = vmatprep.subr.bf16.mxu1 %v6271_v15  ;;  %v6281_v11 = vld [vmem:[#allocation81_spill] sm:$0xff]  ;;  %v6282_v15 = vld [vmem:[#allocation82_spill] sm:$0xff] }
 0x375   : > { %1809 = vmatpush2.bf16.msra.mxu0 %v6272_v19  ;;  %1850 = vmatpush2.bf16.msra.mxu1 %v6273_v20  ;;  %v6283_v19 = vld [vmem:[#allocation83_spill] sm:$0xff]  ;;  %v6284_v20 = vld [vmem:[#allocation84_spill] sm:$0xff] }
 0x376   : > { %1810 = vmatprep.subr.bf16.mxu0 %v6274_v21  ;;  %1851 = vmatprep.subr.bf16.mxu1 %v6275_v4  ;;  %v6285_v21 = vld [vmem:[#allocation85_spill] sm:$0xff]  ;;  %v6286_v4 = vld [vmem:[#allocation86_spill] sm:$0xff] }
 0x379   : > { %1811 = vmatpush2.bf16.msra.mxu0 %v6276_v9  ;;  %1852 = vmatpush2.bf16.msra.mxu1 %v6277_v14  ;;  %v6287_v14 = vld [vmem:[#allocation87_spill] sm:$0xff] }
 0x37a   : > { %1812 = vmatprep.subr.bf16.mxu0 %v6278_v22  ;;  %1853 = vmatprep.subr.bf16.mxu1 %v6279_v6 }
 0x37d   : > { %1813 = vmatpush2.bf16.msra.mxu0 %v6280_v10  ;;  %1854 = vmatpush2.bf16.msra.mxu1 %v6281_v11 }
 0x37e   : > { %1814 = vmatprep.subr.bf16.mxu0 %v6282_v15  ;;  %1855 = vmatprep.subr.bf16.mxu1 %v6283_v19  ;;  %v6288_v19 = vld [vmem:[#allocation150_spill] sm:$0xff] }
 0x381   : > { %1815 = vmatpush2.bf16.msra.mxu0 %v6284_v20  ;;  %1856 = vmatpush2.bf16.msra.mxu1 %v6285_v21 }
 0x382   : > { %1866 = vmatprep.subr.bf16.mxu0 %v6286_v4  ;;  %1907 = vmatprep.subr.bf16.mxu1 %v6287_v14 }
 0x3c4   : > { %v1579_v22 = vpop.f32.mrf.mxu0  ;;  %v1620_v9 = vpop.f32.mrf.mxu1 }
 0x3c6   : > { %v1581_v6 = vpop.f32.mrf.mxu0  ;;  %v1622_v17 = vpop.f32.mrf.mxu1 }
 0x3c7   : > { %v1738_v15 = vcombine.low %v1579_v22, %v1581_v6  ;;  %v1739_v59 = vcombine.low %v1620_v9, %v1622_v17  ;;  %v6290_v17 = vld [vmem:[#allocation152_spill] sm:$0xff] }
 0x3c8   : > { %v1583_v10 = vpop.f32.mrf.mxu0  ;;  %v1624_v18 = vpop.f32.mrf.mxu1 }
 0x3c9   : > { %v1746_v57 = vrot.slane %v1738_v15, %v6288_v19  ;;  %v1753_v20 = vrot.slane %v1739_v59, %v6288_v19  ;;  %v6289_v10 = vld [vmem:[#allocation151_spill] sm:$0xff] }
 0x3ca   : > { %v1584_v11 = vpop.f32.mrf.mxu0  ;;  %v1625_v5 = vpop.f32.mrf.mxu1 }
 0x3cb   : > { %v1754_v21 = vcombine.low %v1746_v57, %v1753_v20 }
 0x3cd   : > { %v1756_v33 = vadd.f32 %v3363_v60, %v1754_v21 }
 0x3cf   : > { %v1762_v4 = vrot.slane %v1756_v33, 2  ;;  %v1757_v14 = vmul.f32 0.5, %v1756_v33  ;;  %v1768_v11 = vrot.slane %v1756_v33, 4 }
 0x3d1   : > { %v1764_v54 = vmul.f32 0.5, %v1762_v4 }
 0x3d3   : > { %3509 = vtanh.f32 %v1764_v54 }
 0x3d4   : > { %3511 = vtanh.f32 %v1757_v14 }
 0x3e0   : > { %v3510_v60 = vpop.eup %3509 }
 0x3e1   : > { %v3512_v57 = vpop.eup %3511  ;;  %v1766_v14 = vmul.f32 0.5, %v3510_v60 }
 0x3e3   : > { %v1767_v19 = vadd.f32 0.5, %v1766_v14 }
 0x404   : > { %v1661_v32 = vpop.f32.mrf.mxu0  ;;  %v1702_v0 = vpop.f32.mrf.mxu1 }
 0x405   : > { %v1709_v18 = vadd.f32 %v1661_v32, %v6289_v10  ;;  %v1711_v54 = vadd.f32 %v1702_v0, %v4483_v56  ;;  %v1759_v32 = vmul.f32 0.5, %v3512_v57  ;;  %v1771_v10 = vrot.slane %v1756_v33, 6 }
 0x406   : > { %v1663_v5 = vpop.f32.mrf.mxu0  ;;  %v1704_v6 = vpop.f32.mrf.mxu1 }
 0x407   : > { %v1713_v9 = vmul.f32 0.5, %v1709_v18  ;;  %v1710_v15 = vadd.f32 %v1663_v5, %v6290_v17  ;;  %v1712_v18 = vadd.f32 %v1704_v6, %v4487_v49  ;;  %v1760_v5 = vadd.f32 0.5, %v1759_v32 }
 0x408   : > { %v1665_v22 = vpop.f32.mrf.mxu0  ;;  %v1706_v59 = vpop.f32.mrf.mxu1 }
 0x409   : > { %3513 = vtanh.f32 %v1713_v9  ;;  %v1717_v20 = vmul.f32 0.5, %v1710_v15  ;;  %v1773_v22 = vmul.f32 0.5, %v1771_v10  ;;  %v1722_v59 = vmul.f32 0.5, %v1712_v18 }
 0x40a   : > { %3515 = vtanh.f32 %v1768_v11  ;;  %v1666_v21 = vpop.f32.mrf.mxu0  ;;  %v1707_v4 = vpop.f32.mrf.mxu1  ;;  %v1777_v11 = vmul.f32 %v1767_v19, %v4660_v45 }
 0x40b   : > { %3517 = vtanh.f32 %v1717_v20 }
 0x40c   : > { %3519 = vtanh.f32 %v1711_v54 }
 0x40d   : > { %3521 = vtanh.f32 %v1773_v22 }
 0x40e   : > { %3523 = vtanh.f32 %v1722_v59 }
 0x416   : > { %v3514_v9 = vpop.eup %3513 }
 0x417   : > { %v3516_v15 = vpop.eup %3515  ;;  %v1715_v21 = vmul.f32 0.5, %v3514_v9 }
 0x418   : > { %v3518_v4 = vpop.eup %3517  ;;  %v1778_v17 = vmul.f32 %v3516_v15, %v1760_v5 }
 0x419   : > { %v1716_v0 = vadd.f32 0.5, %v1715_v21  ;;  %v1719_v20 = vmul.f32 0.5, %v3518_v4  ;;  %v3520_v54 = vpop.eup %3519  ;;  %v6292_v21 = vld [vmem:[#allocation103_spill] sm:$0xff]  ;;  %v6293_v4 = vld [vmem:[#allocation104_spill] sm:$0xff] }
 0x41a   : > { %v4819_v60 = vadd.f32 %v1778_v17, %v1777_v11  ;;  %v3522_v19 = vpop.eup %3521 }
 0x41b   : > { %v1720_v33 = vadd.f32 0.5, %v1719_v20  ;;  %v1727_v57 = vmul.f32 %v3520_v54, %v1716_v0  ;;  %v3524_v45 = vpop.eup %3523  ;;  %v1775_v14 = vmul.f32 0.5, %v3522_v19  ;;  %v6294_v0 = vld [vmem:[#allocation105_spill] sm:$0xff]  ;;  %v6295_v20 = vld [vmem:[#allocation106_spill] sm:$0xff]  ;;  %v6297_v54 = vld [vmem:[#allocation108_spill] sm:$0xff] }
 0x41c   : > { %3525 = vtanh.f32 %v4819_v60  ;;  %v1724_v32 = vmul.f32 0.5, %v3524_v45  ;;  %v6300_v19 = vld [vmem:[#allocation111_spill] sm:$0xff]  ;;  %v6301_v45 = vld [vmem:[#allocation112_spill] sm:$0xff] }
 0x41d   : > { %v1726_v6 = vmul.f32 %v1720_v33, %v4668_v63  ;;  %v1776_v5 = vadd.f32 0.5, %v1775_v14  ;;  %v6296_v33 = vld [vmem:[#allocation107_spill] sm:$0xff]  ;;  %v6302_v14 = vld [vmem:[#allocation113_spill] sm:$0xff] }
 0x41e   : > { %v1725_v22 = vadd.f32 0.5, %v1724_v32  ;;  %v6303_v32 = vld [vmem:[#allocation117_spill] sm:$0xff] }
 0x41f   : > { %v4823_v10 = vadd.f32 %v1727_v57, %v1726_v6  ;;  %v6298_v6 = vld [vmem:[#allocation109_spill] sm:$0xff]  ;;  %v6299_v57 = vld [vmem:[#allocation110_spill] sm:$0xff] }
 0x421   : > { %3527 = vtanh.f32 %v4823_v10 }
 0x429   : > { %v3526_v18 = vpop.eup %3525 }
 0x42a   : > { %v1781_v59 = vmul.f32 %v3526_v18, %v1776_v5  ;;  %v6304_v18 = vld [vmem:[#allocation139_spill] sm:$0xff]  ;;  %v6305_v5 = vld [vmem:[#allocation140_spill] sm:$0xff] }
 0x42c   : > { %v4829_v15 = vpack.c.bf16 %v1781_v59, %v1781_v59  ;;  %v6308_v59 = vld [vmem:[#allocation143_spill] sm:$0xff] }
 0x42e   : > { %v3528_v17 = vpop.eup %3527 }
 0x42f   : > { %v1730_v9 = vmul.f32 %v3528_v17, %v1725_v22  ;;  %v6306_v22 = vld [vmem:[#allocation141_spill] sm:$0xff]  ;;  %v6307_v17 = vld [vmem:[#allocation142_spill] sm:$0xff] }
 0x431   : > { %v4827_v11 = vadd.f32 %v1730_v9, %v4675_v30  ;;  %v1783_v63 = vpack.c.bf16 %v1730_v9, %v1730_v9  ;;  %v6291_v30 = vld [vmem:[#allocation102_spill] sm:$0xff]  ;;  %v6309_v9 = vld [vmem:[#allocation144_spill] sm:$0xff] }
 0x433   : > { %1816 = vmatprep.mubr.bf16.mxu0 %v1783_v63  ;;  %1857 = vmatprep.mubr.bf16.mxu1 %v1783_v63 }
 0x434   : > { %1817 = vmatmul.mubr.bf16.vlgmr.msra.gmra.mxu0 %v4829_v15  ;;  %1858 = vmatmul.mubr.bf16.vlgmr.msra.gmra.mxu1 %v4829_v15 }
 0x435   : > { %1867 = vmatpush1.bf16.msra.mxu0 %v6105_v24  ;;  %1908 = vmatpush1.bf16.msra.mxu1 %v6106_v26 }
 0x436   : > { %1898 = vmatprep.mubr.bf16.mxu0 %v1783_v63  ;;  %1939 = vmatprep.mubr.bf16.mxu1 %v1783_v63  ;;  %v6310_v63 = vld [vmem:[#allocation145_spill] sm:$0xff] }
 0x437   : > { %1868 = vmatprep.subr.bf16.mxu0 %v6107_v8  ;;  %1909 = vmatprep.subr.bf16.mxu1 %v6196_v34 }
 0x439   : > { %1869 = vmatpush1.bf16.msra.mxu0 %v6197_v48  ;;  %1910 = vmatpush1.bf16.msra.mxu1 %v6198_v35 }
 0x43a   : > { %1870 = vmatprep.subr.bf16.mxu0 %v6199_v29  ;;  %1911 = vmatprep.subr.bf16.mxu1 %v6200_v28 }
 0x43d   : > { %1871 = vmatpush1.bf16.msra.mxu0 %v6201_v55  ;;  %1912 = vmatpush1.bf16.msra.mxu1 %v6202_v52 }
 0x43e   : > { %1872 = vmatprep.subr.bf16.mxu0 %v6203_v51  ;;  %1913 = vmatprep.subr.bf16.mxu1 %v6204_v42 }
 0x441   : > { %1873 = vmatpush1.bf16.msra.mxu0 %v6205_v1  ;;  %1914 = vmatpush1.bf16.msra.mxu1 %v6206_v27 }
 0x442   : > { %1874 = vmatprep.subr.bf16.mxu0 %v6291_v30  ;;  %1915 = vmatprep.subr.bf16.mxu1 %v6292_v21 }
 0x445   : > { %1875 = vmatpush1.bf16.msra.mxu0 %v6293_v4  ;;  %1916 = vmatpush1.bf16.msra.mxu1 %v6294_v0 }
 0x446   : > { %1876 = vmatprep.subr.bf16.mxu0 %v6295_v20  ;;  %1917 = vmatprep.subr.bf16.mxu1 %v6296_v33 }
 0x449   : > { %1877 = vmatpush1.bf16.msra.mxu0 %v6297_v54  ;;  %1918 = vmatpush1.bf16.msra.mxu1 %v6298_v6 }
 0x44a   : > { %1878 = vmatprep.subr.bf16.mxu0 %v6299_v57  ;;  %1919 = vmatprep.subr.bf16.mxu1 %v6300_v19 }
 0x44d   : > { %1879 = vmatpush1.bf16.msra.mxu0 %v6301_v45  ;;  %1920 = vmatpush1.bf16.msra.mxu1 %v6302_v14 }
 0x44e   : > { %1880 = vmatprep.subr.bf16.mxu0 %v6219_v38  ;;  %1921 = vmatprep.subr.bf16.mxu1 %v6220_v37 }
 0x451   : > { %1881 = vmatpush1.bf16.msra.mxu0 %v6221_v62  ;;  %1922 = vmatpush1.bf16.msra.mxu1 %v6303_v32 }
 0x452   : > { %1882 = vmatprep.subr.bf16.mxu0 %v6223_v43  ;;  %1923 = vmatprep.subr.bf16.mxu1 %v6224_v61 }
 0x455   : > { %1883 = vmatpush2.bf16.msra.mxu0 %v6225_v23  ;;  %1924 = vmatpush2.bf16.msra.mxu1 %v6226_v50 }
 0x456   : > { %1884 = vmatprep.subr.bf16.mxu0 %v6227_v53  ;;  %1925 = vmatprep.subr.bf16.mxu1 %v6228_v44 }
 0x459   : > { %1885 = vmatpush2.bf16.msra.mxu0 %v6229_v46  ;;  %1926 = vmatpush2.bf16.msra.mxu1 %v6142_v47 }
 0x45a   : > { %1886 = vmatprep.subr.bf16.mxu0 %v6143_v16  ;;  %1927 = vmatprep.subr.bf16.mxu1 %v6144_v39 }
 0x45d   : > { %1887 = vmatpush2.bf16.msra.mxu0 %v6230_v36  ;;  %1928 = vmatpush2.bf16.msra.mxu1 %v6146_v40 }
 0x45e   : > { %1888 = vmatprep.subr.bf16.mxu0 %v6147_v58  ;;  %1929 = vmatprep.subr.bf16.mxu1 %v6148_v41  ;;  %v3364_v58 = vld [vmem:[%s3995_s8 + $0x18] sm:$0xff] }
 0x461   : > { %1889 = vmatpush2.bf16.msra.mxu0 %v6149_v7  ;;  %1930 = vmatpush2.bf16.msra.mxu1 %v6150_v12 }
 0x462   : > { %1890 = vmatprep.subr.bf16.mxu0 %v6151_v13  ;;  %1931 = vmatprep.subr.bf16.mxu1 %v6152_v25  ;;  %v6311_v25 = vld [vmem:[#allocation146_spill] sm:$0xff] }
 0x465   : > { %1891 = vmatpush2.bf16.msra.mxu0 %v4360_v3  ;;  %1932 = vmatpush2.bf16.msra.mxu1 %v4364_v31  ;;  %v6312_v3 = vld [vmem:[#allocation147_spill] sm:$0xff]  ;;  %v6313_v31 = vld [vmem:[#allocation148_spill] sm:$0xff] }
 0x466   : > { %1892 = vmatprep.subr.bf16.mxu0 %v4366_v2  ;;  %1933 = vmatprep.subr.bf16.mxu1 %v6304_v18  ;;  %v6314_v2 = vld [vmem:[#allocation149_spill] sm:$0xff] }
 0x467   : > { %v6315_v18 = vld [vmem:[#allocation21_spill] sm:$0xff] }
 0x469   : > { %1893 = vmatpush2.bf16.msra.mxu0 %v6305_v5  ;;  %1934 = vmatpush2.bf16.msra.mxu1 %v6306_v22  ;;  %v6316_v5 = vld [vmem:[#allocation23_spill] sm:$0xff] }
 0x46a   : > { %1894 = vmatprep.subr.bf16.mxu0 %v6307_v17  ;;  %1935 = vmatprep.subr.bf16.mxu1 %v6308_v59  ;;  %v6317_v59 = vld [vmem:[#allocation22_spill] sm:$0xff]  ;;  %v6326_v17 = vld [vmem:[#allocation32_spill] sm:$0xff] }
 0x46d   : > { %1895 = vmatpush2.bf16.msra.mxu0 %v6309_v9  ;;  %1936 = vmatpush2.bf16.msra.mxu1 %v6310_v63  ;;  %v6318_v9 = vld [vmem:[#allocation24_spill] sm:$0xff]  ;;  %v6319_v63 = vld [vmem:[#allocation25_spill] sm:$0xff] }
 0x46e   : > { %1896 = vmatprep.subr.bf16.mxu0 %v6311_v25  ;;  %1937 = vmatprep.subr.bf16.mxu1 %v6312_v3  ;;  %v6320_v25 = vld [vmem:[#allocation26_spill] sm:$0xff]  ;;  %v6321_v3 = vld [vmem:[#allocation27_spill] sm:$0xff] }
 0x471   : > { %1897 = vmatpush2.bf16.msra.mxu0 %v6313_v31  ;;  %1938 = vmatpush2.bf16.msra.mxu1 %v6314_v2  ;;  %v6322_v31 = vld [vmem:[#allocation28_spill] sm:$0xff]  ;;  %v6323_v2 = vld [vmem:[#allocation29_spill] sm:$0xff] }
 0x472   : > { %2023 = vmatprep.subr.bf16.mxu0 %v6315_v18  ;;  %2064 = vmatprep.subr.bf16.mxu1 %v6316_v5  ;;  %v6324_v18 = vld [vmem:[#allocation30_spill] sm:$0xff]  ;;  %v6325_v5 = vld [vmem:[#allocation31_spill] sm:$0xff] }
 0x474   : > { %1899 = vmatmul.mubr.bf16.vlgmr.msra.gmra.mxu0 %v4829_v15  ;;  %1940 = vmatmul.mubr.bf16.vlgmr.msra.gmra.mxu1 %v4829_v15  ;;  %v6327_v15 = vld [vmem:[#allocation33_spill] sm:$0xff] }
 0x475   : > { %2024 = vmatpush1.bf16.msra.mxu0 %v6317_v59  ;;  %2065 = vmatpush1.bf16.msra.mxu1 %v6318_v9  ;;  %v6328_v59 = vld [vmem:[#allocation34_spill] sm:$0xff]  ;;  %v6329_v9 = vld [vmem:[#allocation35_spill] sm:$0xff] }
 0x476   : > { %2025 = vmatprep.subr.bf16.mxu0 %v6319_v63  ;;  %2066 = vmatprep.subr.bf16.mxu1 %v6320_v25  ;;  %v6330_v63 = vld [vmem:[#allocation36_spill] sm:$0xff]  ;;  %v6331_v25 = vld [vmem:[#allocation37_spill] sm:$0xff] }
 0x479   : > { %2026 = vmatpush1.bf16.msra.mxu0 %v6321_v3  ;;  %2067 = vmatpush1.bf16.msra.mxu1 %v6322_v31  ;;  %v6332_v3 = vld [vmem:[#allocation38_spill] sm:$0xff]  ;;  %v6333_v31 = vld [vmem:[#allocation39_spill] sm:$0xff] }
 0x47a   : > { %2027 = vmatprep.subr.bf16.mxu0 %v6323_v2  ;;  %2068 = vmatprep.subr.bf16.mxu1 %v6324_v18  ;;  %v6334_v2 = vld [vmem:[#allocation40_spill] sm:$0xff]  ;;  %v6335_v18 = vld [vmem:[#allocation41_spill] sm:$0xff] }
 0x47d   : > { %2028 = vmatpush1.bf16.msra.mxu0 %v6325_v5  ;;  %2069 = vmatpush1.bf16.msra.mxu1 %v6326_v17  ;;  %v6336_v5 = vld [vmem:[#allocation42_spill] sm:$0xff]  ;;  %v6337_v17 = vld [vmem:[#allocation43_spill] sm:$0xff] }
 0x47e   : > { %2029 = vmatprep.subr.bf16.mxu0 %v6327_v15  ;;  %2070 = vmatprep.subr.bf16.mxu1 %v6328_v59  ;;  %v6338_v15 = vld [vmem:[#allocation44_spill] sm:$0xff]  ;;  %v6339_v59 = vld [vmem:[#allocation45_spill] sm:$0xff] }
 0x481   : > { %2030 = vmatpush1.bf16.msra.mxu0 %v6329_v9  ;;  %2071 = vmatpush1.bf16.msra.mxu1 %v6330_v63  ;;  %v6340_v9 = vld [vmem:[#allocation47_spill] sm:$0xff]  ;;  %v6341_v63 = vld [vmem:[#allocation48_spill] sm:$0xff] }
 0x482   : > { %2031 = vmatprep.subr.bf16.mxu0 %v6331_v25  ;;  %2072 = vmatprep.subr.bf16.mxu1 %v6332_v3  ;;  %v6342_v25 = vld [vmem:[#allocation49_spill] sm:$0xff]  ;;  %v6343_v3 = vld [vmem:[#allocation50_spill] sm:$0xff] }
 0x485   : > { %2032 = vmatpush1.bf16.msra.mxu0 %v6333_v31  ;;  %2073 = vmatpush1.bf16.msra.mxu1 %v6334_v2  ;;  %v6344_v31 = vld [vmem:[#allocation51_spill] sm:$0xff]  ;;  %v6345_v2 = vld [vmem:[#allocation52_spill] sm:$0xff] }
 0x486   : > { %2033 = vmatprep.subr.bf16.mxu0 %v6335_v18  ;;  %2074 = vmatprep.subr.bf16.mxu1 %v6336_v5  ;;  %v6346_v18 = vld [vmem:[#allocation53_spill] sm:$0xff]  ;;  %v6347_v5 = vld [vmem:[#allocation54_spill] sm:$0xff] }
 0x489   : > { %2034 = vmatpush1.bf16.msra.mxu0 %v6337_v17  ;;  %2075 = vmatpush1.bf16.msra.mxu1 %v6338_v15  ;;  %v6348_v17 = vld [vmem:[#allocation55_spill] sm:$0xff]  ;;  %v6349_v15 = vld [vmem:[#allocation56_spill] sm:$0xff] }
 0x48a   : > { %2035 = vmatprep.subr.bf16.mxu0 %v6339_v59  ;;  %2076 = vmatprep.subr.bf16.mxu1 %v6340_v9  ;;  %v6350_v59 = vld [vmem:[#allocation57_spill] sm:$0xff]  ;;  %v6351_v9 = vld [vmem:[#allocation58_spill] sm:$0xff] }
 0x48d   : > { %2036 = vmatpush1.bf16.msra.mxu0 %v6341_v63  ;;  %2077 = vmatpush1.bf16.msra.mxu1 %v6342_v25  ;;  %v6352_v63 = vld [vmem:[#allocation59_spill] sm:$0xff]  ;;  %v6353_v25 = vld [vmem:[#allocation60_spill] sm:$0xff] }
 0x48e   : > { %2037 = vmatprep.subr.bf16.mxu0 %v6343_v3  ;;  %2078 = vmatprep.subr.bf16.mxu1 %v6344_v31  ;;  %v6354_v3 = vld [vmem:[#allocation61_spill] sm:$0xff]  ;;  %v6355_v31 = vld [vmem:[#allocation62_spill] sm:$0xff] }
 0x491   : > { %2038 = vmatpush1.bf16.msra.mxu0 %v6345_v2  ;;  %2079 = vmatpush1.bf16.msra.mxu1 %v6346_v18  ;;  %v6356_v2 = vld [vmem:[#allocation63_spill] sm:$0xff]  ;;  %v6357_v18 = vld [vmem:[#allocation64_spill] sm:$0xff] }
 0x492   : > { %2039 = vmatprep.subr.bf16.mxu0 %v6347_v5  ;;  %2080 = vmatprep.subr.bf16.mxu1 %v6348_v17  ;;  %v6358_v5 = vld [vmem:[#allocation65_spill] sm:$0xff]  ;;  %v6359_v17 = vld [vmem:[#allocation66_spill] sm:$0xff] }
 0x495   : > { %2040 = vmatpush2.bf16.msra.mxu0 %v6349_v15  ;;  %2081 = vmatpush2.bf16.msra.mxu1 %v6350_v59  ;;  %v6360_v15 = vld [vmem:[#allocation67_spill] sm:$0xff]  ;;  %v6361_v59 = vld [vmem:[#allocation68_spill] sm:$0xff] }
 0x496   : > { %2041 = vmatprep.subr.bf16.mxu0 %v6351_v9  ;;  %2082 = vmatprep.subr.bf16.mxu1 %v6352_v63  ;;  %v6362_v9 = vld [vmem:[#allocation69_spill] sm:$0xff]  ;;  %v6363_v63 = vld [vmem:[#allocation70_spill] sm:$0xff] }
 0x499   : > { %2042 = vmatpush2.bf16.msra.mxu0 %v6353_v25  ;;  %2083 = vmatpush2.bf16.msra.mxu1 %v6354_v3  ;;  %v6364_v25 = vld [vmem:[#allocation71_spill] sm:$0xff]  ;;  %v6365_v3 = vld [vmem:[#allocation72_spill] sm:$0xff] }
 0x49a   : > { %2043 = vmatprep.subr.bf16.mxu0 %v6355_v31  ;;  %2084 = vmatprep.subr.bf16.mxu1 %v6356_v2  ;;  %v6366_v31 = vld [vmem:[#allocation73_spill] sm:$0xff]  ;;  %v6367_v2 = vld [vmem:[#allocation74_spill] sm:$0xff] }
 0x49d   : > { %2044 = vmatpush2.bf16.msra.mxu0 %v6357_v18  ;;  %2085 = vmatpush2.bf16.msra.mxu1 %v6358_v5  ;;  %v6368_v18 = vld [vmem:[#allocation75_spill] sm:$0xff]  ;;  %v6369_v5 = vld [vmem:[#allocation76_spill] sm:$0xff] }
 0x49e   : > { %2045 = vmatprep.subr.bf16.mxu0 %v6359_v17  ;;  %2086 = vmatprep.subr.bf16.mxu1 %v6360_v15  ;;  %v6370_v17 = vld [vmem:[#allocation77_spill] sm:$0xff]  ;;  %v6371_v15 = vld [vmem:[#allocation78_spill] sm:$0xff] }
 0x4a1   : > { %2046 = vmatpush2.bf16.msra.mxu0 %v6361_v59  ;;  %2087 = vmatpush2.bf16.msra.mxu1 %v6362_v9  ;;  %v6372_v59 = vld [vmem:[#allocation79_spill] sm:$0xff]  ;;  %v6373_v9 = vld [vmem:[#allocation80_spill] sm:$0xff] }
 0x4a2   : > { %2047 = vmatprep.subr.bf16.mxu0 %v6363_v63  ;;  %2088 = vmatprep.subr.bf16.mxu1 %v6364_v25  ;;  %v6374_v63 = vld [vmem:[#allocation81_spill] sm:$0xff]  ;;  %v6375_v25 = vld [vmem:[#allocation82_spill] sm:$0xff] }
 0x4a5   : > { %2048 = vmatpush2.bf16.msra.mxu0 %v6365_v3  ;;  %2089 = vmatpush2.bf16.msra.mxu1 %v6366_v31  ;;  %v6376_v3 = vld [vmem:[#allocation83_spill] sm:$0xff]  ;;  %v6377_v31 = vld [vmem:[#allocation84_spill] sm:$0xff] }
 0x4a6   : > { %2049 = vmatprep.subr.bf16.mxu0 %v6367_v2  ;;  %2090 = vmatprep.subr.bf16.mxu1 %v6368_v18  ;;  %v6378_v2 = vld [vmem:[#allocation85_spill] sm:$0xff]  ;;  %v6379_v18 = vld [vmem:[#allocation86_spill] sm:$0xff] }
 0x4a9   : > { %2050 = vmatpush2.bf16.msra.mxu0 %v6369_v5  ;;  %2091 = vmatpush2.bf16.msra.mxu1 %v6370_v17  ;;  %v6380_v17 = vld [vmem:[#allocation87_spill] sm:$0xff] }
 0x4aa   : > { %2051 = vmatprep.subr.bf16.mxu0 %v6371_v15  ;;  %2092 = vmatprep.subr.bf16.mxu1 %v6372_v59 }
 0x4ad   : > { %2052 = vmatpush2.bf16.msra.mxu0 %v6373_v9  ;;  %2093 = vmatpush2.bf16.msra.mxu1 %v6374_v63 }
 0x4ae   : > { %2053 = vmatprep.subr.bf16.mxu0 %v6375_v25  ;;  %2094 = vmatprep.subr.bf16.mxu1 %v6376_v3  ;;  %v6381_v3 = vld [vmem:[#allocation150_spill] sm:$0xff] }
 0x4b1   : > { %2054 = vmatpush2.bf16.msra.mxu0 %v6377_v31  ;;  %2095 = vmatpush2.bf16.msra.mxu1 %v6378_v2 }
 0x4b2   : > { %2105 = vmatprep.subr.bf16.mxu0 %v6379_v18  ;;  %2146 = vmatprep.subr.bf16.mxu1 %v6380_v17 }
 0x4f4   : > { %v1818_v15 = vpop.f32.mrf.mxu0  ;;  %v1859_v5 = vpop.f32.mrf.mxu1 }
 0x4f6   : > { %v1820_v59 = vpop.f32.mrf.mxu0  ;;  %v1861_v22 = vpop.f32.mrf.mxu1 }
 0x4f7   : > { %v1977_v25 = vcombine.low %v1818_v15, %v1820_v59  ;;  %v1978_v7 = vcombine.low %v1859_v5, %v1861_v22  ;;  %v6383_v22 = vld [vmem:[#allocation152_spill] sm:$0xff] }
 0x4f8   : > { %v1822_v9 = vpop.f32.mrf.mxu0  ;;  %v1863_v13 = vpop.f32.mrf.mxu1 }
 0x4f9   : > { %v1985_v41 = vrot.slane %v1977_v25, %v6381_v3  ;;  %v1992_v31 = vrot.slane %v1978_v7, %v6381_v3  ;;  %v6382_v9 = vld [vmem:[#allocation151_spill] sm:$0xff] }
 0x4fa   : > { %v1823_v63 = vpop.f32.mrf.mxu0  ;;  %v1864_v12 = vpop.f32.mrf.mxu1 }
 0x4fb   : > { %v1993_v2 = vcombine.low %v1985_v41, %v1992_v31 }
 0x4fd   : > { %v1995_v40 = vadd.f32 %v3364_v58, %v1993_v2 }
 0x4ff   : > { %v2001_v18 = vrot.slane %v1995_v40, 2  ;;  %v1996_v17 = vmul.f32 0.5, %v1995_v40  ;;  %v2007_v63 = vrot.slane %v1995_v40, 4 }
 0x501   : > { %v2003_v36 = vmul.f32 0.5, %v2001_v18 }
 0x503   : > { %3529 = vtanh.f32 %v2003_v36 }
 0x504   : > { %3531 = vtanh.f32 %v1996_v17 }
 0x510   : > { %v3530_v41 = vpop.eup %3529 }
 0x511   : > { %v3532_v18 = vpop.eup %3531  ;;  %v2005_v17 = vmul.f32 0.5, %v3530_v41 }
 0x513   : > { %v2006_v3 = vadd.f32 0.5, %v2005_v17 }
 0x534   : > { %v1900_v39 = vpop.f32.mrf.mxu0  ;;  %v1941_v16 = vpop.f32.mrf.mxu1 }
 0x535   : > { %v1948_v13 = vadd.f32 %v1900_v39, %v6382_v9  ;;  %v1950_v36 = vadd.f32 %v1941_v16, %v4483_v56  ;;  %v1998_v39 = vmul.f32 0.5, %v3532_v18  ;;  %v2010_v9 = vrot.slane %v1995_v40, 6 }
 0x536   : > { %v1902_v12 = vpop.f32.mrf.mxu0  ;;  %v1943_v59 = vpop.f32.mrf.mxu1 }
 0x537   : > { %v1952_v5 = vmul.f32 0.5, %v1948_v13  ;;  %v1949_v25 = vadd.f32 %v1902_v12, %v6383_v22  ;;  %v1951_v13 = vadd.f32 %v1943_v59, %v4487_v49  ;;  %v1999_v12 = vadd.f32 0.5, %v1998_v39 }
 0x538   : > { %v1904_v15 = vpop.f32.mrf.mxu0  ;;  %v1945_v7 = vpop.f32.mrf.mxu1 }
 0x539   : > { %3533 = vtanh.f32 %v1952_v5  ;;  %v1956_v31 = vmul.f32 0.5, %v1949_v25  ;;  %v2012_v15 = vmul.f32 0.5, %v2010_v9  ;;  %v1961_v7 = vmul.f32 0.5, %v1951_v13 }
 0x53a   : > { %3535 = vtanh.f32 %v2007_v63  ;;  %v1905_v2 = vpop.f32.mrf.mxu0  ;;  %v1946_v58 = vpop.f32.mrf.mxu1  ;;  %v2016_v63 = vmul.f32 %v2006_v3, %v4819_v60 }
 0x53b   : > { %3537 = vtanh.f32 %v1956_v31 }
 0x53c   : > { %3539 = vtanh.f32 %v1950_v36 }
 0x53d   : > { %3541 = vtanh.f32 %v2012_v15 }
 0x53e   : > { %3543 = vtanh.f32 %v1961_v7 }
 0x546   : > { %v3534_v5 = vpop.eup %3533 }
 0x547   : > { %v3536_v25 = vpop.eup %3535  ;;  %v1954_v2 = vmul.f32 0.5, %v3534_v5 }
 0x548   : > { %v3538_v58 = vpop.eup %3537  ;;  %v2017_v22 = vmul.f32 %v3536_v25, %v1999_v12 }
 0x549   : > { %v1955_v16 = vadd.f32 0.5, %v1954_v2  ;;  %v1958_v31 = vmul.f32 0.5, %v3538_v58  ;;  %v3540_v36 = vpop.eup %3539  ;;  %v6385_v2 = vld [vmem:[#allocation127_spill] sm:$0xff]  ;;  %v6386_v58 = vld [vmem:[#allocation128_spill] sm:$0xff] }
 0x54a   : > { %v4971_v41 = vadd.f32 %v2017_v22, %v2016_v63  ;;  %v3542_v3 = vpop.eup %3541 }
 0x54b   : > { %v1959_v40 = vadd.f32 0.5, %v1958_v31  ;;  %v1966_v18 = vmul.f32 %v3540_v36, %v1955_v16  ;;  %v3544_v60 = vpop.eup %3543  ;;  %v2014_v17 = vmul.f32 0.5, %v3542_v3  ;;  %v6387_v16 = vld [vmem:[#allocation129_spill] sm:$0xff]  ;;  %v6388_v31 = vld [vmem:[#allocation130_spill] sm:$0xff]  ;;  %v6390_v36 = vld [vmem:[#allocation132_spill] sm:$0xff] }
 0x54c   : > { %3545 = vtanh.f32 %v4971_v41  ;;  %v1963_v39 = vmul.f32 0.5, %v3544_v60  ;;  %v6393_v3 = vld [vmem:[#allocation135_spill] sm:$0xff]  ;;  %v6394_v60 = vld [vmem:[#allocation136_spill] sm:$0xff] }
 0x54d   : > { %v1965_v59 = vmul.f32 %v1959_v40, %v4823_v10  ;;  %v2015_v12 = vadd.f32 0.5, %v2014_v17  ;;  %v6389_v40 = vld [vmem:[#allocation131_spill] sm:$0xff]  ;;  %v6395_v17 = vld [vmem:[#allocation137_spill] sm:$0xff] }
 0x54e   : > { %v1964_v15 = vadd.f32 0.5, %v1963_v39  ;;  %v6396_v39 = vld [vmem:[#allocation138_spill] sm:$0xff] }
 0x54f   : > { %v4975_v9 = vadd.f32 %v1966_v18, %v1965_v59  ;;  %v6391_v59 = vld [vmem:[#allocation133_spill] sm:$0xff]  ;;  %v6392_v18 = vld [vmem:[#allocation134_spill] sm:$0xff] }
 0x551   : > { %3547 = vtanh.f32 %v4975_v9 }
 0x559   : > { %v3546_v13 = vpop.eup %3545 }
 0x55a   : > { %v2020_v7 = vmul.f32 %v3546_v13, %v2015_v12  ;;  %v6397_v13 = vld [vmem:[#allocation139_spill] sm:$0xff]  ;;  %v6398_v12 = vld [vmem:[#allocation140_spill] sm:$0xff] }
 0x55c   : > { %v4981_v25 = vpack.c.bf16 %v2020_v7, %v2020_v7  ;;  %v6401_v7 = vld [vmem:[#allocation143_spill] sm:$0xff] }
 0x55e   : > { %v3548_v22 = vpop.eup %3547 }
 0x55f   : > { %v1969_v5 = vmul.f32 %v3548_v22, %v1964_v15  ;;  %v6399_v15 = vld [vmem:[#allocation141_spill] sm:$0xff]  ;;  %v6400_v22 = vld [vmem:[#allocation142_spill] sm:$0xff] }
 0x561   : > { %v4979_v63 = vadd.f32 %v1969_v5, %v4827_v11  ;;  %v2022_v10 = vpack.c.bf16 %v1969_v5, %v1969_v5  ;;  %v6384_v11 = vld [vmem:[#allocation126_spill] sm:$0xff]  ;;  %v6402_v5 = vld [vmem:[#allocation144_spill] sm:$0xff] }
 0x563   : > { %2055 = vmatprep.mubr.bf16.mxu0 %v2022_v10  ;;  %2096 = vmatprep.mubr.bf16.mxu1 %v2022_v10 }
 0x564   : > { %2056 = vmatmul.mubr.bf16.vlgmr.msra.gmra.mxu0 %v4981_v25  ;;  %2097 = vmatmul.mubr.bf16.vlgmr.msra.gmra.mxu1 %v4981_v25 }
 0x565   : > { %2106 = vmatpush1.bf16.msra.mxu0 %v6105_v24  ;;  %2147 = vmatpush1.bf16.msra.mxu1 %v6106_v26 }
 0x566   : > { %2137 = vmatprep.mubr.bf16.mxu0 %v2022_v10  ;;  %2178 = vmatprep.mubr.bf16.mxu1 %v2022_v10  ;;  %v6403_v10 = vld [vmem:[#allocation145_spill] sm:$0xff] }
 0x567   : > { %2107 = vmatprep.subr.bf16.mxu0 %v6107_v8  ;;  %2148 = vmatprep.subr.bf16.mxu1 %v6196_v34 }
 0x569   : > { %2108 = vmatpush1.bf16.msra.mxu0 %v6197_v48  ;;  %2149 = vmatpush1.bf16.msra.mxu1 %v6198_v35 }
 0x56a   : > { %2109 = vmatprep.subr.bf16.mxu0 %v6199_v29  ;;  %2150 = vmatprep.subr.bf16.mxu1 %v6200_v28 }
 0x56d   : > { %2110 = vmatpush1.bf16.msra.mxu0 %v6201_v55  ;;  %2151 = vmatpush1.bf16.msra.mxu1 %v6202_v52 }
 0x56e   : > { %2111 = vmatprep.subr.bf16.mxu0 %v6203_v51  ;;  %2152 = vmatprep.subr.bf16.mxu1 %v6204_v42 }
 0x571   : > { %2112 = vmatpush1.bf16.msra.mxu0 %v6205_v1  ;;  %2153 = vmatpush1.bf16.msra.mxu1 %v6206_v27 }
 0x572   : > { %2113 = vmatprep.subr.bf16.mxu0 %v6291_v30  ;;  %2154 = vmatprep.subr.bf16.mxu1 %v6292_v21 }
 0x575   : > { %2114 = vmatpush1.bf16.msra.mxu0 %v6293_v4  ;;  %2155 = vmatpush1.bf16.msra.mxu1 %v6294_v0 }
 0x576   : > { %2115 = vmatprep.subr.bf16.mxu0 %v6295_v20  ;;  %2156 = vmatprep.subr.bf16.mxu1 %v6296_v33 }
 0x579   : > { %2116 = vmatpush1.bf16.msra.mxu0 %v6297_v54  ;;  %2157 = vmatpush1.bf16.msra.mxu1 %v6298_v6 }
 0x57a   : > { %2117 = vmatprep.subr.bf16.mxu0 %v6299_v57  ;;  %2158 = vmatprep.subr.bf16.mxu1 %v6300_v19 }
 0x57d   : > { %2118 = vmatpush1.bf16.msra.mxu0 %v6301_v45  ;;  %2159 = vmatpush1.bf16.msra.mxu1 %v6302_v14 }
 0x57e   : > { %2119 = vmatprep.subr.bf16.mxu0 %v6219_v38  ;;  %2160 = vmatprep.subr.bf16.mxu1 %v6220_v37 }
 0x581   : > { %2120 = vmatpush1.bf16.msra.mxu0 %v6221_v62  ;;  %2161 = vmatpush1.bf16.msra.mxu1 %v6303_v32 }
 0x582   : > { %2121 = vmatprep.subr.bf16.mxu0 %v6223_v43  ;;  %2162 = vmatprep.subr.bf16.mxu1 %v6224_v61 }
 0x585   : > { %2122 = vmatpush2.bf16.msra.mxu0 %v6225_v23  ;;  %2163 = vmatpush2.bf16.msra.mxu1 %v6226_v50 }
 0x586   : > { %2123 = vmatprep.subr.bf16.mxu0 %v6227_v53  ;;  %2164 = vmatprep.subr.bf16.mxu1 %v6228_v44 }
 0x589   : > { %2124 = vmatpush2.bf16.msra.mxu0 %v6229_v46  ;;  %2165 = vmatpush2.bf16.msra.mxu1 %v6142_v47 }
 0x58a   : > { %2125 = vmatprep.subr.bf16.mxu0 %v6384_v11  ;;  %2166 = vmatprep.subr.bf16.mxu1 %v6385_v2 }
 0x58d   : > { %2126 = vmatpush2.bf16.msra.mxu0 %v6386_v58  ;;  %2167 = vmatpush2.bf16.msra.mxu1 %v6387_v16 }
 0x58e   : > { %2127 = vmatprep.subr.bf16.mxu0 %v6388_v31  ;;  %2168 = vmatprep.subr.bf16.mxu1 %v6389_v40  ;;  %v3365_v31 = vld [vmem:[%s3995_s8 + $0x20] sm:$0xff] }
 0x591   : > { %2128 = vmatpush2.bf16.msra.mxu0 %v6390_v36  ;;  %2169 = vmatpush2.bf16.msra.mxu1 %v6391_v59 }
 0x592   : > { %2129 = vmatprep.subr.bf16.mxu0 %v6392_v18  ;;  %2170 = vmatprep.subr.bf16.mxu1 %v6393_v3  ;;  %v6404_v3 = vld [vmem:[#allocation146_spill] sm:$0xff] }
 0x595   : > { %2130 = vmatpush2.bf16.msra.mxu0 %v6394_v60  ;;  %2171 = vmatpush2.bf16.msra.mxu1 %v6395_v17  ;;  %v6405_v60 = vld [vmem:[#allocation147_spill] sm:$0xff]  ;;  %v6406_v17 = vld [vmem:[#allocation148_spill] sm:$0xff] }
 0x596   : > { %2131 = vmatprep.subr.bf16.mxu0 %v6396_v39  ;;  %2172 = vmatprep.subr.bf16.mxu1 %v6397_v13  ;;  %v6407_v39 = vld [vmem:[#allocation149_spill] sm:$0xff] }
 0x597   : > { %v6408_v13 = vld [vmem:[#allocation21_spill] sm:$0xff] }
 0x599   : > { %2132 = vmatpush2.bf16.msra.mxu0 %v6398_v12  ;;  %2173 = vmatpush2.bf16.msra.mxu1 %v6399_v15  ;;  %v6409_v12 = vld [vmem:[#allocation23_spill] sm:$0xff] }
 0x59a   : > { %2133 = vmatprep.subr.bf16.mxu0 %v6400_v22  ;;  %2174 = vmatprep.subr.bf16.mxu1 %v6401_v7  ;;  %v6410_v7 = vld [vmem:[#allocation22_spill] sm:$0xff]  ;;  %v6419_v22 = vld [vmem:[#allocation32_spill] sm:$0xff] }
 0x59d   : > { %2134 = vmatpush2.bf16.msra.mxu0 %v6402_v5  ;;  %2175 = vmatpush2.bf16.msra.mxu1 %v6403_v10  ;;  %v6411_v5 = vld [vmem:[#allocation24_spill] sm:$0xff]  ;;  %v6412_v10 = vld [vmem:[#allocation25_spill] sm:$0xff] }
 0x59e   : > { %2135 = vmatprep.subr.bf16.mxu0 %v6404_v3  ;;  %2176 = vmatprep.subr.bf16.mxu1 %v6405_v60  ;;  %v6413_v3 = vld [vmem:[#allocation26_spill] sm:$0xff]  ;;  %v6414_v60 = vld [vmem:[#allocation27_spill] sm:$0xff] }
 0x5a1   : > { %2136 = vmatpush2.bf16.msra.mxu0 %v6406_v17  ;;  %2177 = vmatpush2.bf16.msra.mxu1 %v6407_v39  ;;  %v6415_v17 = vld [vmem:[#allocation28_spill] sm:$0xff]  ;;  %v6416_v39 = vld [vmem:[#allocation29_spill] sm:$0xff] }
 0x5a2   : > { %2262 = vmatprep.subr.bf16.mxu0 %v6408_v13  ;;  %2303 = vmatprep.subr.bf16.mxu1 %v6409_v12  ;;  %v6417_v13 = vld [vmem:[#allocation30_spill] sm:$0xff]  ;;  %v6418_v12 = vld [vmem:[#allocation31_spill] sm:$0xff] }
 0x5a4   : > { %2138 = vmatmul.mubr.bf16.vlgmr.msra.gmra.mxu0 %v4981_v25  ;;  %2179 = vmatmul.mubr.bf16.vlgmr.msra.gmra.mxu1 %v4981_v25  ;;  %v6420_v25 = vld [vmem:[#allocation33_spill] sm:$0xff] }
 0x5a5   : > { %2263 = vmatpush1.bf16.msra.mxu0 %v6410_v7  ;;  %2304 = vmatpush1.bf16.msra.mxu1 %v6411_v5  ;;  %v6421_v7 = vld [vmem:[#allocation34_spill] sm:$0xff]  ;;  %v6422_v5 = vld [vmem:[#allocation35_spill] sm:$0xff] }
 0x5a6   : > { %2264 = vmatprep.subr.bf16.mxu0 %v6412_v10  ;;  %2305 = vmatprep.subr.bf16.mxu1 %v6413_v3  ;;  %v6423_v10 = vld [vmem:[#allocation36_spill] sm:$0xff]  ;;  %v6424_v3 = vld [vmem:[#allocation37_spill] sm:$0xff] }
 0x5a9   : > { %2265 = vmatpush1.bf16.msra.mxu0 %v6414_v60  ;;  %2306 = vmatpush1.bf16.msra.mxu1 %v6415_v17  ;;  %v6425_v60 = vld [vmem:[#allocation38_spill] sm:$0xff]  ;;  %v6426_v17 = vld [vmem:[#allocation39_spill] sm:$0xff] }
 0x5aa   : > { %2266 = vmatprep.subr.bf16.mxu0 %v6416_v39  ;;  %2307 = vmatprep.subr.bf16.mxu1 %v6417_v13  ;;  %v6427_v39 = vld [vmem:[#allocation40_spill] sm:$0xff]  ;;  %v6428_v13 = vld [vmem:[#allocation41_spill] sm:$0xff] }
 0x5ad   : > { %2267 = vmatpush1.bf16.msra.mxu0 %v6418_v12  ;;  %2308 = vmatpush1.bf16.msra.mxu1 %v6419_v22  ;;  %v6429_v12 = vld [vmem:[#allocation42_spill] sm:$0xff]  ;;  %v6430_v22 = vld [vmem:[#allocation43_spill] sm:$0xff] }
 0x5ae   : > { %2268 = vmatprep.subr.bf16.mxu0 %v6420_v25  ;;  %2309 = vmatprep.subr.bf16.mxu1 %v6421_v7  ;;  %v6431_v25 = vld [vmem:[#allocation44_spill] sm:$0xff]  ;;  %v6432_v7 = vld [vmem:[#allocation45_spill] sm:$0xff] }
 0x5b1   : > { %2269 = vmatpush1.bf16.msra.mxu0 %v6422_v5  ;;  %2310 = vmatpush1.bf16.msra.mxu1 %v6423_v10  ;;  %v6433_v5 = vld [vmem:[#allocation47_spill] sm:$0xff]  ;;  %v6434_v10 = vld [vmem:[#allocation48_spill] sm:$0xff] }
 0x5b2   : > { %2270 = vmatprep.subr.bf16.mxu0 %v6424_v3  ;;  %2311 = vmatprep.subr.bf16.mxu1 %v6425_v60  ;;  %v6435_v3 = vld [vmem:[#allocation49_spill] sm:$0xff]  ;;  %v6436_v60 = vld [vmem:[#allocation50_spill] sm:$0xff] }
 0x5b5   : > { %2271 = vmatpush1.bf16.msra.mxu0 %v6426_v17  ;;  %2312 = vmatpush1.bf16.msra.mxu1 %v6427_v39  ;;  %v6437_v17 = vld [vmem:[#allocation51_spill] sm:$0xff]  ;;  %v6438_v39 = vld [vmem:[#allocation52_spill] sm:$0xff] }
 0x5b6   : > { %2272 = vmatprep.subr.bf16.mxu0 %v6428_v13  ;;  %2313 = vmatprep.subr.bf16.mxu1 %v6429_v12  ;;  %v6439_v13 = vld [vmem:[#allocation53_spill] sm:$0xff]  ;;  %v6440_v12 = vld [vmem:[#allocation54_spill] sm:$0xff] }
 0x5b9   : > { %2273 = vmatpush1.bf16.msra.mxu0 %v6430_v22  ;;  %2314 = vmatpush1.bf16.msra.mxu1 %v6431_v25  ;;  %v6441_v22 = vld [vmem:[#allocation55_spill] sm:$0xff]  ;;  %v6442_v25 = vld [vmem:[#allocation56_spill] sm:$0xff] }
 0x5ba   : > { %2274 = vmatprep.subr.bf16.mxu0 %v6432_v7  ;;  %2315 = vmatprep.subr.bf16.mxu1 %v6433_v5  ;;  %v6443_v7 = vld [vmem:[#allocation57_spill] sm:$0xff]  ;;  %v6444_v5 = vld [vmem:[#allocation58_spill] sm:$0xff] }
 0x5bd   : > { %2275 = vmatpush1.bf16.msra.mxu0 %v6434_v10  ;;  %2316 = vmatpush1.bf16.msra.mxu1 %v6435_v3  ;;  %v6445_v10 = vld [vmem:[#allocation59_spill] sm:$0xff]  ;;  %v6446_v3 = vld [vmem:[#allocation60_spill] sm:$0xff] }
 0x5be   : > { %2276 = vmatprep.subr.bf16.mxu0 %v6436_v60  ;;  %2317 = vmatprep.subr.bf16.mxu1 %v6437_v17  ;;  %v6447_v60 = vld [vmem:[#allocation61_spill] sm:$0xff]  ;;  %v6448_v17 = vld [vmem:[#allocation62_spill] sm:$0xff] }
 0x5c1   : > { %2277 = vmatpush1.bf16.msra.mxu0 %v6438_v39  ;;  %2318 = vmatpush1.bf16.msra.mxu1 %v6439_v13  ;;  %v6449_v39 = vld [vmem:[#allocation63_spill] sm:$0xff]  ;;  %v6450_v13 = vld [vmem:[#allocation64_spill] sm:$0xff] }
 0x5c2   : > { %2278 = vmatprep.subr.bf16.mxu0 %v6440_v12  ;;  %2319 = vmatprep.subr.bf16.mxu1 %v6441_v22  ;;  %v6451_v12 = vld [vmem:[#allocation65_spill] sm:$0xff]  ;;  %v6452_v22 = vld [vmem:[#allocation66_spill] sm:$0xff] }
 0x5c5   : > { %2279 = vmatpush2.bf16.msra.mxu0 %v6442_v25  ;;  %2320 = vmatpush2.bf16.msra.mxu1 %v6443_v7  ;;  %v6453_v25 = vld [vmem:[#allocation67_spill] sm:$0xff]  ;;  %v6454_v7 = vld [vmem:[#allocation68_spill] sm:$0xff] }
 0x5c6   : > { %2280 = vmatprep.subr.bf16.mxu0 %v6444_v5  ;;  %2321 = vmatprep.subr.bf16.mxu1 %v6445_v10  ;;  %v6455_v5 = vld [vmem:[#allocation69_spill] sm:$0xff]  ;;  %v6456_v10 = vld [vmem:[#allocation70_spill] sm:$0xff] }
 0x5c9   : > { %2281 = vmatpush2.bf16.msra.mxu0 %v6446_v3  ;;  %2322 = vmatpush2.bf16.msra.mxu1 %v6447_v60  ;;  %v6457_v3 = vld [vmem:[#allocation71_spill] sm:$0xff]  ;;  %v6458_v60 = vld [vmem:[#allocation72_spill] sm:$0xff] }
 0x5ca   : > { %2282 = vmatprep.subr.bf16.mxu0 %v6448_v17  ;;  %2323 = vmatprep.subr.bf16.mxu1 %v6449_v39  ;;  %v6459_v17 = vld [vmem:[#allocation73_spill] sm:$0xff]  ;;  %v6460_v39 = vld [vmem:[#allocation74_spill] sm:$0xff] }
 0x5cd   : > { %2283 = vmatpush2.bf16.msra.mxu0 %v6450_v13  ;;  %2324 = vmatpush2.bf16.msra.mxu1 %v6451_v12  ;;  %v6461_v13 = vld [vmem:[#allocation75_spill] sm:$0xff]  ;;  %v6462_v12 = vld [vmem:[#allocation76_spill] sm:$0xff] }
 0x5ce   : > { %2284 = vmatprep.subr.bf16.mxu0 %v6452_v22  ;;  %2325 = vmatprep.subr.bf16.mxu1 %v6453_v25  ;;  %v6463_v22 = vld [vmem:[#allocation77_spill] sm:$0xff]  ;;  %v6464_v25 = vld [vmem:[#allocation78_spill] sm:$0xff] }
 0x5d1   : > { %2285 = vmatpush2.bf16.msra.mxu0 %v6454_v7  ;;  %2326 = vmatpush2.bf16.msra.mxu1 %v6455_v5  ;;  %v6465_v7 = vld [vmem:[#allocation79_spill] sm:$0xff]  ;;  %v6466_v5 = vld [vmem:[#allocation80_spill] sm:$0xff] }
 0x5d2   : > { %2286 = vmatprep.subr.bf16.mxu0 %v6456_v10  ;;  %2327 = vmatprep.subr.bf16.mxu1 %v6457_v3  ;;  %v6467_v10 = vld [vmem:[#allocation81_spill] sm:$0xff]  ;;  %v6468_v3 = vld [vmem:[#allocation82_spill] sm:$0xff] }
 0x5d5   : > { %2287 = vmatpush2.bf16.msra.mxu0 %v6458_v60  ;;  %2328 = vmatpush2.bf16.msra.mxu1 %v6459_v17  ;;  %v6469_v60 = vld [vmem:[#allocation83_spill] sm:$0xff]  ;;  %v6470_v17 = vld [vmem:[#allocation84_spill] sm:$0xff] }
 0x5d6   : > { %2288 = vmatprep.subr.bf16.mxu0 %v6460_v39  ;;  %2329 = vmatprep.subr.bf16.mxu1 %v6461_v13  ;;  %v6471_v39 = vld [vmem:[#allocation85_spill] sm:$0xff]  ;;  %v6472_v13 = vld [vmem:[#allocation86_spill] sm:$0xff] }
 0x5d9   : > { %2289 = vmatpush2.bf16.msra.mxu0 %v6462_v12  ;;  %2330 = vmatpush2.bf16.msra.mxu1 %v6463_v22  ;;  %v6473_v22 = vld [vmem:[#allocation87_spill] sm:$0xff] }
 0x5da   : > { %2290 = vmatprep.subr.bf16.mxu0 %v6464_v25  ;;  %2331 = vmatprep.subr.bf16.mxu1 %v6465_v7 }
 0x5dd   : > { %2291 = vmatpush2.bf16.msra.mxu0 %v6466_v5  ;;  %2332 = vmatpush2.bf16.msra.mxu1 %v6467_v10 }
 0x5de   : > { %2292 = vmatprep.subr.bf16.mxu0 %v6468_v3  ;;  %2333 = vmatprep.subr.bf16.mxu1 %v6469_v60  ;;  %v6474_v60 = vld [vmem:[#allocation150_spill] sm:$0xff] }
 0x5e1   : > { %2293 = vmatpush2.bf16.msra.mxu0 %v6470_v17  ;;  %2334 = vmatpush2.bf16.msra.mxu1 %v6471_v39 }
 0x5e2   : > { %2344 = vmatprep.subr.bf16.mxu0 %v6472_v13  ;;  %2385 = vmatprep.subr.bf16.mxu1 %v6473_v22 }
 0x624   : > { %v2057_v25 = vpop.f32.mrf.mxu0  ;;  %v2098_v12 = vpop.f32.mrf.mxu1 }
 0x626   : > { %v2059_v7 = vpop.f32.mrf.mxu0  ;;  %v2100_v15 = vpop.f32.mrf.mxu1 }
 0x627   : > { %v2216_v3 = vcombine.low %v2057_v25, %v2059_v7  ;;  %v2217_v36 = vcombine.low %v2098_v12, %v2100_v15  ;;  %v6476_v15 = vld [vmem:[#allocation152_spill] sm:$0xff] }
 0x628   : > { %v2061_v5 = vpop.f32.mrf.mxu0  ;;  %v2102_v18 = vpop.f32.mrf.mxu1 }
 0x629   : > { %v2224_v40 = vrot.slane %v2216_v3, %v6474_v60  ;;  %v2231_v17 = vrot.slane %v2217_v36, %v6474_v60  ;;  %v6475_v5 = vld [vmem:[#allocation151_spill] sm:$0xff] }
 0x62a   : > { %v2062_v10 = vpop.f32.mrf.mxu0  ;;  %v2103_v59 = vpop.f32.mrf.mxu1 }
 0x62b   : > { %v2232_v39 = vcombine.low %v2224_v40, %v2231_v17 }
 0x62d   : > { %v2234_v16 = vadd.f32 %v3365_v31, %v2232_v39 }
 0x62f   : > { %v2240_v13 = vrot.slane %v2234_v16, 2  ;;  %v2235_v22 = vmul.f32 0.5, %v2234_v16  ;;  %v2246_v10 = vrot.slane %v2234_v16, 4 }
 0x631   : > { %v2242_v58 = vmul.f32 0.5, %v2240_v13 }
 0x633   : > { %3549 = vtanh.f32 %v2242_v58 }
 0x634   : > { %3551 = vtanh.f32 %v2235_v22 }
 0x640   : > { %v3550_v39 = vpop.eup %3549 }
 0x641   : > { %v3552_v13 = vpop.eup %3551  ;;  %v2244_v22 = vmul.f32 0.5, %v3550_v39 }
 0x643   : > { %v2245_v60 = vadd.f32 0.5, %v2244_v22 }
 0x664   : > { %v2139_v2 = vpop.f32.mrf.mxu0  ;;  %v2180_v11 = vpop.f32.mrf.mxu1 }
 0x665   : > { %v2187_v18 = vadd.f32 %v2139_v2, %v6475_v5  ;;  %v2189_v58 = vadd.f32 %v2180_v11, %v4483_v56  ;;  %v2237_v2 = vmul.f32 0.5, %v3552_v13  ;;  %v2249_v5 = vrot.slane %v2234_v16, 6 }
 0x666   : > { %v2141_v59 = vpop.f32.mrf.mxu0  ;;  %v2182_v7 = vpop.f32.mrf.mxu1 }
 0x667   : > { %v2191_v12 = vmul.f32 0.5, %v2187_v18  ;;  %v2188_v3 = vadd.f32 %v2141_v59, %v6476_v15  ;;  %v2190_v18 = vadd.f32 %v2182_v7, %v4487_v49  ;;  %v2238_v59 = vadd.f32 0.5, %v2237_v2 }
 0x668   : > { %v2143_v25 = vpop.f32.mrf.mxu0  ;;  %v2184_v36 = vpop.f32.mrf.mxu1 }
 0x669   : > { %3553 = vtanh.f32 %v2191_v12  ;;  %v2195_v40 = vmul.f32 0.5, %v2188_v3  ;;  %v2251_v25 = vmul.f32 0.5, %v2249_v5  ;;  %v2200_v36 = vmul.f32 0.5, %v2190_v18 }
 0x66a   : > { %3555 = vtanh.f32 %v2246_v10  ;;  %v2144_v31 = vpop.f32.mrf.mxu0  ;;  %v2185_v17 = vpop.f32.mrf.mxu1  ;;  %v2255_v10 = vmul.f32 %v2245_v60, %v4971_v41 }
 0x66b   : > { %3557 = vtanh.f32 %v2195_v40 }
 0x66c   : > { %3559 = vtanh.f32 %v2189_v58 }
 0x66d   : > { %3561 = vtanh.f32 %v2251_v25 }
 0x66e   : > { %3563 = vtanh.f32 %v2200_v36 }
 0x676   : > { %v3554_v12 = vpop.eup %3553 }
 0x677   : > { %v3556_v3 = vpop.eup %3555  ;;  %v2193_v31 = vmul.f32 0.5, %v3554_v12 }
 0x678   : > { %v3558_v17 = vpop.eup %3557  ;;  %v2256_v15 = vmul.f32 %v3556_v3, %v2238_v59 }
 0x679   : > { %v2194_v11 = vadd.f32 0.5, %v2193_v31  ;;  %v2197_v40 = vmul.f32 0.5, %v3558_v17  ;;  %v3560_v58 = vpop.eup %3559  ;;  %v6478_v31 = vld [vmem:[#allocation127_spill] sm:$0xff]  ;;  %v6479_v17 = vld [vmem:[#allocation128_spill] sm:$0xff] }
 0x67a   : > { %v5123_v39 = vadd.f32 %v2256_v15, %v2255_v10  ;;  %v3562_v41 = vpop.eup %3561 }
 0x67b   : > { %v2198_v16 = vadd.f32 0.5, %v2197_v40  ;;  %v2205_v13 = vmul.f32 %v3560_v58, %v2194_v11  ;;  %v3564_v60 = vpop.eup %3563  ;;  %v2253_v22 = vmul.f32 0.5, %v3562_v41  ;;  %v6480_v11 = vld [vmem:[#allocation129_spill] sm:$0xff]  ;;  %v6481_v40 = vld [vmem:[#allocation130_spill] sm:$0xff]  ;;  %v6483_v58 = vld [vmem:[#allocation132_spill] sm:$0xff] }
 0x67c   : > { %3565 = vtanh.f32 %v5123_v39  ;;  %v2202_v2 = vmul.f32 0.5, %v3564_v60  ;;  %v6486_v41 = vld [vmem:[#allocation135_spill] sm:$0xff]  ;;  %v6487_v60 = vld [vmem:[#allocation136_spill] sm:$0xff] }
 0x67d   : > { %v2204_v7 = vmul.f32 %v2198_v16, %v4975_v9  ;;  %v2254_v59 = vadd.f32 0.5, %v2253_v22  ;;  %v6482_v16 = vld [vmem:[#allocation131_spill] sm:$0xff]  ;;  %v6488_v22 = vld [vmem:[#allocation137_spill] sm:$0xff] }
 0x67e   : > { %v2203_v25 = vadd.f32 0.5, %v2202_v2  ;;  %v6489_v2 = vld [vmem:[#allocation138_spill] sm:$0xff] }
 0x67f   : > { %v5127_v5 = vadd.f32 %v2205_v13, %v2204_v7  ;;  %v6484_v7 = vld [vmem:[#allocation133_spill] sm:$0xff]  ;;  %v6485_v13 = vld [vmem:[#allocation134_spill] sm:$0xff] }
 0x681   : > { %3567 = vtanh.f32 %v5127_v5 }
 0x689   : > { %v3566_v18 = vpop.eup %3565 }
 0x68a   : > { %v2259_v36 = vmul.f32 %v3566_v18, %v2254_v59  ;;  %v6490_v18 = vld [vmem:[#allocation139_spill] sm:$0xff]  ;;  %v6491_v59 = vld [vmem:[#allocation140_spill] sm:$0xff] }
 0x68c   : > { %v5133_v3 = vpack.c.bf16 %v2259_v36, %v2259_v36  ;;  %v6494_v36 = vld [vmem:[#allocation143_spill] sm:$0xff] }
 0x68e   : > { %v3568_v15 = vpop.eup %3567 }
 0x68f   : > { %v2208_v12 = vmul.f32 %v3568_v15, %v2203_v25  ;;  %v6492_v25 = vld [vmem:[#allocation141_spill] sm:$0xff]  ;;  %v6493_v15 = vld [vmem:[#allocation142_spill] sm:$0xff] }
 0x691   : > { %v5131_v10 = vadd.f32 %v2208_v12, %v4979_v63  ;;  %v2261_v9 = vpack.c.bf16 %v2208_v12, %v2208_v12  ;;  %v6477_v63 = vld [vmem:[#allocation126_spill] sm:$0xff]  ;;  %v6495_v12 = vld [vmem:[#allocation144_spill] sm:$0xff] }
 0x693   : > { %2294 = vmatprep.mubr.bf16.mxu0 %v2261_v9  ;;  %2335 = vmatprep.mubr.bf16.mxu1 %v2261_v9 }
 0x694   : > { %2295 = vmatmul.mubr.bf16.vlgmr.msra.gmra.mxu0 %v5133_v3  ;;  %2336 = vmatmul.mubr.bf16.vlgmr.msra.gmra.mxu1 %v5133_v3 }
 0x695   : > { %2345 = vmatpush1.bf16.msra.mxu0 %v6105_v24  ;;  %2386 = vmatpush1.bf16.msra.mxu1 %v6106_v26 }
 0x696   : > { %2376 = vmatprep.mubr.bf16.mxu0 %v2261_v9  ;;  %2417 = vmatprep.mubr.bf16.mxu1 %v2261_v9  ;;  %v6496_v9 = vld [vmem:[#allocation145_spill] sm:$0xff] }
 0x697   : > { %2346 = vmatprep.subr.bf16.mxu0 %v6107_v8  ;;  %2387 = vmatprep.subr.bf16.mxu1 %v6196_v34 }
 0x699   : > { %2347 = vmatpush1.bf16.msra.mxu0 %v6197_v48  ;;  %2388 = vmatpush1.bf16.msra.mxu1 %v6198_v35 }
 0x69a   : > { %2348 = vmatprep.subr.bf16.mxu0 %v6199_v29  ;;  %2389 = vmatprep.subr.bf16.mxu1 %v6200_v28 }
 0x69d   : > { %2349 = vmatpush1.bf16.msra.mxu0 %v6201_v55  ;;  %2390 = vmatpush1.bf16.msra.mxu1 %v6202_v52 }
 0x69e   : > { %2350 = vmatprep.subr.bf16.mxu0 %v6203_v51  ;;  %2391 = vmatprep.subr.bf16.mxu1 %v6204_v42 }
 0x6a1   : > { %2351 = vmatpush1.bf16.msra.mxu0 %v6205_v1  ;;  %2392 = vmatpush1.bf16.msra.mxu1 %v6206_v27 }
 0x6a2   : > { %2352 = vmatprep.subr.bf16.mxu0 %v6291_v30  ;;  %2393 = vmatprep.subr.bf16.mxu1 %v6292_v21 }
 0x6a5   : > { %2353 = vmatpush1.bf16.msra.mxu0 %v6293_v4  ;;  %2394 = vmatpush1.bf16.msra.mxu1 %v6294_v0 }
 0x6a6   : > { %2354 = vmatprep.subr.bf16.mxu0 %v6295_v20  ;;  %2395 = vmatprep.subr.bf16.mxu1 %v6296_v33 }
 0x6a9   : > { %2355 = vmatpush1.bf16.msra.mxu0 %v6297_v54  ;;  %2396 = vmatpush1.bf16.msra.mxu1 %v6298_v6 }
 0x6aa   : > { %2356 = vmatprep.subr.bf16.mxu0 %v6299_v57  ;;  %2397 = vmatprep.subr.bf16.mxu1 %v6300_v19 }
 0x6ad   : > { %2357 = vmatpush1.bf16.msra.mxu0 %v6301_v45  ;;  %2398 = vmatpush1.bf16.msra.mxu1 %v6302_v14 }
 0x6ae   : > { %2358 = vmatprep.subr.bf16.mxu0 %v6219_v38  ;;  %2399 = vmatprep.subr.bf16.mxu1 %v6220_v37 }
 0x6b1   : > { %2359 = vmatpush1.bf16.msra.mxu0 %v6221_v62  ;;  %2400 = vmatpush1.bf16.msra.mxu1 %v6303_v32 }
 0x6b2   : > { %2360 = vmatprep.subr.bf16.mxu0 %v6223_v43  ;;  %2401 = vmatprep.subr.bf16.mxu1 %v6224_v61 }
 0x6b5   : > { %2361 = vmatpush2.bf16.msra.mxu0 %v6225_v23  ;;  %2402 = vmatpush2.bf16.msra.mxu1 %v6226_v50 }
 0x6b6   : > { %2362 = vmatprep.subr.bf16.mxu0 %v6227_v53  ;;  %2403 = vmatprep.subr.bf16.mxu1 %v6228_v44 }
 0x6b9   : > { %2363 = vmatpush2.bf16.msra.mxu0 %v6229_v46  ;;  %2404 = vmatpush2.bf16.msra.mxu1 %v6142_v47 }
 0x6ba   : > { %2364 = vmatprep.subr.bf16.mxu0 %v6477_v63  ;;  %2405 = vmatprep.subr.bf16.mxu1 %v6478_v31 }
 0x6bd   : > { %2365 = vmatpush2.bf16.msra.mxu0 %v6479_v17  ;;  %2406 = vmatpush2.bf16.msra.mxu1 %v6480_v11 }
 0x6be   : > { %2366 = vmatprep.subr.bf16.mxu0 %v6481_v40  ;;  %2407 = vmatprep.subr.bf16.mxu1 %v6482_v16  ;;  %v3366_v40 = vld [vmem:[%s3995_s8 + $0x28] sm:$0xff] }
 0x6c1   : > { %2367 = vmatpush2.bf16.msra.mxu0 %v6483_v58  ;;  %2408 = vmatpush2.bf16.msra.mxu1 %v6484_v7 }
 0x6c2   : > { %2368 = vmatprep.subr.bf16.mxu0 %v6485_v13  ;;  %2409 = vmatprep.subr.bf16.mxu1 %v6486_v41  ;;  %v6497_v41 = vld [vmem:[#allocation146_spill] sm:$0xff] }
 0x6c5   : > { %2369 = vmatpush2.bf16.msra.mxu0 %v6487_v60  ;;  %2410 = vmatpush2.bf16.msra.mxu1 %v6488_v22  ;;  %v6498_v60 = vld [vmem:[#allocation147_spill] sm:$0xff]  ;;  %v6499_v22 = vld [vmem:[#allocation148_spill] sm:$0xff] }
 0x6c6   : > { %2370 = vmatprep.subr.bf16.mxu0 %v6489_v2  ;;  %2411 = vmatprep.subr.bf16.mxu1 %v6490_v18  ;;  %v6500_v2 = vld [vmem:[#allocation149_spill] sm:$0xff] }
 0x6c7   : > { %v6501_v18 = vld [vmem:[#allocation21_spill] sm:$0xff] }
 0x6c9   : > { %2371 = vmatpush2.bf16.msra.mxu0 %v6491_v59  ;;  %2412 = vmatpush2.bf16.msra.mxu1 %v6492_v25  ;;  %v6502_v59 = vld [vmem:[#allocation23_spill] sm:$0xff] }
 0x6ca   : > { %2372 = vmatprep.subr.bf16.mxu0 %v6493_v15  ;;  %2413 = vmatprep.subr.bf16.mxu1 %v6494_v36  ;;  %v6503_v36 = vld [vmem:[#allocation22_spill] sm:$0xff]  ;;  %v6512_v15 = vld [vmem:[#allocation32_spill] sm:$0xff] }
 0x6cd   : > { %2373 = vmatpush2.bf16.msra.mxu0 %v6495_v12  ;;  %2414 = vmatpush2.bf16.msra.mxu1 %v6496_v9  ;;  %v6504_v12 = vld [vmem:[#allocation24_spill] sm:$0xff]  ;;  %v6505_v9 = vld [vmem:[#allocation25_spill] sm:$0xff] }
 0x6ce   : > { %2374 = vmatprep.subr.bf16.mxu0 %v6497_v41  ;;  %2415 = vmatprep.subr.bf16.mxu1 %v6498_v60  ;;  %v6506_v41 = vld [vmem:[#allocation26_spill] sm:$0xff]  ;;  %v6507_v60 = vld [vmem:[#allocation27_spill] sm:$0xff] }
 0x6d1   : > { %2375 = vmatpush2.bf16.msra.mxu0 %v6499_v22  ;;  %2416 = vmatpush2.bf16.msra.mxu1 %v6500_v2  ;;  %v6508_v22 = vld [vmem:[#allocation28_spill] sm:$0xff]  ;;  %v6509_v2 = vld [vmem:[#allocation29_spill] sm:$0xff] }
 0x6d2   : > { %2501 = vmatprep.subr.bf16.mxu0 %v6501_v18  ;;  %2542 = vmatprep.subr.bf16.mxu1 %v6502_v59  ;;  %v6510_v18 = vld [vmem:[#allocation30_spill] sm:$0xff]  ;;  %v6511_v59 = vld [vmem:[#allocation31_spill] sm:$0xff] }
 0x6d4   : > { %2377 = vmatmul.mubr.bf16.vlgmr.msra.gmra.mxu0 %v5133_v3  ;;  %2418 = vmatmul.mubr.bf16.vlgmr.msra.gmra.mxu1 %v5133_v3  ;;  %v6513_v3 = vld [vmem:[#allocation33_spill] sm:$0xff] }
 0x6d5   : > { %2502 = vmatpush1.bf16.msra.mxu0 %v6503_v36  ;;  %2543 = vmatpush1.bf16.msra.mxu1 %v6504_v12  ;;  %v6514_v36 = vld [vmem:[#allocation34_spill] sm:$0xff]  ;;  %v6515_v12 = vld [vmem:[#allocation35_spill] sm:$0xff] }
 0x6d6   : > { %2503 = vmatprep.subr.bf16.mxu0 %v6505_v9  ;;  %2544 = vmatprep.subr.bf16.mxu1 %v6506_v41  ;;  %v6516_v9 = vld [vmem:[#allocation36_spill] sm:$0xff]  ;;  %v6517_v41 = vld [vmem:[#allocation37_spill] sm:$0xff] }
 0x6d9   : > { %2504 = vmatpush1.bf16.msra.mxu0 %v6507_v60  ;;  %2545 = vmatpush1.bf16.msra.mxu1 %v6508_v22  ;;  %v6518_v60 = vld [vmem:[#allocation38_spill] sm:$0xff]  ;;  %v6519_v22 = vld [vmem:[#allocation39_spill] sm:$0xff] }
 0x6da   : > { %2505 = vmatprep.subr.bf16.mxu0 %v6509_v2  ;;  %2546 = vmatprep.subr.bf16.mxu1 %v6510_v18  ;;  %v6520_v2 = vld [vmem:[#allocation40_spill] sm:$0xff]  ;;  %v6521_v18 = vld [vmem:[#allocation41_spill] sm:$0xff] }
 0x6dd   : > { %2506 = vmatpush1.bf16.msra.mxu0 %v6511_v59  ;;  %2547 = vmatpush1.bf16.msra.mxu1 %v6512_v15  ;;  %v6522_v59 = vld [vmem:[#allocation42_spill] sm:$0xff]  ;;  %v6523_v15 = vld [vmem:[#allocation43_spill] sm:$0xff] }
 0x6de   : > { %2507 = vmatprep.subr.bf16.mxu0 %v6513_v3  ;;  %2548 = vmatprep.subr.bf16.mxu1 %v6514_v36  ;;  %v6524_v3 = vld [vmem:[#allocation44_spill] sm:$0xff]  ;;  %v6525_v36 = vld [vmem:[#allocation45_spill] sm:$0xff] }
 0x6e1   : > { %2508 = vmatpush1.bf16.msra.mxu0 %v6515_v12  ;;  %2549 = vmatpush1.bf16.msra.mxu1 %v6516_v9  ;;  %v6526_v12 = vld [vmem:[#allocation47_spill] sm:$0xff]  ;;  %v6527_v9 = vld [vmem:[#allocation48_spill] sm:$0xff] }
 0x6e2   : > { %2509 = vmatprep.subr.bf16.mxu0 %v6517_v41  ;;  %2550 = vmatprep.subr.bf16.mxu1 %v6518_v60  ;;  %v6528_v41 = vld [vmem:[#allocation49_spill] sm:$0xff]  ;;  %v6529_v60 = vld [vmem:[#allocation50_spill] sm:$0xff] }
 0x6e5   : > { %2510 = vmatpush1.bf16.msra.mxu0 %v6519_v22  ;;  %2551 = vmatpush1.bf16.msra.mxu1 %v6520_v2  ;;  %v6530_v22 = vld [vmem:[#allocation51_spill] sm:$0xff]  ;;  %v6531_v2 = vld [vmem:[#allocation52_spill] sm:$0xff] }
 0x6e6   : > { %2511 = vmatprep.subr.bf16.mxu0 %v6521_v18  ;;  %2552 = vmatprep.subr.bf16.mxu1 %v6522_v59  ;;  %v6532_v18 = vld [vmem:[#allocation53_spill] sm:$0xff]  ;;  %v6533_v59 = vld [vmem:[#allocation54_spill] sm:$0xff] }
 0x6e9   : > { %2512 = vmatpush1.bf16.msra.mxu0 %v6523_v15  ;;  %2553 = vmatpush1.bf16.msra.mxu1 %v6524_v3  ;;  %v6534_v15 = vld [vmem:[#allocation55_spill] sm:$0xff]  ;;  %v6535_v3 = vld [vmem:[#allocation56_spill] sm:$0xff] }
 0x6ea   : > { %2513 = vmatprep.subr.bf16.mxu0 %v6525_v36  ;;  %2554 = vmatprep.subr.bf16.mxu1 %v6526_v12  ;;  %v6536_v36 = vld [vmem:[#allocation57_spill] sm:$0xff]  ;;  %v6537_v12 = vld [vmem:[#allocation58_spill] sm:$0xff] }
 0x6ed   : > { %2514 = vmatpush1.bf16.msra.mxu0 %v6527_v9  ;;  %2555 = vmatpush1.bf16.msra.mxu1 %v6528_v41  ;;  %v6538_v9 = vld [vmem:[#allocation59_spill] sm:$0xff]  ;;  %v6539_v41 = vld [vmem:[#allocation60_spill] sm:$0xff] }
 0x6ee   : > { %2515 = vmatprep.subr.bf16.mxu0 %v6529_v60  ;;  %2556 = vmatprep.subr.bf16.mxu1 %v6530_v22  ;;  %v6540_v60 = vld [vmem:[#allocation61_spill] sm:$0xff]  ;;  %v6541_v22 = vld [vmem:[#allocation62_spill] sm:$0xff] }
 0x6f1   : > { %2516 = vmatpush1.bf16.msra.mxu0 %v6531_v2  ;;  %2557 = vmatpush1.bf16.msra.mxu1 %v6532_v18  ;;  %v6542_v2 = vld [vmem:[#allocation63_spill] sm:$0xff]  ;;  %v6543_v18 = vld [vmem:[#allocation64_spill] sm:$0xff] }
 0x6f2   : > { %2517 = vmatprep.subr.bf16.mxu0 %v6533_v59  ;;  %2558 = vmatprep.subr.bf16.mxu1 %v6534_v15  ;;  %v6544_v59 = vld [vmem:[#allocation65_spill] sm:$0xff]  ;;  %v6545_v15 = vld [vmem:[#allocation66_spill] sm:$0xff] }
 0x6f5   : > { %2518 = vmatpush2.bf16.msra.mxu0 %v6535_v3  ;;  %2559 = vmatpush2.bf16.msra.mxu1 %v6536_v36  ;;  %v6546_v3 = vld [vmem:[#allocation67_spill] sm:$0xff]  ;;  %v6547_v36 = vld [vmem:[#allocation68_spill] sm:$0xff] }
 0x6f6   : > { %2519 = vmatprep.subr.bf16.mxu0 %v6537_v12  ;;  %2560 = vmatprep.subr.bf16.mxu1 %v6538_v9  ;;  %v6548_v12 = vld [vmem:[#allocation69_spill] sm:$0xff]  ;;  %v6549_v9 = vld [vmem:[#allocation70_spill] sm:$0xff] }
 0x6f9   : > { %2520 = vmatpush2.bf16.msra.mxu0 %v6539_v41  ;;  %2561 = vmatpush2.bf16.msra.mxu1 %v6540_v60  ;;  %v6550_v41 = vld [vmem:[#allocation71_spill] sm:$0xff]  ;;  %v6551_v60 = vld [vmem:[#allocation72_spill] sm:$0xff] }
 0x6fa   : > { %2521 = vmatprep.subr.bf16.mxu0 %v6541_v22  ;;  %2562 = vmatprep.subr.bf16.mxu1 %v6542_v2  ;;  %v6552_v22 = vld [vmem:[#allocation73_spill] sm:$0xff]  ;;  %v6553_v2 = vld [vmem:[#allocation74_spill] sm:$0xff] }
 0x6fd   : > { %2522 = vmatpush2.bf16.msra.mxu0 %v6543_v18  ;;  %2563 = vmatpush2.bf16.msra.mxu1 %v6544_v59  ;;  %v6554_v18 = vld [vmem:[#allocation75_spill] sm:$0xff]  ;;  %v6555_v59 = vld [vmem:[#allocation76_spill] sm:$0xff] }
 0x6fe   : > { %2523 = vmatprep.subr.bf16.mxu0 %v6545_v15  ;;  %2564 = vmatprep.subr.bf16.mxu1 %v6546_v3  ;;  %v6556_v15 = vld [vmem:[#allocation77_spill] sm:$0xff]  ;;  %v6557_v3 = vld [vmem:[#allocation78_spill] sm:$0xff] }
 0x701   : > { %2524 = vmatpush2.bf16.msra.mxu0 %v6547_v36  ;;  %2565 = vmatpush2.bf16.msra.mxu1 %v6548_v12  ;;  %v6558_v36 = vld [vmem:[#allocation79_spill] sm:$0xff]  ;;  %v6559_v12 = vld [vmem:[#allocation80_spill] sm:$0xff] }
 0x702   : > { %2525 = vmatprep.subr.bf16.mxu0 %v6549_v9  ;;  %2566 = vmatprep.subr.bf16.mxu1 %v6550_v41  ;;  %v6560_v9 = vld [vmem:[#allocation81_spill] sm:$0xff]  ;;  %v6561_v41 = vld [vmem:[#allocation82_spill] sm:$0xff] }
 0x705   : > { %2526 = vmatpush2.bf16.msra.mxu0 %v6551_v60  ;;  %2567 = vmatpush2.bf16.msra.mxu1 %v6552_v22  ;;  %v6562_v60 = vld [vmem:[#allocation83_spill] sm:$0xff]  ;;  %v6563_v22 = vld [vmem:[#allocation84_spill] sm:$0xff] }
 0x706   : > { %2527 = vmatprep.subr.bf16.mxu0 %v6553_v2  ;;  %2568 = vmatprep.subr.bf16.mxu1 %v6554_v18  ;;  %v6564_v2 = vld [vmem:[#allocation85_spill] sm:$0xff]  ;;  %v6565_v18 = vld [vmem:[#allocation86_spill] sm:$0xff] }
 0x709   : > { %2528 = vmatpush2.bf16.msra.mxu0 %v6555_v59  ;;  %2569 = vmatpush2.bf16.msra.mxu1 %v6556_v15  ;;  %v6566_v15 = vld [vmem:[#allocation87_spill] sm:$0xff] }
 0x70a   : > { %2529 = vmatprep.subr.bf16.mxu0 %v6557_v3  ;;  %2570 = vmatprep.subr.bf16.mxu1 %v6558_v36 }
 0x70d   : > { %2530 = vmatpush2.bf16.msra.mxu0 %v6559_v12  ;;  %2571 = vmatpush2.bf16.msra.mxu1 %v6560_v9 }
 0x70e   : > { %2531 = vmatprep.subr.bf16.mxu0 %v6561_v41  ;;  %2572 = vmatprep.subr.bf16.mxu1 %v6562_v60  ;;  %v6567_v60 = vld [vmem:[#allocation150_spill] sm:$0xff] }
 0x711   : > { %2532 = vmatpush2.bf16.msra.mxu0 %v6563_v22  ;;  %2573 = vmatpush2.bf16.msra.mxu1 %v6564_v2 }
 0x712   : > { %2583 = vmatprep.subr.bf16.mxu0 %v6565_v18  ;;  %2624 = vmatprep.subr.bf16.mxu1 %v6566_v15 }
 0x754   : > { %v2296_v3 = vpop.f32.mrf.mxu0  ;;  %v2337_v59 = vpop.f32.mrf.mxu1 }
 0x756   : > { %v2298_v36 = vpop.f32.mrf.mxu0  ;;  %v2339_v25 = vpop.f32.mrf.mxu1 }
 0x757   : > { %v2455_v41 = vcombine.low %v2296_v3, %v2298_v36  ;;  %v2456_v58 = vcombine.low %v2337_v59, %v2339_v25  ;;  %v6569_v25 = vld [vmem:[#allocation152_spill] sm:$0xff] }
 0x758   : > { %v2300_v12 = vpop.f32.mrf.mxu0  ;;  %v2341_v13 = vpop.f32.mrf.mxu1 }
 0x759   : > { %v2463_v16 = vrot.slane %v2455_v41, %v6567_v60  ;;  %v2470_v22 = vrot.slane %v2456_v58, %v6567_v60  ;;  %v6568_v12 = vld [vmem:[#allocation151_spill] sm:$0xff] }
 0x75a   : > { %v2301_v9 = vpop.f32.mrf.mxu0  ;;  %v2342_v7 = vpop.f32.mrf.mxu1 }
 0x75b   : > { %v2471_v2 = vcombine.low %v2463_v16, %v2470_v22 }
 0x75d   : > { %v2473_v11 = vadd.f32 %v3366_v40, %v2471_v2 }
 0x75f   : > { %v2479_v18 = vrot.slane %v2473_v11, 2  ;;  %v2474_v15 = vmul.f32 0.5, %v2473_v11  ;;  %v2485_v9 = vrot.slane %v2473_v11, 4 }
 0x761   : > { %v2481_v17 = vmul.f32 0.5, %v2479_v18 }
 0x763   : > { %3569 = vtanh.f32 %v2481_v17 }
 0x764   : > { %3571 = vtanh.f32 %v2474_v15 }
 0x770   : > { %v3570_v2 = vpop.eup %3569 }
 0x771   : > { %v3572_v18 = vpop.eup %3571  ;;  %v2483_v15 = vmul.f32 0.5, %v3570_v2 }
 0x773   : > { %v2484_v60 = vadd.f32 0.5, %v2483_v15 }
 0x794   : > { %v2378_v31 = vpop.f32.mrf.mxu0  ;;  %v2419_v63 = vpop.f32.mrf.mxu1 }
 0x795   : > { %v2426_v13 = vadd.f32 %v2378_v31, %v6568_v12  ;;  %v2428_v17 = vadd.f32 %v2419_v63, %v4483_v56  ;;  %v2476_v31 = vmul.f32 0.5, %v3572_v18  ;;  %v2488_v12 = vrot.slane %v2473_v11, 6 }
 0x796   : > { %v2380_v7 = vpop.f32.mrf.mxu0  ;;  %v2421_v36 = vpop.f32.mrf.mxu1 }
 0x797   : > { %v2430_v59 = vmul.f32 0.5, %v2426_v13  ;;  %v2427_v41 = vadd.f32 %v2380_v7, %v6569_v25  ;;  %v2429_v13 = vadd.f32 %v2421_v36, %v4487_v49  ;;  %v2477_v7 = vadd.f32 0.5, %v2476_v31 }
 0x798   : > { %v2382_v3 = vpop.f32.mrf.mxu0  ;;  %v2423_v58 = vpop.f32.mrf.mxu1 }
 0x799   : > { %3573 = vtanh.f32 %v2430_v59  ;;  %v2434_v16 = vmul.f32 0.5, %v2427_v41  ;;  %v2490_v3 = vmul.f32 0.5, %v2488_v12  ;;  %v2439_v58 = vmul.f32 0.5, %v2429_v13 }
 0x79a   : > { %3575 = vtanh.f32 %v2485_v9  ;;  %v2383_v40 = vpop.f32.mrf.mxu0  ;;  %v2424_v22 = vpop.f32.mrf.mxu1  ;;  %v2494_v9 = vmul.f32 %v2484_v60, %v5123_v39 }
 0x79b   : > { %3577 = vtanh.f32 %v2434_v16 }
 0x79c   : > { %3579 = vtanh.f32 %v2428_v17 }
 0x79d   : > { %3581 = vtanh.f32 %v2490_v3 }
 0x79e   : > { %3583 = vtanh.f32 %v2439_v58 }
 0x7a6   : > { %v3574_v59 = vpop.eup %3573 }
 0x7a7   : > { %v3576_v41 = vpop.eup %3575  ;;  %v2432_v40 = vmul.f32 0.5, %v3574_v59 }
 0x7a8   : > { %v3578_v22 = vpop.eup %3577  ;;  %v2495_v25 = vmul.f32 %v3576_v41, %v2477_v7 }
 0x7a9   : > { %v2433_v63 = vadd.f32 0.5, %v2432_v40  ;;  %v2436_v16 = vmul.f32 0.5, %v3578_v22  ;;  %v3580_v17 = vpop.eup %3579  ;;  %v6571_v40 = vld [vmem:[#allocation127_spill] sm:$0xff]  ;;  %v6572_v22 = vld [vmem:[#allocation128_spill] sm:$0xff] }
 0x7aa   : > { %v5275_v2 = vadd.f32 %v2495_v25, %v2494_v9  ;;  %v3582_v39 = vpop.eup %3581 }
 0x7ab   : > { %v2437_v11 = vadd.f32 0.5, %v2436_v16  ;;  %v2444_v18 = vmul.f32 %v3580_v17, %v2433_v63  ;;  %v3584_v60 = vpop.eup %3583  ;;  %v2492_v15 = vmul.f32 0.5, %v3582_v39  ;;  %v6573_v63 = vld [vmem:[#allocation129_spill] sm:$0xff]  ;;  %v6574_v16 = vld [vmem:[#allocation130_spill] sm:$0xff]  ;;  %v6576_v17 = vld [vmem:[#allocation132_spill] sm:$0xff] }
 0x7ac   : > { %3585 = vtanh.f32 %v5275_v2  ;;  %v2441_v31 = vmul.f32 0.5, %v3584_v60  ;;  %v6579_v39 = vld [vmem:[#allocation135_spill] sm:$0xff]  ;;  %v6580_v60 = vld [vmem:[#allocation136_spill] sm:$0xff] }
 0x7ad   : > { %v2443_v36 = vmul.f32 %v2437_v11, %v5127_v5  ;;  %v2493_v7 = vadd.f32 0.5, %v2492_v15  ;;  %v6575_v11 = vld [vmem:[#allocation131_spill] sm:$0xff]  ;;  %v6581_v15 = vld [vmem:[#allocation137_spill] sm:$0xff] }
 0x7ae   : > { %v2442_v3 = vadd.f32 0.5, %v2441_v31  ;;  %v6582_v31 = vld [vmem:[#allocation138_spill] sm:$0xff] }
 0x7af   : > { %v5279_v12 = vadd.f32 %v2444_v18, %v2443_v36  ;;  %v6577_v36 = vld [vmem:[#allocation133_spill] sm:$0xff]  ;;  %v6578_v18 = vld [vmem:[#allocation134_spill] sm:$0xff] }
 0x7b1   : > { %3587 = vtanh.f32 %v5279_v12 }
 0x7b9   : > { %v3586_v13 = vpop.eup %3585 }
 0x7ba   : > { %v2498_v58 = vmul.f32 %v3586_v13, %v2493_v7  ;;  %v6583_v13 = vld [vmem:[#allocation139_spill] sm:$0xff]  ;;  %v6584_v7 = vld [vmem:[#allocation140_spill] sm:$0xff] }
 0x7bc   : > { %v5285_v41 = vpack.c.bf16 %v2498_v58, %v2498_v58  ;;  %v6587_v58 = vld [vmem:[#allocation143_spill] sm:$0xff] }
 0x7be   : > { %v3588_v25 = vpop.eup %3587 }
 0x7bf   : > { %v2447_v59 = vmul.f32 %v3588_v25, %v2442_v3  ;;  %v6585_v3 = vld [vmem:[#allocation141_spill] sm:$0xff]  ;;  %v6586_v25 = vld [vmem:[#allocation142_spill] sm:$0xff] }
 0x7c1   : > { %v5283_v9 = vadd.f32 %v2447_v59, %v5131_v10  ;;  %v2500_v5 = vpack.c.bf16 %v2447_v59, %v2447_v59  ;;  %v6570_v10 = vld [vmem:[#allocation126_spill] sm:$0xff]  ;;  %v6588_v59 = vld [vmem:[#allocation144_spill] sm:$0xff] }
 0x7c3   : > { %2533 = vmatprep.mubr.bf16.mxu0 %v2500_v5  ;;  %2574 = vmatprep.mubr.bf16.mxu1 %v2500_v5 }
 0x7c4   : > { %2534 = vmatmul.mubr.bf16.vlgmr.msra.gmra.mxu0 %v5285_v41  ;;  %2575 = vmatmul.mubr.bf16.vlgmr.msra.gmra.mxu1 %v5285_v41 }
 0x7c5   : > { %2584 = vmatpush1.bf16.msra.mxu0 %v6105_v24  ;;  %2625 = vmatpush1.bf16.msra.mxu1 %v6106_v26 }
 0x7c6   : > { %2615 = vmatprep.mubr.bf16.mxu0 %v2500_v5  ;;  %2656 = vmatprep.mubr.bf16.mxu1 %v2500_v5  ;;  %v6589_v5 = vld [vmem:[#allocation145_spill] sm:$0xff] }
 0x7c7   : > { %2585 = vmatprep.subr.bf16.mxu0 %v6107_v8  ;;  %2626 = vmatprep.subr.bf16.mxu1 %v6196_v34 }
 0x7c9   : > { %2586 = vmatpush1.bf16.msra.mxu0 %v6197_v48  ;;  %2627 = vmatpush1.bf16.msra.mxu1 %v6198_v35 }
 0x7ca   : > { %2587 = vmatprep.subr.bf16.mxu0 %v6199_v29  ;;  %2628 = vmatprep.subr.bf16.mxu1 %v6200_v28 }
 0x7cd   : > { %2588 = vmatpush1.bf16.msra.mxu0 %v6201_v55  ;;  %2629 = vmatpush1.bf16.msra.mxu1 %v6202_v52 }
 0x7ce   : > { %2589 = vmatprep.subr.bf16.mxu0 %v6203_v51  ;;  %2630 = vmatprep.subr.bf16.mxu1 %v6204_v42 }
 0x7d1   : > { %2590 = vmatpush1.bf16.msra.mxu0 %v6205_v1  ;;  %2631 = vmatpush1.bf16.msra.mxu1 %v6206_v27 }
 0x7d2   : > { %2591 = vmatprep.subr.bf16.mxu0 %v6291_v30  ;;  %2632 = vmatprep.subr.bf16.mxu1 %v6292_v21 }
 0x7d5   : > { %2592 = vmatpush1.bf16.msra.mxu0 %v6293_v4  ;;  %2633 = vmatpush1.bf16.msra.mxu1 %v6294_v0 }
 0x7d6   : > { %2593 = vmatprep.subr.bf16.mxu0 %v6295_v20  ;;  %2634 = vmatprep.subr.bf16.mxu1 %v6296_v33 }
 0x7d9   : > { %2594 = vmatpush1.bf16.msra.mxu0 %v6297_v54  ;;  %2635 = vmatpush1.bf16.msra.mxu1 %v6298_v6 }
 0x7da   : > { %2595 = vmatprep.subr.bf16.mxu0 %v6299_v57  ;;  %2636 = vmatprep.subr.bf16.mxu1 %v6300_v19 }
 0x7dd   : > { %2596 = vmatpush1.bf16.msra.mxu0 %v6301_v45  ;;  %2637 = vmatpush1.bf16.msra.mxu1 %v6302_v14 }
 0x7de   : > { %2597 = vmatprep.subr.bf16.mxu0 %v6219_v38  ;;  %2638 = vmatprep.subr.bf16.mxu1 %v6220_v37 }
 0x7e1   : > { %2598 = vmatpush1.bf16.msra.mxu0 %v6221_v62  ;;  %2639 = vmatpush1.bf16.msra.mxu1 %v6303_v32 }
 0x7e2   : > { %2599 = vmatprep.subr.bf16.mxu0 %v6223_v43  ;;  %2640 = vmatprep.subr.bf16.mxu1 %v6224_v61 }
 0x7e5   : > { %2600 = vmatpush2.bf16.msra.mxu0 %v6225_v23  ;;  %2641 = vmatpush2.bf16.msra.mxu1 %v6226_v50 }
 0x7e6   : > { %2601 = vmatprep.subr.bf16.mxu0 %v6227_v53  ;;  %2642 = vmatprep.subr.bf16.mxu1 %v6228_v44 }
 0x7e9   : > { %2602 = vmatpush2.bf16.msra.mxu0 %v6229_v46  ;;  %2643 = vmatpush2.bf16.msra.mxu1 %v6142_v47 }
 0x7ea   : > { %2603 = vmatprep.subr.bf16.mxu0 %v6570_v10  ;;  %2644 = vmatprep.subr.bf16.mxu1 %v6571_v40 }
 0x7ed   : > { %2604 = vmatpush2.bf16.msra.mxu0 %v6572_v22  ;;  %2645 = vmatpush2.bf16.msra.mxu1 %v6573_v63 }
 0x7ee   : > { %2605 = vmatprep.subr.bf16.mxu0 %v6574_v16  ;;  %2646 = vmatprep.subr.bf16.mxu1 %v6575_v11  ;;  %v3367_v16 = vld [vmem:[%s3995_s8 + $0x30] sm:$0xff] }
 0x7f1   : > { %2606 = vmatpush2.bf16.msra.mxu0 %v6576_v17  ;;  %2647 = vmatpush2.bf16.msra.mxu1 %v6577_v36 }
 0x7f2   : > { %2607 = vmatprep.subr.bf16.mxu0 %v6578_v18  ;;  %2648 = vmatprep.subr.bf16.mxu1 %v6579_v39  ;;  %v6590_v39 = vld [vmem:[#allocation146_spill] sm:$0xff] }
 0x7f5   : > { %2608 = vmatpush2.bf16.msra.mxu0 %v6580_v60  ;;  %2649 = vmatpush2.bf16.msra.mxu1 %v6581_v15  ;;  %v6591_v60 = vld [vmem:[#allocation147_spill] sm:$0xff]  ;;  %v6592_v15 = vld [vmem:[#allocation148_spill] sm:$0xff] }
 0x7f6   : > { %2609 = vmatprep.subr.bf16.mxu0 %v6582_v31  ;;  %2650 = vmatprep.subr.bf16.mxu1 %v6583_v13  ;;  %v6593_v31 = vld [vmem:[#allocation149_spill] sm:$0xff] }
 0x7f7   : > { %v6594_v13 = vld [vmem:[#allocation21_spill] sm:$0xff] }
 0x7f9   : > { %2610 = vmatpush2.bf16.msra.mxu0 %v6584_v7  ;;  %2651 = vmatpush2.bf16.msra.mxu1 %v6585_v3  ;;  %v6595_v7 = vld [vmem:[#allocation23_spill] sm:$0xff] }
 0x7fa   : > { %2611 = vmatprep.subr.bf16.mxu0 %v6586_v25  ;;  %2652 = vmatprep.subr.bf16.mxu1 %v6587_v58  ;;  %v6596_v58 = vld [vmem:[#allocation22_spill] sm:$0xff]  ;;  %v6605_v25 = vld [vmem:[#allocation32_spill] sm:$0xff] }
 0x7fd   : > { %2612 = vmatpush2.bf16.msra.mxu0 %v6588_v59  ;;  %2653 = vmatpush2.bf16.msra.mxu1 %v6589_v5  ;;  %v6597_v59 = vld [vmem:[#allocation24_spill] sm:$0xff]  ;;  %v6598_v5 = vld [vmem:[#allocation25_spill] sm:$0xff] }
 0x7fe   : > { %2613 = vmatprep.subr.bf16.mxu0 %v6590_v39  ;;  %2654 = vmatprep.subr.bf16.mxu1 %v6591_v60  ;;  %v6599_v39 = vld [vmem:[#allocation26_spill] sm:$0xff]  ;;  %v6600_v60 = vld [vmem:[#allocation27_spill] sm:$0xff] }
 0x801   : > { %2614 = vmatpush2.bf16.msra.mxu0 %v6592_v15  ;;  %2655 = vmatpush2.bf16.msra.mxu1 %v6593_v31  ;;  %v6601_v15 = vld [vmem:[#allocation28_spill] sm:$0xff]  ;;  %v6602_v31 = vld [vmem:[#allocation29_spill] sm:$0xff] }
 0x802   : > { %2740 = vmatprep.subr.bf16.mxu0 %v6594_v13  ;;  %2781 = vmatprep.subr.bf16.mxu1 %v6595_v7  ;;  %v6603_v13 = vld [vmem:[#allocation30_spill] sm:$0xff]  ;;  %v6604_v7 = vld [vmem:[#allocation31_spill] sm:$0xff] }
 0x804   : > { %2616 = vmatmul.mubr.bf16.vlgmr.msra.gmra.mxu0 %v5285_v41  ;;  %2657 = vmatmul.mubr.bf16.vlgmr.msra.gmra.mxu1 %v5285_v41  ;;  %v6606_v41 = vld [vmem:[#allocation33_spill] sm:$0xff] }
 0x805   : > { %2741 = vmatpush1.bf16.msra.mxu0 %v6596_v58  ;;  %2782 = vmatpush1.bf16.msra.mxu1 %v6597_v59  ;;  %v6607_v58 = vld [vmem:[#allocation34_spill] sm:$0xff]  ;;  %v6608_v59 = vld [vmem:[#allocation35_spill] sm:$0xff] }
 0x806   : > { %2742 = vmatprep.subr.bf16.mxu0 %v6598_v5  ;;  %2783 = vmatprep.subr.bf16.mxu1 %v6599_v39  ;;  %v6609_v5 = vld [vmem:[#allocation36_spill] sm:$0xff]  ;;  %v6610_v39 = vld [vmem:[#allocation37_spill] sm:$0xff] }
 0x809   : > { %2743 = vmatpush1.bf16.msra.mxu0 %v6600_v60  ;;  %2784 = vmatpush1.bf16.msra.mxu1 %v6601_v15  ;;  %v6611_v60 = vld [vmem:[#allocation38_spill] sm:$0xff]  ;;  %v6612_v15 = vld [vmem:[#allocation39_spill] sm:$0xff] }
 0x80a   : > { %2744 = vmatprep.subr.bf16.mxu0 %v6602_v31  ;;  %2785 = vmatprep.subr.bf16.mxu1 %v6603_v13  ;;  %v6613_v31 = vld [vmem:[#allocation40_spill] sm:$0xff]  ;;  %v6614_v13 = vld [vmem:[#allocation41_spill] sm:$0xff] }
 0x80d   : > { %2745 = vmatpush1.bf16.msra.mxu0 %v6604_v7  ;;  %2786 = vmatpush1.bf16.msra.mxu1 %v6605_v25  ;;  %v6615_v7 = vld [vmem:[#allocation42_spill] sm:$0xff]  ;;  %v6616_v25 = vld [vmem:[#allocation43_spill] sm:$0xff] }
 0x80e   : > { %2746 = vmatprep.subr.bf16.mxu0 %v6606_v41  ;;  %2787 = vmatprep.subr.bf16.mxu1 %v6607_v58  ;;  %v6617_v41 = vld [vmem:[#allocation44_spill] sm:$0xff]  ;;  %v6618_v58 = vld [vmem:[#allocation45_spill] sm:$0xff] }
 0x811   : > { %2747 = vmatpush1.bf16.msra.mxu0 %v6608_v59  ;;  %2788 = vmatpush1.bf16.msra.mxu1 %v6609_v5  ;;  %v6619_v59 = vld [vmem:[#allocation47_spill] sm:$0xff]  ;;  %v6620_v5 = vld [vmem:[#allocation48_spill] sm:$0xff] }
 0x812   : > { %2748 = vmatprep.subr.bf16.mxu0 %v6610_v39  ;;  %2789 = vmatprep.subr.bf16.mxu1 %v6611_v60  ;;  %v6621_v39 = vld [vmem:[#allocation49_spill] sm:$0xff]  ;;  %v6622_v60 = vld [vmem:[#allocation50_spill] sm:$0xff] }
 0x815   : > { %2749 = vmatpush1.bf16.msra.mxu0 %v6612_v15  ;;  %2790 = vmatpush1.bf16.msra.mxu1 %v6613_v31  ;;  %v6623_v15 = vld [vmem:[#allocation51_spill] sm:$0xff]  ;;  %v6624_v31 = vld [vmem:[#allocation52_spill] sm:$0xff] }
 0x816   : > { %2750 = vmatprep.subr.bf16.mxu0 %v6614_v13  ;;  %2791 = vmatprep.subr.bf16.mxu1 %v6615_v7  ;;  %v6625_v13 = vld [vmem:[#allocation53_spill] sm:$0xff]  ;;  %v6626_v7 = vld [vmem:[#allocation54_spill] sm:$0xff] }
 0x819   : > { %2751 = vmatpush1.bf16.msra.mxu0 %v6616_v25  ;;  %2792 = vmatpush1.bf16.msra.mxu1 %v6617_v41  ;;  %v6627_v25 = vld [vmem:[#allocation55_spill] sm:$0xff]  ;;  %v6628_v41 = vld [vmem:[#allocation56_spill] sm:$0xff] }
 0x81a   : > { %2752 = vmatprep.subr.bf16.mxu0 %v6618_v58  ;;  %2793 = vmatprep.subr.bf16.mxu1 %v6619_v59  ;;  %v6629_v58 = vld [vmem:[#allocation57_spill] sm:$0xff]  ;;  %v6630_v59 = vld [vmem:[#allocation58_spill] sm:$0xff] }
 0x81d   : > { %2753 = vmatpush1.bf16.msra.mxu0 %v6620_v5  ;;  %2794 = vmatpush1.bf16.msra.mxu1 %v6621_v39  ;;  %v6631_v5 = vld [vmem:[#allocation59_spill] sm:$0xff]  ;;  %v6632_v39 = vld [vmem:[#allocation60_spill] sm:$0xff] }
 0x81e   : > { %2754 = vmatprep.subr.bf16.mxu0 %v6622_v60  ;;  %2795 = vmatprep.subr.bf16.mxu1 %v6623_v15  ;;  %v6633_v60 = vld [vmem:[#allocation61_spill] sm:$0xff]  ;;  %v6634_v15 = vld [vmem:[#allocation62_spill] sm:$0xff] }
 0x821   : > { %2755 = vmatpush1.bf16.msra.mxu0 %v6624_v31  ;;  %2796 = vmatpush1.bf16.msra.mxu1 %v6625_v13  ;;  %v6635_v31 = vld [vmem:[#allocation63_spill] sm:$0xff]  ;;  %v6636_v13 = vld [vmem:[#allocation64_spill] sm:$0xff] }
 0x822   : > { %2756 = vmatprep.subr.bf16.mxu0 %v6626_v7  ;;  %2797 = vmatprep.subr.bf16.mxu1 %v6627_v25  ;;  %v6637_v7 = vld [vmem:[#allocation65_spill] sm:$0xff]  ;;  %v6638_v25 = vld [vmem:[#allocation66_spill] sm:$0xff] }
 0x825   : > { %2757 = vmatpush2.bf16.msra.mxu0 %v6628_v41  ;;  %2798 = vmatpush2.bf16.msra.mxu1 %v6629_v58  ;;  %v6639_v41 = vld [vmem:[#allocation67_spill] sm:$0xff]  ;;  %v6640_v58 = vld [vmem:[#allocation68_spill] sm:$0xff] }
 0x826   : > { %2758 = vmatprep.subr.bf16.mxu0 %v6630_v59  ;;  %2799 = vmatprep.subr.bf16.mxu1 %v6631_v5  ;;  %v6641_v59 = vld [vmem:[#allocation69_spill] sm:$0xff]  ;;  %v6642_v5 = vld [vmem:[#allocation70_spill] sm:$0xff] }
 0x829   : > { %2759 = vmatpush2.bf16.msra.mxu0 %v6632_v39  ;;  %2800 = vmatpush2.bf16.msra.mxu1 %v6633_v60  ;;  %v6643_v39 = vld [vmem:[#allocation71_spill] sm:$0xff]  ;;  %v6644_v60 = vld [vmem:[#allocation72_spill] sm:$0xff] }
 0x82a   : > { %2760 = vmatprep.subr.bf16.mxu0 %v6634_v15  ;;  %2801 = vmatprep.subr.bf16.mxu1 %v6635_v31  ;;  %v6645_v15 = vld [vmem:[#allocation73_spill] sm:$0xff]  ;;  %v6646_v31 = vld [vmem:[#allocation74_spill] sm:$0xff] }
 0x82d   : > { %2761 = vmatpush2.bf16.msra.mxu0 %v6636_v13  ;;  %2802 = vmatpush2.bf16.msra.mxu1 %v6637_v7  ;;  %v6647_v13 = vld [vmem:[#allocation75_spill] sm:$0xff]  ;;  %v6648_v7 = vld [vmem:[#allocation76_spill] sm:$0xff] }
 0x82e   : > { %2762 = vmatprep.subr.bf16.mxu0 %v6638_v25  ;;  %2803 = vmatprep.subr.bf16.mxu1 %v6639_v41  ;;  %v6649_v25 = vld [vmem:[#allocation77_spill] sm:$0xff]  ;;  %v6650_v41 = vld [vmem:[#allocation78_spill] sm:$0xff] }
 0x831   : > { %2763 = vmatpush2.bf16.msra.mxu0 %v6640_v58  ;;  %2804 = vmatpush2.bf16.msra.mxu1 %v6641_v59  ;;  %v6651_v58 = vld [vmem:[#allocation79_spill] sm:$0xff]  ;;  %v6652_v59 = vld [vmem:[#allocation80_spill] sm:$0xff] }
 0x832   : > { %2764 = vmatprep.subr.bf16.mxu0 %v6642_v5  ;;  %2805 = vmatprep.subr.bf16.mxu1 %v6643_v39  ;;  %v6653_v5 = vld [vmem:[#allocation81_spill] sm:$0xff]  ;;  %v6654_v39 = vld [vmem:[#allocation82_spill] sm:$0xff] }
 0x835   : > { %2765 = vmatpush2.bf16.msra.mxu0 %v6644_v60  ;;  %2806 = vmatpush2.bf16.msra.mxu1 %v6645_v15  ;;  %v6655_v60 = vld [vmem:[#allocation83_spill] sm:$0xff]  ;;  %v6656_v15 = vld [vmem:[#allocation84_spill] sm:$0xff] }
 0x836   : > { %2766 = vmatprep.subr.bf16.mxu0 %v6646_v31  ;;  %2807 = vmatprep.subr.bf16.mxu1 %v6647_v13  ;;  %v6657_v31 = vld [vmem:[#allocation85_spill] sm:$0xff]  ;;  %v6658_v13 = vld [vmem:[#allocation86_spill] sm:$0xff] }
 0x839   : > { %2767 = vmatpush2.bf16.msra.mxu0 %v6648_v7  ;;  %2808 = vmatpush2.bf16.msra.mxu1 %v6649_v25  ;;  %v6659_v7 = vld [vmem:[#allocation87_spill] sm:$0xff] }
 0x83a   : > { %2768 = vmatprep.subr.bf16.mxu0 %v6650_v41  ;;  %2809 = vmatprep.subr.bf16.mxu1 %v6651_v58 }
 0x83d   : > { %2769 = vmatpush2.bf16.msra.mxu0 %v6652_v59  ;;  %2810 = vmatpush2.bf16.msra.mxu1 %v6653_v5 }
 0x83e   : > { %2770 = vmatprep.subr.bf16.mxu0 %v6654_v39  ;;  %2811 = vmatprep.subr.bf16.mxu1 %v6655_v60  ;;  %v6660_v60 = vld [vmem:[#allocation150_spill] sm:$0xff] }
 0x841   : > { %2771 = vmatpush2.bf16.msra.mxu0 %v6656_v15  ;;  %2812 = vmatpush2.bf16.msra.mxu1 %v6657_v31 }
 0x842   : > { %2822 = vmatprep.subr.bf16.mxu0 %v6658_v13  ;;  %2863 = vmatprep.subr.bf16.mxu1 %v6659_v7 }
 0x884   : > { %v2535_v25 = vpop.f32.mrf.mxu0  ;;  %v2576_v41 = vpop.f32.mrf.mxu1 }
 0x886   : > { %v2537_v58 = vpop.f32.mrf.mxu0  ;;  %v2578_v3 = vpop.f32.mrf.mxu1 }
 0x887   : > { %v2694_v39 = vcombine.low %v2535_v25, %v2537_v58  ;;  %v2695_v17 = vcombine.low %v2576_v41, %v2578_v3  ;;  %v6662_v41 = vld [vmem:[#allocation152_spill] sm:$0xff] }
 0x888   : > { %v2539_v59 = vpop.f32.mrf.mxu0  ;;  %v2580_v18 = vpop.f32.mrf.mxu1 }
 0x889   : > { %v2702_v11 = vrot.slane %v2694_v39, %v6660_v60  ;;  %v2709_v15 = vrot.slane %v2695_v17, %v6660_v60  ;;  %v6661_v59 = vld [vmem:[#allocation151_spill] sm:$0xff] }
 0x88a   : > { %v2540_v5 = vpop.f32.mrf.mxu0  ;;  %v2581_v36 = vpop.f32.mrf.mxu1 }
 0x88b   : > { %v2710_v31 = vcombine.low %v2702_v11, %v2709_v15 }
 0x88d   : > { %v2712_v63 = vadd.f32 %v3367_v16, %v2710_v31 }
 0x88f   : > { %v2718_v13 = vrot.slane %v2712_v63, 2  ;;  %v2713_v7 = vmul.f32 0.5, %v2712_v63  ;;  %v2724_v5 = vrot.slane %v2712_v63, 4 }
 0x891   : > { %v2720_v22 = vmul.f32 0.5, %v2718_v13 }
 0x893   : > { %3589 = vtanh.f32 %v2720_v22 }
 0x894   : > { %3591 = vtanh.f32 %v2713_v7 }
 0x8a0   : > { %v3590_v31 = vpop.eup %3589 }
 0x8a1   : > { %v3592_v13 = vpop.eup %3591  ;;  %v2722_v7 = vmul.f32 0.5, %v3590_v31 }
 0x8a3   : > { %v2723_v60 = vadd.f32 0.5, %v2722_v7 }
 0x8c4   : > { %v2617_v40 = vpop.f32.mrf.mxu0  ;;  %v2658_v10 = vpop.f32.mrf.mxu1 }
 0x8c5   : > { %v2665_v18 = vadd.f32 %v2617_v40, %v6661_v59  ;;  %v2667_v22 = vadd.f32 %v2658_v10, %v4483_v56  ;;  %v2715_v40 = vmul.f32 0.5, %v3592_v13  ;;  %v2727_v59 = vrot.slane %v2712_v63, 6 }
 0x8c6   : > { %v2619_v36 = vpop.f32.mrf.mxu0  ;;  %v2660_v25 = vpop.f32.mrf.mxu1 }
 0x8c7   : > { %v2669_v3 = vmul.f32 0.5, %v2665_v18  ;;  %v2666_v58 = vadd.f32 %v2619_v36, %v6662_v41  ;;  %v2668_v18 = vadd.f32 %v2660_v25, %v4487_v49  ;;  %v2716_v36 = vadd.f32 0.5, %v2715_v40 }
 0x8c8   : > { %v2621_v39 = vpop.f32.mrf.mxu0  ;;  %v2662_v17 = vpop.f32.mrf.mxu1 }
 0x8c9   : > { %3593 = vtanh.f32 %v2669_v3  ;;  %v2673_v11 = vmul.f32 0.5, %v2666_v58  ;;  %v2729_v39 = vmul.f32 0.5, %v2727_v59  ;;  %v2678_v17 = vmul.f32 0.5, %v2668_v18 }
 0x8ca   : > { %3595 = vtanh.f32 %v2724_v5  ;;  %v2622_v16 = vpop.f32.mrf.mxu0  ;;  %v2663_v15 = vpop.f32.mrf.mxu1  ;;  %v2733_v5 = vmul.f32 %v2723_v60, %v5275_v2 }
 0x8cb   : > { %3597 = vtanh.f32 %v2673_v11 }
 0x8cc   : > { %3599 = vtanh.f32 %v2667_v22 }
 0x8cd   : > { %3601 = vtanh.f32 %v2729_v39 }
 0x8ce   : > { %3603 = vtanh.f32 %v2678_v17 }
 0x8d6   : > { %v3594_v3 = vpop.eup %3593 }
 0x8d7   : > { %v3596_v58 = vpop.eup %3595  ;;  %v2671_v16 = vmul.f32 0.5, %v3594_v3 }
 0x8d8   : > { %v3598_v15 = vpop.eup %3597  ;;  %v2734_v41 = vmul.f32 %v3596_v58, %v2716_v36 }
 0x8d9   : > { %v2672_v10 = vadd.f32 0.5, %v2671_v16  ;;  %v2675_v11 = vmul.f32 0.5, %v3598_v15  ;;  %v3600_v22 = vpop.eup %3599 }
 0x8da   : > { %v5427_v31 = vadd.f32 %v2734_v41, %v2733_v5  ;;  %v3602_v2 = vpop.eup %3601 }
 0x8db   : > { %v2676_v63 = vadd.f32 0.5, %v2675_v11  ;;  %v2683_v13 = vmul.f32 %v3600_v22, %v2672_v10  ;;  %v3604_v60 = vpop.eup %3603  ;;  %v2731_v7 = vmul.f32 0.5, %v3602_v2 }
 0x8dc   : > { %3605 = vtanh.f32 %v5427_v31  ;;  %v2680_v40 = vmul.f32 0.5, %v3604_v60 }
 0x8dd   : > { %v2682_v25 = vmul.f32 %v2676_v63, %v5279_v12  ;;  %v2732_v36 = vadd.f32 0.5, %v2731_v7 }
 0x8de   : > { %v2681_v39 = vadd.f32 0.5, %v2680_v40 }
 0x8df   : > { %v5431_v59 = vadd.f32 %v2683_v13, %v2682_v25 }
 0x8e1   : > { %3607 = vtanh.f32 %v5431_v59 }
 0x8e9   : > { %v3606_v18 = vpop.eup %3605 }
 0x8ea   : > { %v2737_v17 = vmul.f32 %v3606_v18, %v2732_v36 }
 0x8ec   : > { %v5437_v58 = vpack.c.bf16 %v2737_v17, %v2737_v17 }
 0x8ee   : > { %v3608_v41 = vpop.eup %3607 }
 0x8ef   : > { %v2686_v3 = vmul.f32 %v3608_v41, %v2681_v39 }
 0x8f1   : > { %v5435_v5 = vadd.f32 %v2686_v3, %v5283_v9  ;;  %v2739_v12 = vpack.c.bf16 %v2686_v3, %v2686_v3 }
 0x8f3   : > { %2772 = vmatprep.mubr.bf16.mxu0 %v2739_v12  ;;  %2813 = vmatprep.mubr.bf16.mxu1 %v2739_v12 }
 0x8f4   : > { %2773 = vmatmul.mubr.bf16.vlgmr.msra.gmra.mxu0 %v5437_v58  ;;  %2814 = vmatmul.mubr.bf16.vlgmr.msra.gmra.mxu1 %v5437_v58 }
 0x8f5   : > { %2823 = vmatpush1.bf16.msra.mxu0 %v6105_v24  ;;  %2864 = vmatpush1.bf16.msra.mxu1 %v6106_v26  ;;  %v6663_v24 = vld [vmem:[#allocation126_spill] sm:$0xff]  ;;  %v6664_v26 = vld [vmem:[#allocation127_spill] sm:$0xff] }
 0x8f6   : > { %2854 = vmatprep.mubr.bf16.mxu0 %v2739_v12  ;;  %2895 = vmatprep.mubr.bf16.mxu1 %v2739_v12 }
 0x8f7   : > { %2824 = vmatprep.subr.bf16.mxu0 %v6107_v8  ;;  %2865 = vmatprep.subr.bf16.mxu1 %v6196_v34  ;;  %v6665_v8 = vld [vmem:[#allocation128_spill] sm:$0xff]  ;;  %v6666_v34 = vld [vmem:[#allocation129_spill] sm:$0xff] }
 0x8f9   : > { %2825 = vmatpush1.bf16.msra.mxu0 %v6197_v48  ;;  %2866 = vmatpush1.bf16.msra.mxu1 %v6198_v35  ;;  %v6667_v48 = vld [vmem:[#allocation130_spill] sm:$0xff]  ;;  %v6668_v35 = vld [vmem:[#allocation131_spill] sm:$0xff] }
 0x8fa   : > { %2826 = vmatprep.subr.bf16.mxu0 %v6199_v29  ;;  %2867 = vmatprep.subr.bf16.mxu1 %v6200_v28  ;;  %v6669_v29 = vld [vmem:[#allocation132_spill] sm:$0xff]  ;;  %v6670_v28 = vld [vmem:[#allocation133_spill] sm:$0xff] }
 0x8fd   : > { %2827 = vmatpush1.bf16.msra.mxu0 %v6201_v55  ;;  %2868 = vmatpush1.bf16.msra.mxu1 %v6202_v52  ;;  %v6671_v55 = vld [vmem:[#allocation134_spill] sm:$0xff]  ;;  %v6672_v52 = vld [vmem:[#allocation135_spill] sm:$0xff] }
 0x8fe   : > { %2828 = vmatprep.subr.bf16.mxu0 %v6203_v51  ;;  %2869 = vmatprep.subr.bf16.mxu1 %v6204_v42  ;;  %v6674_v51 = vld [vmem:[#allocation137_spill] sm:$0xff]  ;;  %v6675_v42 = vld [vmem:[#allocation138_spill] sm:$0xff] }
 0x901   : > { %2829 = vmatpush1.bf16.msra.mxu0 %v6205_v1  ;;  %2870 = vmatpush1.bf16.msra.mxu1 %v6206_v27  ;;  %v6676_v1 = vld [vmem:[#allocation139_spill] sm:$0xff]  ;;  %v6677_v27 = vld [vmem:[#allocation140_spill] sm:$0xff] }
 0x902   : > { %2830 = vmatprep.subr.bf16.mxu0 %v6291_v30  ;;  %2871 = vmatprep.subr.bf16.mxu1 %v6292_v21 }
 0x905   : > { %2831 = vmatpush1.bf16.msra.mxu0 %v6293_v4  ;;  %2872 = vmatpush1.bf16.msra.mxu1 %v6294_v0 }
 0x906   : > { %2832 = vmatprep.subr.bf16.mxu0 %v6295_v20  ;;  %2873 = vmatprep.subr.bf16.mxu1 %v6296_v33 }
 0x909   : > { %2833 = vmatpush1.bf16.msra.mxu0 %v6297_v54  ;;  %2874 = vmatpush1.bf16.msra.mxu1 %v6298_v6  ;;  %v6687_v6 = vld [vmem:[#allocation150_spill] sm:$0xff] }
 0x90a   : > { %2834 = vmatprep.subr.bf16.mxu0 %v6299_v57  ;;  %2875 = vmatprep.subr.bf16.mxu1 %v6300_v19 }
 0x90d   : > { %2835 = vmatpush1.bf16.msra.mxu0 %v6301_v45  ;;  %2876 = vmatpush1.bf16.msra.mxu1 %v6302_v14  ;;  %v3368_v45 = vld [vmem:[%s3995_s8 + $0x38] sm:$0xff] }
 0x90e   : > { %2836 = vmatprep.subr.bf16.mxu0 %v6219_v38  ;;  %2877 = vmatprep.subr.bf16.mxu1 %v6220_v37  ;;  %v6679_v38 = vld [vmem:[#allocation142_spill] sm:$0xff]  ;;  %v6680_v37 = vld [vmem:[#allocation143_spill] sm:$0xff] }
 0x911   : > { %2837 = vmatpush1.bf16.msra.mxu0 %v6221_v62  ;;  %2878 = vmatpush1.bf16.msra.mxu1 %v6303_v32  ;;  %v6681_v62 = vld [vmem:[#allocation144_spill] sm:$0xff] }
 0x912   : > { %2838 = vmatprep.subr.bf16.mxu0 %v6223_v43  ;;  %2879 = vmatprep.subr.bf16.mxu1 %v6224_v61  ;;  %v6682_v43 = vld [vmem:[#allocation145_spill] sm:$0xff]  ;;  %v6683_v61 = vld [vmem:[#allocation146_spill] sm:$0xff] }
 0x915   : > { %2839 = vmatpush2.bf16.msra.mxu0 %v6225_v23  ;;  %2880 = vmatpush2.bf16.msra.mxu1 %v6226_v50  ;;  %v6684_v23 = vld [vmem:[#allocation147_spill] sm:$0xff]  ;;  %v6685_v50 = vld [vmem:[#allocation148_spill] sm:$0xff] }
 0x916   : > { %2840 = vmatprep.subr.bf16.mxu0 %v6227_v53  ;;  %2881 = vmatprep.subr.bf16.mxu1 %v6228_v44  ;;  %v6686_v53 = vld [vmem:[#allocation149_spill] sm:$0xff] }
 0x919   : > { %2841 = vmatpush2.bf16.msra.mxu0 %v6229_v46  ;;  %2882 = vmatpush2.bf16.msra.mxu1 %v6142_v47  ;;  %v6673_v47 = vld [vmem:[#allocation136_spill] sm:$0xff]  ;;  %v6678_v46 = vld [vmem:[#allocation141_spill] sm:$0xff] }
 0x91a   : > { %2842 = vmatprep.subr.bf16.mxu0 %v6663_v24  ;;  %2883 = vmatprep.subr.bf16.mxu1 %v6664_v26 }
 0x91d   : > { %2843 = vmatpush2.bf16.msra.mxu0 %v6665_v8  ;;  %2884 = vmatpush2.bf16.msra.mxu1 %v6666_v34 }
 0x91e   : > { %2844 = vmatprep.subr.bf16.mxu0 %v6667_v48  ;;  %2885 = vmatprep.subr.bf16.mxu1 %v6668_v35  ;;  %v6688_v48 = vld [vmem:[#allocation151_spill] sm:$0xff] }
 0x921   : > { %2845 = vmatpush2.bf16.msra.mxu0 %v6669_v29  ;;  %2886 = vmatpush2.bf16.msra.mxu1 %v6670_v28 }
 0x922   : > { %2846 = vmatprep.subr.bf16.mxu0 %v6671_v55  ;;  %2887 = vmatprep.subr.bf16.mxu1 %v6672_v52 }
 0x925   : > { %2847 = vmatpush2.bf16.msra.mxu0 %v6673_v47  ;;  %2888 = vmatpush2.bf16.msra.mxu1 %v6674_v51 }
 0x926   : > { %2848 = vmatprep.subr.bf16.mxu0 %v6675_v42  ;;  %2889 = vmatprep.subr.bf16.mxu1 %v6676_v1 }
 0x929   : > { %2849 = vmatpush2.bf16.msra.mxu0 %v6677_v27  ;;  %2890 = vmatpush2.bf16.msra.mxu1 %v6678_v46 }
 0x92a   : > { %2850 = vmatprep.subr.bf16.mxu0 %v6679_v38  ;;  %2891 = vmatprep.subr.bf16.mxu1 %v6680_v37 }
 0x92d   : > { %2851 = vmatpush2.bf16.msra.mxu0 %v6681_v62  ;;  %2892 = vmatpush2.bf16.msra.mxu1 %v6682_v43 }
 0x92e   : > { %2852 = vmatprep.subr.bf16.mxu0 %v6683_v61  ;;  %2893 = vmatprep.subr.bf16.mxu1 %v6684_v23 }
 0x931   : > { %2853 = vmatpush2.bf16.msra.mxu0 %v6685_v50  ;;  %2894 = vmatpush2.bf16.msra.mxu1 %v6686_v53 }
 0x934   : > { %2855 = vmatmul.mubr.bf16.vlgmr.msra.gmra.mxu0 %v5437_v58  ;;  %2896 = vmatmul.mubr.bf16.vlgmr.msra.gmra.mxu1 %v5437_v58 }
 0x9b4   : > { %v2774_v44 = vpop.f32.mrf.mxu0  ;;  %v2815_v30 = vpop.f32.mrf.mxu1 }
 0x9b6   : > { %v2776_v21 = vpop.f32.mrf.mxu0  ;;  %v2817_v4 = vpop.f32.mrf.mxu1 }
 0x9b7   : > { %v2933_v0 = vcombine.low %v2774_v44, %v2776_v21  ;;  %v2934_v20 = vcombine.low %v2815_v30, %v2817_v4 }
 0x9b8   : > { %v2778_v33 = vpop.f32.mrf.mxu0  ;;  %v2819_v54 = vpop.f32.mrf.mxu1 }
 0x9b9   : > { %v2941_v57 = vrot.slane %v2933_v0, %v6687_v6  ;;  %v2948_v19 = vrot.slane %v2934_v20, %v6687_v6 }
 0x9ba   : > { %v2779_v14 = vpop.f32.mrf.mxu0  ;;  %v2820_v32 = vpop.f32.mrf.mxu1 }
 0x9bb   : > { %v2949_v9 = vcombine.low %v2941_v57, %v2948_v19 }
 0x9bd   : > { %v2951_v16 = vadd.f32 %v3368_v45, %v2949_v9 }
 0x9bf   : > { %v2952_v15 = vmul.f32 0.5, %v2951_v16  ;;  %v2957_v10 = vrot.slane %v2951_v16, 2  ;;  %v2963_v63 = vrot.slane %v2951_v16, 4  ;;  %v2966_v22 = vrot.slane %v2951_v16, 6 }
 0x9c1   : > { %3609 = vtanh.f32 %v2952_v15  ;;  %v2959_v11 = vmul.f32 0.5, %v2957_v10  ;;  %v2968_v25 = vmul.f32 0.5, %v2966_v22 }
 0x9c3   : > { %3611 = vtanh.f32 %v2959_v11 }
 0x9c4   : > { %3613 = vtanh.f32 %v2963_v63 }
 0x9c5   : > { %3615 = vtanh.f32 %v2968_v25 }
 0x9ce   : > { %v3610_v13 = vpop.eup %3609 }
 0x9cf   : > { %v2954_v2 = vmul.f32 0.5, %v3610_v13 }
 0x9d0   : > { %v3612_v60 = vpop.eup %3611 }
 0x9d1   : > { %v2955_v7 = vadd.f32 0.5, %v2954_v2  ;;  %v2961_v40 = vmul.f32 0.5, %v3612_v60  ;;  %v3614_v36 = vpop.eup %3613 }
 0x9d2   : > { %v3616_v3 = vpop.eup %3615 }
 0x9d3   : > { %v2962_v18 = vadd.f32 0.5, %v2961_v40  ;;  %v2973_v41 = vmul.f32 %v3614_v36, %v2955_v7  ;;  %v2970_v12 = vmul.f32 0.5, %v3616_v3 }
 0x9d5   : > { %v2972_v39 = vmul.f32 %v2962_v18, %v5427_v31  ;;  %v2971_v58 = vadd.f32 0.5, %v2970_v12  ;;  %v6689_v31 = vld [vmem:[#allocation152_spill] sm:$0xff] }
 0x9d7   : > { %v2974_v17 = vadd.f32 %v2973_v41, %v2972_v39 }
 0x9d9   : > { %3617 = vtanh.f32 %v2974_v17  ;;  %2978 = vst [vmem:[#allocation3] sm:$0x3] %v2974_v17 }
 0x9e6   : > { %v3618_v24 = vpop.eup %3617 }
 0x9e7   : > { %v5509_v26 = vmul.f32 %v3618_v24, %v2971_v58 }
 0x9e9   : > { %2977 = vst [vmem:[#allocation2] sm:$0x3] %v5509_v26 }
 0x9f4   : > { %v2856_v8 = vpop.f32.mrf.mxu0  ;;  %v2897_v34 = vpop.f32.mrf.mxu1 }
 0x9f5   : > { %v2904_v35 = vadd.f32 %v2856_v8, %v6688_v48  ;;  %v2906_v46 = vadd.f32 %v2897_v34, %v4483_v56 }
 0x9f6   : > { %v2858_v29 = vpop.f32.mrf.mxu0  ;;  %v2899_v28 = vpop.f32.mrf.mxu1 }
 0x9f7   : > { %v2908_v55 = vmul.f32 0.5, %v2904_v35  ;;  %v2905_v52 = vadd.f32 %v2858_v29, %v6689_v31  ;;  %v2907_v38 = vadd.f32 %v2899_v28, %v4487_v49 }
 0x9f8   : > { %v2860_v47 = vpop.f32.mrf.mxu0  ;;  %v2901_v51 = vpop.f32.mrf.mxu1 }
 0x9f9   : > { %3619 = vtanh.f32 %v2908_v55  ;;  %v2912_v42 = vmul.f32 0.5, %v2905_v52  ;;  %v2917_v37 = vmul.f32 0.5, %v2907_v38 }
 0x9fa   : > { %v2861_v1 = vpop.f32.mrf.mxu0  ;;  %v2902_v27 = vpop.f32.mrf.mxu1 }
 0x9fb   : > { %3621 = vtanh.f32 %v2912_v42 }
 0x9fc   : > { %3623 = vtanh.f32 %v2906_v46 }
 0x9fd   : > { %3625 = vtanh.f32 %v2917_v37 }
 0xa06   : > { %v3620_v62 = vpop.eup %3619 }
 0xa07   : > { %v2910_v43 = vmul.f32 0.5, %v3620_v62 }
 0xa08   : > { %v3622_v61 = vpop.eup %3621 }
 0xa09   : > { %v2911_v23 = vadd.f32 0.5, %v2910_v43  ;;  %v2914_v50 = vmul.f32 0.5, %v3622_v61  ;;  %v3624_v44 = vpop.eup %3623 }
 0xa0a   : > { %v3626_v0 = vpop.eup %3625 }
 0xa0b   : > { %v2915_v53 = vadd.f32 0.5, %v2914_v50  ;;  %v2922_v21 = vmul.f32 %v3624_v44, %v2911_v23  ;;  %v2919_v20 = vmul.f32 0.5, %v3626_v0 }
 0xa0d   : > { %v2921_v30 = vmul.f32 %v2915_v53, %v5431_v59  ;;  %v2920_v33 = vadd.f32 0.5, %v2919_v20 }
 0xa0f   : > { %v5517_v4 = vadd.f32 %v2922_v21, %v2921_v30 }
 0xa11   : > { %3627 = vtanh.f32 %v5517_v4  ;;  %2980 = vst [vmem:[#allocation5] sm:$0x3] %v5517_v4 }
 0xa1e   : > { %v3628_v54 = vpop.eup %3627 }
 0xa1f   : > { %v2925_v6 = vmul.f32 %v3628_v54, %v2920_v33  ;;  %2985 = sbr.rel (%p3369_p12) target bundleno = 2903 (0xb57), region = 52 }
 0xa21   : > { %v5522_v57 = vadd.f32 %v2925_v6, %v5435_v5  ;;  %2979 = vst [vmem:[#allocation4] sm:$0x3] %v2925_v6 }
 0xa23   : > { %2981 = vst [vmem:[#allocation6] sm:$0x3] %v5522_v57 }
 0xa24   : > { %v6690_v59 = vld [vmem:[#allocation86_spill] sm:$0xff]  ;;  %v6691_v19 = vld [vmem:[#allocation87_spill] sm:$0xff]  ;;  %v2987_v45 = vpack.c.bf16 %v2925_v6, %v2925_v6  ;;  %3091 = vst [vmem:[#allocation14] sm:$0x3] %v5509_v26  ;;  %3094 = vst [vmem:[#allocation16] sm:$0x3] %v2974_v17 }
 0xa25   : > { %2988 = vmatprep.subr.bf16.mxu0 %v6690_v59  ;;  %3029 = vmatprep.subr.bf16.mxu1 %v6691_v19  ;;  %v6692_v14 = vld [vmem:[#allocation88_spill] sm:$0xff]  ;;  %v6693_v32 = vld [vmem:[#allocation89_spill] sm:$0xff]  ;;  %v6694_v5 = vld [vmem:[#allocation90_spill] sm:$0xff] }
 0xa26   : > { %2989 = vmatpush1.bf16.msra.mxu0 %v6692_v14  ;;  %3030 = vmatpush1.bf16.msra.mxu1 %v6693_v32  ;;  %v6695_v9 = vld [vmem:[#allocation91_spill] sm:$0xff]  ;;  %v6696_v16 = vld [vmem:[#allocation92_spill] sm:$0xff]  ;;  %v6697_v15 = vld [vmem:[#allocation93_spill] sm:$0xff]  ;;  %v2986_v32 = vpack.c.bf16 %v5509_v26, %v5509_v26 }
 0xa27   : > { %2990 = vmatprep.subr.bf16.mxu0 %v6694_v5  ;;  %3031 = vmatprep.subr.bf16.mxu1 %v6695_v9  ;;  %v6698_v10 = vld [vmem:[#allocation94_spill] sm:$0xff]  ;;  %v6699_v11 = vld [vmem:[#allocation95_spill] sm:$0xff]  ;;  %v6700_v63 = vld [vmem:[#allocation96_spill] sm:$0xff] }
 0xa28   : > { %3020 = vmatprep.mubr.bf16.mxu0 %v2987_v45  ;;  %3061 = vmatprep.mubr.bf16.mxu1 %v2987_v45  ;;  %v6701_v22 = vld [vmem:[#allocation97_spill] sm:$0xff]  ;;  %v6702_v25 = vld [vmem:[#allocation98_spill] sm:$0xff]  ;;  %v6703_v13 = vld [vmem:[#allocation99_spill] sm:$0xff] }
 0xa29   : > { %v6704_v2 = vld [vmem:[#allocation100_spill] sm:$0xff]  ;;  %v6705_v60 = vld [vmem:[#allocation101_spill] sm:$0xff]  ;;  %v6706_v7 = vld [vmem:[#allocation102_spill] sm:$0xff] }
 0xa2a   : > { %2991 = vmatpush1.bf16.msra.mxu0 %v6696_v16  ;;  %3032 = vmatpush1.bf16.msra.mxu1 %v6697_v15  ;;  %v6707_v40 = vld [vmem:[#allocation103_spill] sm:$0xff]  ;;  %v6708_v18 = vld [vmem:[#allocation104_spill] sm:$0xff]  ;;  %v6709_v36 = vld [vmem:[#allocation105_spill] sm:$0xff] }
 0xa2b   : > { %2992 = vmatprep.subr.bf16.mxu0 %v6698_v10  ;;  %3033 = vmatprep.subr.bf16.mxu1 %v6699_v11  ;;  %v6710_v39 = vld [vmem:[#allocation106_spill] sm:$0xff]  ;;  %v6711_v41 = vld [vmem:[#allocation107_spill] sm:$0xff]  ;;  %v6712_v17 = vld [vmem:[#allocation108_spill] sm:$0xff] }
 0xa2c   : > { %v6713_v3 = vld [vmem:[#allocation109_spill] sm:$0xff]  ;;  %v6714_v12 = vld [vmem:[#allocation110_spill] sm:$0xff]  ;;  %v6715_v58 = vld [vmem:[#allocation111_spill] sm:$0xff] }
 0xa2d   : > { %v6716_v24 = vld [vmem:[#allocation112_spill] sm:$0xff]  ;;  %v6717_v8 = vld [vmem:[#allocation113_spill] sm:$0xff]  ;;  %v6718_v34 = vld [vmem:[#allocation114_spill] sm:$0xff] }
 0xa2e   : > { %2993 = vmatpush1.bf16.msra.mxu0 %v6700_v63  ;;  %3034 = vmatpush1.bf16.msra.mxu1 %v6701_v22  ;;  %v6719_v48 = vld [vmem:[#allocation115_spill] sm:$0xff]  ;;  %v6720_v35 = vld [vmem:[#allocation116_spill] sm:$0xff]  ;;  %v6721_v29 = vld [vmem:[#allocation117_spill] sm:$0xff] }
 0xa2f   : > { %2994 = vmatprep.subr.bf16.mxu0 %v6702_v25  ;;  %3035 = vmatprep.subr.bf16.mxu1 %v6703_v13  ;;  %v6722_v28 = vld [vmem:[#allocation118_spill] sm:$0xff]  ;;  %v6723_v55 = vld [vmem:[#allocation119_spill] sm:$0xff]  ;;  %v6724_v31 = vld [vmem:[#allocation120_spill] sm:$0xff] }
 0xa30   : > { %v6725_v52 = vld [vmem:[#allocation121_spill] sm:$0xff]  ;;  %v6726_v47 = vld [vmem:[#allocation122_spill] sm:$0xff]  ;;  %v6727_v51 = vld [vmem:[#allocation123_spill] sm:$0xff] }
 0xa31   : > { %v6728_v42 = vld [vmem:[#allocation124_spill] sm:$0xff]  ;;  %v6729_v1 = vld [vmem:[#allocation125_spill] sm:$0xff]  ;;  %v6730_v27 = vld [vmem:[#allocation126_spill] sm:$0xff] }
 0xa32   : > { %2995 = vmatpush1.bf16.msra.mxu0 %v6704_v2  ;;  %3036 = vmatpush1.bf16.msra.mxu1 %v6705_v60  ;;  %v6731_v46 = vld [vmem:[#allocation127_spill] sm:$0xff]  ;;  %v6732_v38 = vld [vmem:[#allocation128_spill] sm:$0xff]  ;;  %v6733_v37 = vld [vmem:[#allocation129_spill] sm:$0xff] }
 0xa33   : > { %2996 = vmatprep.subr.bf16.mxu0 %v6706_v7  ;;  %3037 = vmatprep.subr.bf16.mxu1 %v6707_v40  ;;  %v6734_v62 = vld [vmem:[#allocation130_spill] sm:$0xff]  ;;  %v6735_v43 = vld [vmem:[#allocation131_spill] sm:$0xff]  ;;  %v6736_v61 = vld [vmem:[#allocation132_spill] sm:$0xff] }
 0xa34   : > { %v6737_v23 = vld [vmem:[#allocation133_spill] sm:$0xff]  ;;  %v6738_v50 = vld [vmem:[#allocation134_spill] sm:$0xff]  ;;  %v6739_v53 = vld [vmem:[#allocation135_spill] sm:$0xff] }
 0xa35   : > { %v6740_v44 = vld [vmem:[#allocation136_spill] sm:$0xff]  ;;  %v6741_v30 = vld [vmem:[#allocation137_spill] sm:$0xff]  ;;  %v6742_v21 = vld [vmem:[#allocation138_spill] sm:$0xff] }
 0xa36   : > { %2997 = vmatpush1.bf16.msra.mxu0 %v6708_v18  ;;  %3038 = vmatpush1.bf16.msra.mxu1 %v6709_v36  ;;  %v6743_v0 = vld [vmem:[#allocation139_spill] sm:$0xff]  ;;  %v6744_v20 = vld [vmem:[#allocation140_spill] sm:$0xff]  ;;  %v6745_v33 = vld [vmem:[#allocation141_spill] sm:$0xff] }
 0xa37   : > { %2998 = vmatprep.subr.bf16.mxu0 %v6710_v39  ;;  %3039 = vmatprep.subr.bf16.mxu1 %v6711_v41  ;;  %v6746_v54 = vld [vmem:[#allocation142_spill] sm:$0xff]  ;;  %v6747_v6 = vld [vmem:[#allocation143_spill] sm:$0xff]  ;;  %v6748_v59 = vld [vmem:[#allocation144_spill] sm:$0xff] }
 0xa38   : > { %v6749_v19 = vld [vmem:[#allocation145_spill] sm:$0xff]  ;;  %v6750_v45 = vld [vmem:[#allocation146_spill] sm:$0xff]  ;;  %v6751_v14 = vld [vmem:[#allocation147_spill] sm:$0xff] }
 0xa39   : > { %v6752_v5 = vld [vmem:[#allocation148_spill] sm:$0xff]  ;;  %v6753_v9 = vld [vmem:[#allocation149_spill] sm:$0xff]  ;;  %v6754_v10 = vld [vmem:[#allocation151_spill] sm:$0xff] }
 0xa3a   : > { %2999 = vmatpush1.bf16.msra.mxu0 %v6712_v17  ;;  %3040 = vmatpush1.bf16.msra.mxu1 %v6713_v3  ;;  %v6755_v13 = vld [vmem:[#allocation152_spill] sm:$0xff] }
 0xa3b   : > { %3000 = vmatprep.subr.bf16.mxu0 %v6714_v12  ;;  %3041 = vmatprep.subr.bf16.mxu1 %v6715_v58 }
 0xa3e   : > { %3001 = vmatpush1.bf16.msra.mxu0 %v6716_v24  ;;  %3042 = vmatpush1.bf16.msra.mxu1 %v6717_v8 }
 0xa3f   : > { %3002 = vmatprep.subr.bf16.mxu0 %v6718_v34  ;;  %3043 = vmatprep.subr.bf16.mxu1 %v6719_v48 }
 0xa42   : > { %3003 = vmatpush1.bf16.msra.mxu0 %v6720_v35  ;;  %3044 = vmatpush1.bf16.msra.mxu1 %v6721_v29 }
 0xa43   : > { %3004 = vmatprep.subr.bf16.mxu0 %v6722_v28  ;;  %3045 = vmatprep.subr.bf16.mxu1 %v6723_v55 }
 0xa46   : > { %3005 = vmatpush2.bf16.msra.mxu0 %v6724_v31  ;;  %3046 = vmatpush2.bf16.msra.mxu1 %v6725_v52 }
 0xa47   : > { %3006 = vmatprep.subr.bf16.mxu0 %v6726_v47  ;;  %3047 = vmatprep.subr.bf16.mxu1 %v6727_v51 }
 0xa4a   : > { %3007 = vmatpush2.bf16.msra.mxu0 %v6728_v42  ;;  %3048 = vmatpush2.bf16.msra.mxu1 %v6729_v1 }
 0xa4b   : > { %3008 = vmatprep.subr.bf16.mxu0 %v6730_v27  ;;  %3049 = vmatprep.subr.bf16.mxu1 %v6731_v46 }
 0xa4e   : > { %3009 = vmatpush2.bf16.msra.mxu0 %v6732_v38  ;;  %3050 = vmatpush2.bf16.msra.mxu1 %v6733_v37 }
 0xa4f   : > { %3010 = vmatprep.subr.bf16.mxu0 %v6734_v62  ;;  %3051 = vmatprep.subr.bf16.mxu1 %v6735_v43 }
 0xa52   : > { %3011 = vmatpush2.bf16.msra.mxu0 %v6736_v61  ;;  %3052 = vmatpush2.bf16.msra.mxu1 %v6737_v23 }
 0xa53   : > { %3012 = vmatprep.subr.bf16.mxu0 %v6738_v50  ;;  %3053 = vmatprep.subr.bf16.mxu1 %v6739_v53 }
 0xa56   : > { %3013 = vmatpush2.bf16.msra.mxu0 %v6740_v44  ;;  %3054 = vmatpush2.bf16.msra.mxu1 %v6741_v30 }
 0xa57   : > { %3014 = vmatprep.subr.bf16.mxu0 %v6742_v21  ;;  %3055 = vmatprep.subr.bf16.mxu1 %v6743_v0 }
 0xa5a   : > { %3015 = vmatpush2.bf16.msra.mxu0 %v6744_v20  ;;  %3056 = vmatpush2.bf16.msra.mxu1 %v6745_v33 }
 0xa5b   : > { %3016 = vmatprep.subr.bf16.mxu0 %v6746_v54  ;;  %3057 = vmatprep.subr.bf16.mxu1 %v6747_v6 }
 0xa5e   : > { %3017 = vmatpush2.bf16.msra.mxu0 %v6748_v59  ;;  %3058 = vmatpush2.bf16.msra.mxu1 %v6749_v19 }
 0xa5f   : > { %3018 = vmatprep.subr.bf16.mxu0 %v6750_v45  ;;  %3059 = vmatprep.subr.bf16.mxu1 %v6751_v14 }
 0xa62   : > { %3019 = vmatpush2.bf16.msra.mxu0 %v6752_v5  ;;  %3060 = vmatpush2.bf16.msra.mxu1 %v6753_v9 }
 0xa65   : > { %3021 = vmatmul.mubr.bf16.vlgmr.msra.gmra.mxu0 %v2986_v32  ;;  %3062 = vmatmul.mubr.bf16.vlgmr.msra.gmra.mxu1 %v2986_v32 }
 0xb25   : > { %v3022_v16 = vpop.f32.mrf.mxu0  ;;  %v3063_v15 = vpop.f32.mrf.mxu1 }
 0xb26   : > { %v3023_v11 = vadd.f32 %v3022_v16, %v6754_v10  ;;  %v3064_v26 = vadd.f32 %v3063_v15, %v4483_v56 }
 0xb27   : > { %v3024_v63 = vpop.f32.mrf.mxu0  ;;  %v3065_v22 = vpop.f32.mrf.mxu1 }
 0xb28   : > { %v3070_v25 = vmul.f32 0.5, %v3023_v11  ;;  %v3025_v2 = vadd.f32 %v3024_v63, %v6755_v13  ;;  %v3066_v39 = vadd.f32 %v3065_v22, %v4487_v49 }
 0xb29   : > { %v3026_v60 = vpop.f32.mrf.mxu0  ;;  %v3067_v7 = vpop.f32.mrf.mxu1 }
 0xb2a   : > { %3629 = vtanh.f32 %v3070_v25  ;;  %v3074_v40 = vmul.f32 0.5, %v3025_v2  ;;  %v3079_v41 = vmul.f32 0.5, %v3066_v39 }
 0xb2b   : > { %v3027_v18 = vpop.f32.mrf.mxu0  ;;  %v3068_v36 = vpop.f32.mrf.mxu1 }
 0xb2c   : > { %3631 = vtanh.f32 %v3074_v40 }
 0xb2d   : > { %3633 = vtanh.f32 %v3064_v26 }
 0xb2e   : > { %3635 = vtanh.f32 %v3079_v41 }
 0xb37   : > { %v3630_v17 = vpop.eup %3629 }
 0xb38   : > { %v3072_v3 = vmul.f32 0.5, %v3630_v17 }
 0xb39   : > { %v3632_v12 = vpop.eup %3631 }
 0xb3a   : > { %v3073_v58 = vadd.f32 0.5, %v3072_v3  ;;  %v3076_v24 = vmul.f32 0.5, %v3632_v12  ;;  %v3634_v8 = vpop.eup %3633 }
 0xb3b   : > { %v3636_v56 = vpop.eup %3635 }
 0xb3c   : > { %v3077_v34 = vadd.f32 0.5, %v3076_v24  ;;  %v3084_v35 = vmul.f32 %v3634_v8, %v3073_v58  ;;  %v3081_v28 = vmul.f32 0.5, %v3636_v56 }
 0xb3e   : > { %v3083_v48 = vmul.f32 %v3077_v34, %v5517_v4  ;;  %v3082_v55 = vadd.f32 0.5, %v3081_v28 }
 0xb40   : > { %v3085_v29 = vadd.f32 %v3084_v35, %v3083_v48 }
 0xb42   : > { %3637 = vtanh.f32 %v3085_v29  ;;  %3096 = vst [vmem:[#allocation16 + $0x2] sm:$0x3] %v3085_v29 }
 0xb4f   : > { %v3638_v31 = vpop.eup %3637 }
 0xb50   : > { %v3087_v49 = vmul.f32 %v3638_v31, %v3082_v55 }
 0xb52   : > { %v3088_v52 = vadd.f32 %v3087_v49, %v5522_v57  ;;  %3093 = vst [vmem:[#allocation14 + $0x2] sm:$0x3] %v3087_v49 }
 0xb54   : > { %v3089_v47 = vmul.f32 0.0625, %v3088_v52 }
 0xb56   : > { %3090 = vst [vmem:[#allocation13] sm:$0x3] %v3089_v47 }
 0xb57 PF: > { %p3418_p1 = scmp.eq.s32.totalorder %s3902_s22, 1  ;;  %s3848_s24 = smov [#allocation14]  }
 0xb58   : > { %s3114_s28 = sshll.u32 %s3848_s24, 4  ;;  %s3115_s28 = int_to_ptr.vmem [resolvable:$true] %s3114_s28 }
 0xb59   : > { %s3719_s30 = scalar_lea.vmem %s3115_s28, 64  ;;  %p3726_p2 = scmp.lt.s32.totalorder %s3115_s28, %s3115_s28 }
 0xb5a   : > { %p3720_p4 = scmp.ne.s32.totalorder %s3115_s28, %s3719_s30  ;;  %p3727_p3 = scmp.lt.s32.totalorder %s3719_s30, %s3719_s30 }
 0xb5c   : > { %p3721_p9 = pnand %p3720_p4, %p3418_p1  ;;  %p3728_p10 = por %p3727_p3, %p3726_p2 }
 0xb5e   : > { %p3722_p0 = pneg %p3721_p9 }
 0xb60   : > { %p3729_p7 = pnand %p3728_p10, %p3722_p0 }
 0xb62   : > { %3732 = shalt.err (!%p3729_p7)
}
 0xb63   : > { %s3849_s6 = smov 32   ;;  %s3850_s7 = smov 2  }
 0xb64   : > { %3393 = dma.vmem_to_hbm [thread:$0]  (%p3418_p1), %s3115_s28, 64, %s5652_s4, [#allocation15], %s3849_s6, %s3849_s6, %s3850_s7  }
 0xb65   : > { %s3851_s11 = smov [#allocation13]   ;;  %s3852_s14 = smov [#allocation16]  }
 0xb66   : > { %s3104_s12 = sshll.u32 %s3851_s11, 4  ;;  %s3127_s15 = sshll.u32 %s3852_s14, 4  ;;  %s3105_s12 = int_to_ptr.vmem [resolvable:$true] %s3104_s12  ;;  %s3128_s15 = int_to_ptr.vmem [resolvable:$true] %s3127_s15 }
 0xb67   : > { %s3743_s16 = scalar_lea.vmem %s3105_s12, 32  ;;  %p3750_p11 = scmp.lt.s32.totalorder %s3105_s12, %s3105_s12 }
 0xb68   : > { %p3744_p5 = scmp.ne.s32.totalorder %s3105_s12, %s3743_s16  ;;  %p3751_p13 = scmp.lt.s32.totalorder %s3743_s16, %s3743_s16 }
 0xb6a   : > { %p3745_p6 = pnand %p3744_p5, %p3418_p1  ;;  %p3752_p12 = por %p3751_p13, %p3750_p11 }
 0xb6c   : > { %p3746_p8 = pneg %p3745_p6 }
 0xb6e   : > { %p3753_p4 = pnand %p3752_p12, %p3746_p8 }
 0xb70   : > { %3756 = shalt.err (!%p3753_p4)
}
 0xb71   : > { %3391 = dma.vmem_to_hbm [thread:$0]  (%p3418_p1), %s3105_s12, 32, %s5651_s3, [#allocation9]  }
 0xb72   : > { %s3767_s26 = scalar_lea.vmem %s3128_s15, 64  ;;  %p3774_p3 = scmp.lt.s32.totalorder %s3128_s15, %s3128_s15 }
 0xb73   : > { %p3768_p9 = scmp.ne.s32.totalorder %s3128_s15, %s3767_s26  ;;  %p3775_p10 = scmp.lt.s32.totalorder %s3767_s26, %s3767_s26 }
 0xb75   : > { %p3769_p0 = pnand %p3768_p9, %p3418_p1  ;;  %p3776_p7 = por %p3775_p10, %p3774_p3 }
 0xb77   : > { %p3770_p2 = pneg %p3769_p0 }
 0xb79   : > { %p3777_p5 = pnand %p3776_p7, %p3770_p2 }
 0xb7b   : > { %3780 = shalt.err (!%p3777_p5)
}
 0xb7c   : > { %3395 = dma.vmem_to_hbm [thread:$0]  (%p3418_p1), %s3128_s15, 64, %s5653_s5, [#allocation15], %s3849_s6, %s3849_s6, %s3850_s7  }
 0xb7d   : > { %3816 = dma.done.wait (%p3418_p1), [#allocation9], 32  }
 0xb7e   : > { %3818 = vsyncadd (%p3418_p1), [#allocation9], 4294967264 }
 0xb7f   : > { %3820 = dma.done.wait (%p3418_p1), [#allocation15], 128  }
 0xb80   : > { %3822 = vsyncadd (%p3418_p1), [#allocation15], 4294967168 }
 0xb81 PF: > { %p19_p6 = scmp.ge.s32.totalorder %s3946_s13, 4   ;;  %s6756_s18 = smov %s3829_s19 }
 0xb82   : > { %s6757_s19 = smov %s3833_s20  ;;  %s6758_s20 = smov %s3957_s17 }
 0xb83   : > { %s6759_s21 = smov %s3946_s13  ;;  %21 = sbr.rel (!%p19_p6) target bundleno = 6 (0x6), region = 110 }
 0xb88   :  { %3151 = vsyncpa [#allocation8], 1 }
 0xb89   :  { %3153 = vsyncpa [#allocation8 + $0x1], 1 }
 0xb8a   :  { %3154 = vsyncpa [#allocation11], 1 }
 0xb8b   :  { %3155 = vsyncpa [#allocation9], 1 }
 0xb8c   :  { %3157 = vsyncpa [#allocation9 + $0x1], 1 }
 0xb8d   :  { %3158 = vsyncpa [#allocation15], 1 }

</bundles_post_ra>
